<compile_context>
chip_gen: v7x
topology: tpu7x:2x2x1
jax: 0.10.0
libtpu: 0.0.40
codegen_flags: <defaults>
</compile_context>

<pallas_src>
import math
from functools import partial

import jax
import jax.numpy as jnp
from jax import lax
from jax.experimental import pallas as pl
from jax.experimental.pallas import tpu as pltpu


def transformer_block_kernel(x_ref,
                             ln1s_ref, ln1b_ref,
                             wq_ref, bq_ref, wk_ref, bk_ref, wv_ref, bv_ref,
                             wo_ref, bo_ref,
                             ln2s_ref, ln2b_ref,
                             w1_ref, b1_ref, w2_ref, b2_ref,
                             o_ref,
                             k_scr, v_scr, q_scr, attn_scr,
                             *, num_heads, ff_chunk):
    TQ, D = x_ref.shape
    H = num_heads
    hd = D // H
    qt = pl.program_id(1)
    eps = 1e-5
    neg_big = jnp.float32(-1e30)
    inv_scale = jnp.float32(1.0 / math.sqrt(hd))
    bf = jnp.bfloat16

    def layernorm(v, scale, shift):
        m = jnp.mean(v, axis=-1, keepdims=True)
        var = jnp.mean((v - m) ** 2, axis=-1, keepdims=True)   # unbiased=False
        return (v - m) * lax.rsqrt(var + eps) * scale + shift

    # ---- LN1 + Q/K/V projection of THIS tile only (incremental KV cache) ---
    x_t = x_ref[...].astype(jnp.float32)                        # (TQ, D)
    h_t = layernorm(x_t, ln1s_ref[...], ln1b_ref[...]).astype(bf)

    q = jnp.dot(h_t, wq_ref[...], preferred_element_type=jnp.float32) + bq_ref[...]
    k = jnp.dot(h_t, wk_ref[...], preferred_element_type=jnp.float32) + bk_ref[...]
    v = jnp.dot(h_t, wv_ref[...], preferred_element_type=jnp.float32) + bv_ref[...]
    q = q * inv_scale                       # fold 1/sqrt(hd) into q

    row0 = pl.multiple_of(qt * TQ, TQ)
    # TODO(synk): with hd < 128 this head-major scratch is lane-sparse; a
    # lane-dense packed layout (or fp8 K/V on v7x) would cut store/load cost.
    for h_i in range(H):
        lo, hi = h_i * hd, (h_i + 1) * hd
        k_scr[h_i, pl.ds(row0, TQ), :] = k[:, lo:hi].astype(bf)
        v_scr[h_i, pl.ds(row0, TQ), :] = v[:, lo:hi].astype(bf)
        q_scr[h_i] = q[:, lo:hi].astype(bf)

    q_h = q_scr[...]                                            # (H, TQ, hd) bf16

    # ---- flash-style online softmax over the causal KV prefix --------------
    def attend(k_t, v_t, carry, mask=None):
        m_p, l_p, acc_p = carry
        s = jnp.einsum('hqd,hkd->hqk', q_h, k_t,
                       preferred_element_type=jnp.float32)      # (H, TQ, TK)
        if mask is not None:
            s = jnp.where(mask, s, neg_big)
        m_n = jnp.maximum(m_p, s.max(axis=-1, keepdims=True))
        alpha = jnp.exp(m_p - m_n)
        p = jnp.exp(s - m_n)
        # TODO(synk): attention dropout is identity in eval mode (rate = 0.0).
        l_n = alpha * l_p + p.sum(axis=-1, keepdims=True)
        acc_n = alpha * acc_p + jnp.einsum('hqk,hkd->hqd', p.astype(bf), v_t,
                                           preferred_element_type=jnp.float32)
        return m_n, l_n, acc_n

    def kv_step(kv, carry):                 # off-diagonal tiles: NO mask work
        off = pl.multiple_of(kv * TQ, TQ)
        k_t = k_scr[:, pl.ds(off, TQ), :]
        v_t = v_scr[:, pl.ds(off, TQ), :]
        return attend(k_t, v_t, carry)

    m0 = jnp.full((H, TQ, 1), neg_big, jnp.float32)
    l0 = jnp.zeros((H, TQ, 1), jnp.float32)
    a0 = jnp.zeros((H, TQ, hd), jnp.float32)
    carry = lax.fori_loop(0, qt, kv_step, (m0, l0, a0))

    # diagonal tile: the only place the causal mask is needed
    k_d = k_scr[:, pl.ds(row0, TQ), :]
    v_d = v_scr[:, pl.ds(row0, TQ), :]
    qi = lax.broadcasted_iota(jnp.int32, (TQ, TQ), 0)
    kj = lax.broadcasted_iota(jnp.int32, (TQ, TQ), 1)
    _, l_f, acc_f = attend(k_d, v_d, carry, mask=(kj <= qi)[None, :, :])

    ctx = acc_f * pl.reciprocal(l_f, approx=False)              # (H, TQ, hd) f32
    for h_i in range(H):
        attn_scr[:, h_i * hd:(h_i + 1) * hd] = ctx[h_i].astype(bf)

    # single full-contraction output projection (keeps the MXU filled)
    attn = jnp.dot(attn_scr[...], wo_ref[...],
                   preferred_element_type=jnp.float32) + bo_ref[...]
    # TODO(synk): res_drop is identity in eval mode (rate = 0.0).
    x1 = attn + x_t                                             # (TQ, D) f32

    # ---- sublayer 2: feed-forward (tanh GELU), chunked over hidden dim -----
    h2 = layernorm(x1, ln2s_ref[...], ln2b_ref[...]).astype(bf)
    c0 = jnp.float32(math.sqrt(2.0 / math.pi))
    H4 = w1_ref.shape[1]
    n_chunks = H4 // ff_chunk
    # TODO(synk): for very wide models on v7x, stream W1/W2 chunks from HBM
    # (extra grid axis or manual DMA) instead of keeping them VMEM-resident.

    def ff_step(lo, f_acc):
        a = (jnp.dot(h2, w1_ref[:, pl.ds(lo, ff_chunk)],
                     preferred_element_type=jnp.float32)
             + b1_ref[:, pl.ds(lo, ff_chunk)])
        g = 0.5 * a * (1.0 + jnp.tanh(c0 * (a + 0.044715 * a * a * a)))
        return f_acc + jnp.dot(g.astype(bf), w2_ref[pl.ds(lo, ff_chunk), :],
                               preferred_element_type=jnp.float32)

    f = jnp.zeros((TQ, D), jnp.float32)
    if n_chunks <= 4:                       # short: keep unrolled for LLO
        for ci in range(n_chunks):
            f = ff_step(ci * ff_chunk, f)
    else:                                   # many chunks: bound liveness
        f = lax.fori_loop(
            0, n_chunks,
            lambda ci, fa: ff_step(pl.multiple_of(ci * ff_chunk, ff_chunk), fa),
            f)
    f = f + b2_ref[...]

    o_ref[...] = (f + x1).astype(o_ref.dtype)


# ---------------------------------------------------------------------------
def _pick_tile(n, candidates):
    for c in candidates:
        if n % c == 0:
            return c
    return n


def _device_kind():
    try:
        return jax.devices()[0].device_kind.lower()
    except Exception:
        return ""


def transformer_block(x, params, *, num_heads, q_tile=None, ff_chunk=None):
    B, T, D = x.shape
    (ln1s, ln1b, wq, bq, wk, bk, wv, bv, wo, bo,
     ln2s, ln2b, w1, b1, w2, b2) = params
    H4 = w1.shape[1]
    assert D % num_heads == 0
    hd = D // num_heads

    kind = _device_kind()
    is_v5e = ("v5 lite" in kind) or ("v5e" in kind) or ("v5litepod" in kind)
    is_v7 = ("v7" in kind) or ("7x" in kind)

    if q_tile is None:
        cands = (128, 64, 32, 16, 8) if is_v5e else (256, 128, 64, 32, 16, 8)
        q_tile = _pick_tile(T, cands)
    if ff_chunk is None:
        ff_chunk = _pick_tile(H4, (512, 256, 128))
    assert T % q_tile == 0 and H4 % ff_chunk == 0
    n_qt = T // q_tile

    # bf16 weights feed the MXU (f32 accumulation in-kernel); LN params and
    # biases stay f32 (added to f32 accumulators).
    bf = jnp.bfloat16
    wq_c, wk_c, wv_c, wo_c = (w.astype(bf) for w in (wq, wk, wv, wo))
    w1_c, w2_c = w1.astype(bf), w2.astype(bf)

    args = (x, ln1s, ln1b, wq_c, bq, wk_c, bk, wv_c, bv, wo_c, bo,
            ln2s, ln2b, w1_c, b1, w2_c, b2)
    param_shapes = [(1, D), (1, D),
                    (D, D), (1, D), (D, D), (1, D), (D, D), (1, D),
                    (D, D), (1, D),
                    (1, D), (1, D),
                    (D, H4), (1, H4), (H4, D), (1, D)]

    # --- VMEM estimate & limit (always set; generation-aware cap) -----------
    def vmem_estimate(single_buf):
        wbytes = 2 * (4 * D * D + 2 * D * H4)            # bf16 weights
        pbytes = 4 * (6 * D + 2 * H4)                    # f32 LN params + biases
        io = (4 + x.dtype.itemsize) * q_tile * D         # x tile + out tile
        scratch = 2 * (2 * T * D + 2 * q_tile * D)       # K,V,(q,attn) scratch
        inter = 4 * (3 * num_heads * q_tile * q_tile     # scores / p
                     + 2 * num_heads * q_tile * hd       # acc / ctx
                     + 6 * q_tile * D                    # x, h, qkv, x1, f
                     + 2 * q_tile * ff_chunk)            # ff activation
        wbuf = 1 if single_buf else 2
        return wbuf * wbytes + 2 * (pbytes + io) + scratch + inter

    cap = (56 << 20) if (is_v7 or kind == "") else (100 << 20)

    cost = pl.CostEstimate(
        flops=int(B * (24 * T * D * D + 2 * T * T * D)),
        transcendentals=int(B * (num_heads * T * T // 2 + T * H4)),
        bytes_accessed=int(2 * (4 * D * D + 2 * D * H4) + 8 * B * T * D),
    )

    kernel = partial(transformer_block_kernel, num_heads=num_heads,
                     ff_chunk=ff_chunk)

    def build(single_buffer_weights):
        def wspec(shape):
            # grid-invariant weights: request single buffering to halve
            # resident weight VMEM (critical on v7x's 64 MiB/TC).
            if single_buffer_weights:
                return pl.BlockSpec(shape, lambda b, qt: (0,) * len(shape),
                                    pipeline_mode=pl.Buffered(1))
            return pl.BlockSpec(shape, lambda b, qt: (0,) * len(shape))

        in_specs = ([pl.BlockSpec((None, q_tile, D), lambda b, qt: (b, qt, 0))]
                    + [wspec(s) for s in param_shapes])

        vmem_limit = int(min(cap, max(32 << 20, 2 * vmem_estimate(single_buffer_weights))))

        return pl.pallas_call(
            kernel,
            out_shape=jax.ShapeDtypeStruct((B, T, D), x.dtype),
            grid=(B, n_qt),
            in_specs=in_specs,
            out_specs=pl.BlockSpec((None, q_tile, D), lambda b, qt: (b, qt, 0)),
            scratch_shapes=[
                pltpu.VMEM((num_heads, T, hd), jnp.bfloat16),       # K cache
                pltpu.VMEM((num_heads, T, hd), jnp.bfloat16),       # V cache
                pltpu.VMEM((num_heads, q_tile, hd), jnp.bfloat16),  # q (head-major)
                pltpu.VMEM((q_tile, D), jnp.bfloat16),              # ctx (lane-dense)
            ],
            compiler_params=pltpu.CompilerParams(
                # TODO(synk): qt is sequential because the K/V cache is filled
                # incrementally; a separate K/V projection pre-pass would let
                # it be "parallel" too (helps v7x megacore when B is small).
                dimension_semantics=("parallel", "arbitrary"),
                vmem_limit_bytes=vmem_limit),
            cost_estimate=cost,
        )

    # pl.Buffered(1) support varies across JAX versions; fall back to the
    # default double-buffered specs if construction / lowering rejects it.
    try:
        return jax.block_until_ready(build(True)(*args))
    except Exception:
        return jax.block_until_ready(build(False)(*args))


# ---------------------------------------------------------------------------
def transformer_block_ref(x, params, *, num_heads):
    """Plain-JAX f32 reference (mirrors the PyTorch forward in eval mode)."""
    (ln1s, ln1b, wq, bq, wk, bk, wv, bv, wo, bo,
     ln2s, ln2b, w1, b1, w2, b2) = params
    eps = 1e-5

    def ln(v, s, b):
        m = jnp.mean(v, axis=-1, keepdims=True)
        var = jnp.mean((v - m) ** 2, axis=-1, keepdims=True)
        return (v - m) / jnp.sqrt(var + eps) * s + b

    B, T, D = x.shape
    hd = D // num_heads
    h = ln(x, ln1s, ln1b)
    q = h @ wq + bq
    k = h @ wk + bk
    v = h @ wv + bv
    q = q.reshape(B, T, num_heads, hd).transpose(0, 2, 1, 3)
    k = k.reshape(B, T, num_heads, hd).transpose(0, 2, 1, 3)
    v = v.reshape(B, T, num_heads, hd).transpose(0, 2, 1, 3)
    s = jnp.einsum('bhqd,bhkd->bhqk', q, k) / math.sqrt(hd)
    mask = jnp.triu(jnp.ones((T, T), bool), k=1)
    s = jnp.where(mask, -jnp.inf, s)
    p = jax.nn.softmax(s, axis=-1)
    ctx = jnp.einsum('bhqk,bhkd->bhqd', p, v).transpose(0, 2, 1, 3).reshape(B, T, D)
    x1 = ctx @ wo + bo + x
    h2 = ln(x1, ln2s, ln2b)
    a = h2 @ w1 + b1
    g = 0.5 * a * (1.0 + jnp.tanh(math.sqrt(2.0 / math.pi) * (a + 0.044715 * a ** 3)))
    return g @ w2 + b2 + x1


def _make_params(key, D):
    H4 = 4 * D
    ks = jax.random.split(key, 16)
    ln1s = 1.0 + 0.1 * jax.random.normal(ks[0], (1, D), jnp.float32)
    ln1b = 0.1 * jax.random.normal(ks[1], (1, D), jnp.float32)
    ln2s = 1.0 + 0.1 * jax.random.normal(ks[2], (1, D), jnp.float32)
    ln2b = 0.1 * jax.random.normal(ks[3], (1, D), jnp.float32)
    wq = 0.05 * jax.random.normal(ks[4], (D, D), jnp.float32)
    wk = 0.05 * jax.random.normal(ks[5], (D, D), jnp.float32)
    wv = 0.05 * jax.random.normal(ks[6], (D, D), jnp.float32)
    wo = 0.05 * jax.random.normal(ks[7], (D, D), jnp.float32)
    bq = 0.05 * jax.random.normal(ks[8], (1, D), jnp.float32)
    bk = 0.05 * jax.random.normal(ks[9], (1, D), jnp.float32)
    bv = 0.05 * jax.random.normal(ks[10], (1, D), jnp.float32)
    bo = 0.05 * jax.random.normal(ks[11], (1, D), jnp.float32)
    w1 = 0.05 * jax.random.normal(ks[12], (D, H4), jnp.float32)
    b1 = 0.05 * jax.random.normal(ks[13], (1, H4), jnp.float32)
    w2 = 0.05 * jax.random.normal(ks[14], (H4, D), jnp.float32)
    b2 = 0.05 * jax.random.normal(ks[15], (1, D), jnp.float32)
    return (ln1s, ln1b, wq, bq, wk, bk, wv, bv, wo, bo,
            ln2s, ln2b, w1, b1, w2, b2)


if __name__ == "__main__":
    key = jax.random.PRNGKey(0)
    k1, k2, k3, k4 = jax.random.split(key, 4)

    # config 1: module's toy config (B=2, T=8, D=32, 4 heads) -> single q tile
    B, T, D, H = 2, 8, 32, 4
    x = jax.random.normal(k1, (B, T, D), jnp.float32)
    params = _make_params(k2, D)
    out = jax.block_until_ready(transformer_block(x, params, num_heads=H))
    ref = transformer_block_ref(x, params, num_heads=H)
    assert out.shape == (B, T, D)
    assert jnp.allclose(out, ref, atol=3e-2, rtol=3e-2), "config-1 mismatch vs reference"

    # config 2: longer sequence + wider model -> multiple query tiles (tests the
    # incremental K/V cache, the off-diagonal/diagonal split and FF chunking).
    B2, T2, D2, H2 = 2, 16, 64, 4
    x2 = jax.random.normal(k3, (B2, T2, D2), jnp.float32)
    params2 = _make_params(k4, D2)
    out2 = jax.block_until_ready(
        transformer_block(x2, params2, num_heads=H2, q_tile=8, ff_chunk=128))
    ref2 = transformer_block_ref(x2, params2, num_heads=H2)
    assert out2.shape == (B2, T2, D2)
    assert jnp.allclose(out2, ref2, atol=3e-2, rtol=3e-2), "config-2 mismatch vs reference"

    print("KERNEL_OK")
</pallas_src>

<mosaic_0001>
module attributes {stable_mosaic.version = 11 : i64} {
  func.func @transformer_block_kernel(%arg0: i32, %arg1: i32, %arg2: memref<1x8x32xf32, #tpu.memory_space<vmem>>, %arg3: memref<1x32xf32, #tpu.memory_space<vmem>>, %arg4: memref<1x32xf32, #tpu.memory_space<vmem>>, %arg5: memref<32x32xbf16, #tpu.memory_space<vmem>>, %arg6: memref<1x32xf32, #tpu.memory_space<vmem>>, %arg7: memref<32x32xbf16, #tpu.memory_space<vmem>>, %arg8: memref<1x32xf32, #tpu.memory_space<vmem>>, %arg9: memref<32x32xbf16, #tpu.memory_space<vmem>>, %arg10: memref<1x32xf32, #tpu.memory_space<vmem>>, %arg11: memref<32x32xbf16, #tpu.memory_space<vmem>>, %arg12: memref<1x32xf32, #tpu.memory_space<vmem>>, %arg13: memref<1x32xf32, #tpu.memory_space<vmem>>, %arg14: memref<1x32xf32, #tpu.memory_space<vmem>>, %arg15: memref<32x128xbf16, #tpu.memory_space<vmem>>, %arg16: memref<1x128xf32, #tpu.memory_space<vmem>>, %arg17: memref<128x32xbf16, #tpu.memory_space<vmem>>, %arg18: memref<1x32xf32, #tpu.memory_space<vmem>>, %arg19: memref<1x8x32xf32, #tpu.memory_space<vmem>>, %arg20: memref<4x8x8xbf16, #tpu.memory_space<vmem>>, %arg21: memref<4x8x8xbf16, #tpu.memory_space<vmem>>, %arg22: memref<4x8x8xbf16, #tpu.memory_space<vmem>>, %arg23: memref<8x32xbf16, #tpu.memory_space<vmem>>) attributes {dimension_semantics = [#tpu.dimension_semantics<parallel>, #tpu.dimension_semantics<arbitrary>], iteration_bounds = array<i64: 2, 1>, scalar_prefetch = 0 : i64, scratch_operands = 4 : i64, tpu.core_type = #tpu.core_type<tc>, window_params = [{transform_indices = @transform_0, window_bounds = array<i64: 1, 8, 32>}, {pipeline_mode = #tpu.pipeline_mode<synchronous>, transform_indices = @transform_1, window_bounds = array<i64: 1, 32>}, {pipeline_mode = #tpu.pipeline_mode<synchronous>, transform_indices = @transform_2, window_bounds = array<i64: 1, 32>}, {pipeline_mode = #tpu.pipeline_mode<synchronous>, transform_indices = @transform_3, window_bounds = array<i64: 32, 32>}, {pipeline_mode = #tpu.pipeline_mode<synchronous>, transform_indices = @transform_4, window_bounds = array<i64: 1, 32>}, {pipeline_mode = #tpu.pipeline_mode<synchronous>, transform_indices = @transform_5, window_bounds = array<i64: 32, 32>}, {pipeline_mode = #tpu.pipeline_mode<synchronous>, transform_indices = @transform_6, window_bounds = array<i64: 1, 32>}, {pipeline_mode = #tpu.pipeline_mode<synchronous>, transform_indices = @transform_7, window_bounds = array<i64: 32, 32>}, {pipeline_mode = #tpu.pipeline_mode<synchronous>, transform_indices = @transform_8, window_bounds = array<i64: 1, 32>}, {pipeline_mode = #tpu.pipeline_mode<synchronous>, transform_indices = @transform_9, window_bounds = array<i64: 32, 32>}, {pipeline_mode = #tpu.pipeline_mode<synchronous>, transform_indices = @transform_10, window_bounds = array<i64: 1, 32>}, {pipeline_mode = #tpu.pipeline_mode<synchronous>, transform_indices = @transform_11, window_bounds = array<i64: 1, 32>}, {pipeline_mode = #tpu.pipeline_mode<synchronous>, transform_indices = @transform_12, window_bounds = array<i64: 1, 32>}, {pipeline_mode = #tpu.pipeline_mode<synchronous>, transform_indices = @transform_13, window_bounds = array<i64: 32, 128>}, {pipeline_mode = #tpu.pipeline_mode<synchronous>, transform_indices = @transform_14, window_bounds = array<i64: 1, 128>}, {pipeline_mode = #tpu.pipeline_mode<synchronous>, transform_indices = @transform_15, window_bounds = array<i64: 128, 32>}, {pipeline_mode = #tpu.pipeline_mode<synchronous>, transform_indices = @transform_16, window_bounds = array<i64: 1, 32>}, {transform_indices = @transform_17, window_bounds = array<i64: 1, 8, 32>}]} {
    %c0 = arith.constant 0 : index
    %c0_0 = arith.constant 0 : index
    %c0_1 = arith.constant 0 : index
    %0 = vector.load %arg2[%c0, %c0_0, %c0_1] : memref<1x8x32xf32, #tpu.memory_space<vmem>>, vector<1x8x32xf32>
    %1 = vector.shape_cast %0 : vector<1x8x32xf32> to vector<8x32xf32>
    %c0_2 = arith.constant 0 : index
    %c0_3 = arith.constant 0 : index
    %2 = vector.load %arg3[%c0_2, %c0_3] : memref<1x32xf32, #tpu.memory_space<vmem>>, vector<1x32xf32>
    %c0_4 = arith.constant 0 : index
    %c0_5 = arith.constant 0 : index
    %3 = vector.load %arg4[%c0_4, %c0_5] : memref<1x32xf32, #tpu.memory_space<vmem>>, vector<1x32xf32>
    %cst = arith.constant dense<0.000000e+00> : vector<8xf32>
    %4 = vector.multi_reduction <add>, %1, %cst [1] : vector<8x32xf32> to vector<8xf32>
    %5 = vector.shape_cast %4 : vector<8xf32> to vector<8x1xf32>
    %cst_6 = arith.constant 3.200000e+01 : f32
    %6 = vector.broadcast %cst_6 : f32 to vector<8x1xf32>
    %7 = arith.divf %5, %6 : vector<8x1xf32>
    %8 = vector.broadcast %7 : vector<8x1xf32> to vector<8x32xf32>
    %9 = arith.subf %1, %8 : vector<8x32xf32>
    %10 = arith.mulf %9, %9 : vector<8x32xf32>
    %cst_7 = arith.constant dense<0.000000e+00> : vector<8xf32>
    %11 = vector.multi_reduction <add>, %10, %cst_7 [1] : vector<8x32xf32> to vector<8xf32>
    %12 = vector.shape_cast %11 : vector<8xf32> to vector<8x1xf32>
    %cst_8 = arith.constant 3.200000e+01 : f32
    %13 = vector.broadcast %cst_8 : f32 to vector<8x1xf32>
    %14 = arith.divf %12, %13 : vector<8x1xf32>
    %15 = vector.broadcast %7 : vector<8x1xf32> to vector<8x32xf32>
    %16 = arith.subf %1, %15 : vector<8x32xf32>
    %cst_9 = arith.constant 9.99999974E-6 : f32
    %17 = vector.broadcast %cst_9 : f32 to vector<8x1xf32>
    %18 = arith.addf %14, %17 : vector<8x1xf32>
    %19 = math.rsqrt %18 : vector<8x1xf32>
    %20 = vector.broadcast %19 : vector<8x1xf32> to vector<8x32xf32>
    %21 = arith.mulf %16, %20 : vector<8x32xf32>
    %22 = vector.broadcast %2 : vector<1x32xf32> to vector<8x32xf32>
    %23 = arith.mulf %21, %22 : vector<8x32xf32>
    %24 = vector.broadcast %3 : vector<1x32xf32> to vector<8x32xf32>
    %25 = arith.addf %23, %24 : vector<8x32xf32>
    %26 = arith.truncf %25 : vector<8x32xf32> to vector<8x32xbf16>
    %c0_10 = arith.constant 0 : index
    %c0_11 = arith.constant 0 : index
    %27 = vector.load %arg5[%c0_10, %c0_11] : memref<32x32xbf16, #tpu.memory_space<vmem>>, vector<32x32xbf16>
    %cst_12 = arith.constant dense<0.000000e+00> : vector<8x32xf32>
    %28 = tpu.matmul %26, %27, %cst_12 {dimension_numbers = #tpu.dot_dimension_numbers<[1], [0], [0], [1], [0, 0, 1, 1], [], []>} : vector<8x32xbf16>, vector<32x32xbf16>, vector<8x32xf32> -> vector<8x32xf32>
    %c0_13 = arith.constant 0 : index
    %c0_14 = arith.constant 0 : index
    %29 = vector.load %arg6[%c0_13, %c0_14] : memref<1x32xf32, #tpu.memory_space<vmem>>, vector<1x32xf32>
    %30 = vector.broadcast %29 : vector<1x32xf32> to vector<8x32xf32>
    %31 = arith.addf %28, %30 : vector<8x32xf32>
    %c0_15 = arith.constant 0 : index
    %c0_16 = arith.constant 0 : index
    %32 = vector.load %arg7[%c0_15, %c0_16] : memref<32x32xbf16, #tpu.memory_space<vmem>>, vector<32x32xbf16>
    %cst_17 = arith.constant dense<0.000000e+00> : vector<8x32xf32>
    %33 = tpu.matmul %26, %32, %cst_17 {dimension_numbers = #tpu.dot_dimension_numbers<[1], [0], [0], [1], [0, 0, 1, 1], [], []>} : vector<8x32xbf16>, vector<32x32xbf16>, vector<8x32xf32> -> vector<8x32xf32>
    %c0_18 = arith.constant 0 : index
    %c0_19 = arith.constant 0 : index
    %34 = vector.load %arg8[%c0_18, %c0_19] : memref<1x32xf32, #tpu.memory_space<vmem>>, vector<1x32xf32>
    %35 = vector.broadcast %34 : vector<1x32xf32> to vector<8x32xf32>
    %36 = arith.addf %33, %35 : vector<8x32xf32>
    %c0_20 = arith.constant 0 : index
    %c0_21 = arith.constant 0 : index
    %37 = vector.load %arg9[%c0_20, %c0_21] : memref<32x32xbf16, #tpu.memory_space<vmem>>, vector<32x32xbf16>
    %cst_22 = arith.constant dense<0.000000e+00> : vector<8x32xf32>
    %38 = tpu.matmul %26, %37, %cst_22 {dimension_numbers = #tpu.dot_dimension_numbers<[1], [0], [0], [1], [0, 0, 1, 1], [], []>} : vector<8x32xbf16>, vector<32x32xbf16>, vector<8x32xf32> -> vector<8x32xf32>
    %c0_23 = arith.constant 0 : index
    %c0_24 = arith.constant 0 : index
    %39 = vector.load %arg10[%c0_23, %c0_24] : memref<1x32xf32, #tpu.memory_space<vmem>>, vector<1x32xf32>
    %40 = vector.broadcast %39 : vector<1x32xf32> to vector<8x32xf32>
    %41 = arith.addf %38, %40 : vector<8x32xf32>
    %cst_25 = arith.constant 0.353553385 : f32
    %42 = vector.broadcast %cst_25 : f32 to vector<8x32xf32>
    %43 = arith.mulf %31, %42 : vector<8x32xf32>
    %c8_i32 = arith.constant 8 : i32
    %44 = arith.muli %arg1, %c8_i32 : i32
    %45 = tpu.assume_multiple %44, 8 : i32
    %46 = vector.extract_strided_slice %36 {offsets = [0, 0], sizes = [8, 8], strides = [1, 1]} : vector<8x32xf32> to vector<8x8xf32>
    %47 = arith.truncf %46 : vector<8x8xf32> to vector<8x8xbf16>
    %c0_26 = arith.constant 0 : index
    %48 = arith.index_cast %45 : i32 to index
    %c0_27 = arith.constant 0 : index
    %49 = vector.load %arg20[%c0_26, %48, %c0_27] : memref<4x8x8xbf16, #tpu.memory_space<vmem>>, vector<1x8x8xbf16>
    %50 = vector.shape_cast %49 : vector<1x8x8xbf16> to vector<8x8xbf16>
    %51 = vector.shape_cast %47 : vector<8x8xbf16> to vector<1x8x8xbf16>
    tpu.vector_store %arg20[%c0_26, %48, %c0_27], %51 {strides = array<i32>} : memref<4x8x8xbf16, #tpu.memory_space<vmem>>, vector<1x8x8xbf16>,
    %52 = vector.extract_strided_slice %41 {offsets = [0, 0], sizes = [8, 8], strides = [1, 1]} : vector<8x32xf32> to vector<8x8xf32>
    %53 = arith.truncf %52 : vector<8x8xf32> to vector<8x8xbf16>
    %c0_28 = arith.constant 0 : index
    %54 = arith.index_cast %45 : i32 to index
    %c0_29 = arith.constant 0 : index
    %55 = vector.load %arg21[%c0_28, %54, %c0_29] : memref<4x8x8xbf16, #tpu.memory_space<vmem>>, vector<1x8x8xbf16>
    %56 = vector.shape_cast %55 : vector<1x8x8xbf16> to vector<8x8xbf16>
    %57 = vector.shape_cast %53 : vector<8x8xbf16> to vector<1x8x8xbf16>
    tpu.vector_store %arg21[%c0_28, %54, %c0_29], %57 {strides = array<i32>} : memref<4x8x8xbf16, #tpu.memory_space<vmem>>, vector<1x8x8xbf16>,
    %58 = vector.extract_strided_slice %43 {offsets = [0, 0], sizes = [8, 8], strides = [1, 1]} : vector<8x32xf32> to vector<8x8xf32>
    %59 = arith.truncf %58 : vector<8x8xf32> to vector<8x8xbf16>
    %c0_30 = arith.constant 0 : index
    %c0_31 = arith.constant 0 : index
    %c0_32 = arith.constant 0 : index
    %60 = vector.load %arg22[%c0_30, %c0_31, %c0_32] : memref<4x8x8xbf16, #tpu.memory_space<vmem>>, vector<1x8x8xbf16>
    %61 = vector.shape_cast %60 : vector<1x8x8xbf16> to vector<8x8xbf16>
    %62 = vector.shape_cast %59 : vector<8x8xbf16> to vector<1x8x8xbf16>
    tpu.vector_store %arg22[%c0_30, %c0_31, %c0_32], %62 {strides = array<i32>} : memref<4x8x8xbf16, #tpu.memory_space<vmem>>, vector<1x8x8xbf16>,
    %63 = vector.extract_strided_slice %36 {offsets = [0, 8], sizes = [8, 8], strides = [1, 1]} : vector<8x32xf32> to vector<8x8xf32>
    %64 = arith.truncf %63 : vector<8x8xf32> to vector<8x8xbf16>
    %c1 = arith.constant 1 : index
    %65 = arith.index_cast %45 : i32 to index
    %c0_33 = arith.constant 0 : index
    %66 = vector.load %arg20[%c1, %65, %c0_33] : memref<4x8x8xbf16, #tpu.memory_space<vmem>>, vector<1x8x8xbf16>
    %67 = vector.shape_cast %66 : vector<1x8x8xbf16> to vector<8x8xbf16>
    %68 = vector.shape_cast %64 : vector<8x8xbf16> to vector<1x8x8xbf16>
    tpu.vector_store %arg20[%c1, %65, %c0_33], %68 {strides = array<i32>} : memref<4x8x8xbf16, #tpu.memory_space<vmem>>, vector<1x8x8xbf16>,
    %69 = vector.extract_strided_slice %41 {offsets = [0, 8], sizes = [8, 8], strides = [1, 1]} : vector<8x32xf32> to vector<8x8xf32>
    %70 = arith.truncf %69 : vector<8x8xf32> to vector<8x8xbf16>
    %c1_34 = arith.constant 1 : index
    %71 = arith.index_cast %45 : i32 to index
    %c0_35 = arith.constant 0 : index
    %72 = vector.load %arg21[%c1_34, %71, %c0_35] : memref<4x8x8xbf16, #tpu.memory_space<vmem>>, vector<1x8x8xbf16>
    %73 = vector.shape_cast %72 : vector<1x8x8xbf16> to vector<8x8xbf16>
    %74 = vector.shape_cast %70 : vector<8x8xbf16> to vector<1x8x8xbf16>
    tpu.vector_store %arg21[%c1_34, %71, %c0_35], %74 {strides = array<i32>} : memref<4x8x8xbf16, #tpu.memory_space<vmem>>, vector<1x8x8xbf16>,
    %75 = vector.extract_strided_slice %43 {offsets = [0, 8], sizes = [8, 8], strides = [1, 1]} : vector<8x32xf32> to vector<8x8xf32>
    %76 = arith.truncf %75 : vector<8x8xf32> to vector<8x8xbf16>
    %c1_36 = arith.constant 1 : index
    %c0_37 = arith.constant 0 : index
    %c0_38 = arith.constant 0 : index
    %77 = vector.load %arg22[%c1_36, %c0_37, %c0_38] : memref<4x8x8xbf16, #tpu.memory_space<vmem>>, vector<1x8x8xbf16>
    %78 = vector.shape_cast %77 : vector<1x8x8xbf16> to vector<8x8xbf16>
    %79 = vector.shape_cast %76 : vector<8x8xbf16> to vector<1x8x8xbf16>
    tpu.vector_store %arg22[%c1_36, %c0_37, %c0_38], %79 {strides = array<i32>} : memref<4x8x8xbf16, #tpu.memory_space<vmem>>, vector<1x8x8xbf16>,
    %80 = vector.extract_strided_slice %36 {offsets = [0, 16], sizes = [8, 8], strides = [1, 1]} : vector<8x32xf32> to vector<8x8xf32>
    %81 = arith.truncf %80 : vector<8x8xf32> to vector<8x8xbf16>
    %c2 = arith.constant 2 : index
    %82 = arith.index_cast %45 : i32 to index
    %c0_39 = arith.constant 0 : index
    %83 = vector.load %arg20[%c2, %82, %c0_39] : memref<4x8x8xbf16, #tpu.memory_space<vmem>>, vector<1x8x8xbf16>
    %84 = vector.shape_cast %83 : vector<1x8x8xbf16> to vector<8x8xbf16>
    %85 = vector.shape_cast %81 : vector<8x8xbf16> to vector<1x8x8xbf16>
    tpu.vector_store %arg20[%c2, %82, %c0_39], %85 {strides = array<i32>} : memref<4x8x8xbf16, #tpu.memory_space<vmem>>, vector<1x8x8xbf16>,
    %86 = vector.extract_strided_slice %41 {offsets = [0, 16], sizes = [8, 8], strides = [1, 1]} : vector<8x32xf32> to vector<8x8xf32>
    %87 = arith.truncf %86 : vector<8x8xf32> to vector<8x8xbf16>
    %c2_40 = arith.constant 2 : index
    %88 = arith.index_cast %45 : i32 to index
    %c0_41 = arith.constant 0 : index
    %89 = vector.load %arg21[%c2_40, %88, %c0_41] : memref<4x8x8xbf16, #tpu.memory_space<vmem>>, vector<1x8x8xbf16>
    %90 = vector.shape_cast %89 : vector<1x8x8xbf16> to vector<8x8xbf16>
    %91 = vector.shape_cast %87 : vector<8x8xbf16> to vector<1x8x8xbf16>
    tpu.vector_store %arg21[%c2_40, %88, %c0_41], %91 {strides = array<i32>} : memref<4x8x8xbf16, #tpu.memory_space<vmem>>, vector<1x8x8xbf16>,
    %92 = vector.extract_strided_slice %43 {offsets = [0, 16], sizes = [8, 8], strides = [1, 1]} : vector<8x32xf32> to vector<8x8xf32>
    %93 = arith.truncf %92 : vector<8x8xf32> to vector<8x8xbf16>
    %c2_42 = arith.constant 2 : index
    %c0_43 = arith.constant 0 : index
    %c0_44 = arith.constant 0 : index
    %94 = vector.load %arg22[%c2_42, %c0_43, %c0_44] : memref<4x8x8xbf16, #tpu.memory_space<vmem>>, vector<1x8x8xbf16>
    %95 = vector.shape_cast %94 : vector<1x8x8xbf16> to vector<8x8xbf16>
    %96 = vector.shape_cast %93 : vector<8x8xbf16> to vector<1x8x8xbf16>
    tpu.vector_store %arg22[%c2_42, %c0_43, %c0_44], %96 {strides = array<i32>} : memref<4x8x8xbf16, #tpu.memory_space<vmem>>, vector<1x8x8xbf16>,
    %97 = vector.extract_strided_slice %36 {offsets = [0, 24], sizes = [8, 8], strides = [1, 1]} : vector<8x32xf32> to vector<8x8xf32>
    %98 = arith.truncf %97 : vector<8x8xf32> to vector<8x8xbf16>
    %c3 = arith.constant 3 : index
    %99 = arith.index_cast %45 : i32 to index
    %c0_45 = arith.constant 0 : index
    %100 = vector.load %arg20[%c3, %99, %c0_45] : memref<4x8x8xbf16, #tpu.memory_space<vmem>>, vector<1x8x8xbf16>
    %101 = vector.shape_cast %100 : vector<1x8x8xbf16> to vector<8x8xbf16>
    %102 = vector.shape_cast %98 : vector<8x8xbf16> to vector<1x8x8xbf16>
    tpu.vector_store %arg20[%c3, %99, %c0_45], %102 {strides = array<i32>} : memref<4x8x8xbf16, #tpu.memory_space<vmem>>, vector<1x8x8xbf16>,
    %103 = vector.extract_strided_slice %41 {offsets = [0, 24], sizes = [8, 8], strides = [1, 1]} : vector<8x32xf32> to vector<8x8xf32>
    %104 = arith.truncf %103 : vector<8x8xf32> to vector<8x8xbf16>
    %c3_46 = arith.constant 3 : index
    %105 = arith.index_cast %45 : i32 to index
    %c0_47 = arith.constant 0 : index
    %106 = vector.load %arg21[%c3_46, %105, %c0_47] : memref<4x8x8xbf16, #tpu.memory_space<vmem>>, vector<1x8x8xbf16>
    %107 = vector.shape_cast %106 : vector<1x8x8xbf16> to vector<8x8xbf16>
    %108 = vector.shape_cast %104 : vector<8x8xbf16> to vector<1x8x8xbf16>
    tpu.vector_store %arg21[%c3_46, %105, %c0_47], %108 {strides = array<i32>} : memref<4x8x8xbf16, #tpu.memory_space<vmem>>, vector<1x8x8xbf16>,
    %109 = vector.extract_strided_slice %43 {offsets = [0, 24], sizes = [8, 8], strides = [1, 1]} : vector<8x32xf32> to vector<8x8xf32>
    %110 = arith.truncf %109 : vector<8x8xf32> to vector<8x8xbf16>
    %c3_48 = arith.constant 3 : index
    %c0_49 = arith.constant 0 : index
    %c0_50 = arith.constant 0 : index
    %111 = vector.load %arg22[%c3_48, %c0_49, %c0_50] : memref<4x8x8xbf16, #tpu.memory_space<vmem>>, vector<1x8x8xbf16>
    %112 = vector.shape_cast %111 : vector<1x8x8xbf16> to vector<8x8xbf16>
    %113 = vector.shape_cast %110 : vector<8x8xbf16> to vector<1x8x8xbf16>
    tpu.vector_store %arg22[%c3_48, %c0_49, %c0_50], %113 {strides = array<i32>} : memref<4x8x8xbf16, #tpu.memory_space<vmem>>, vector<1x8x8xbf16>,
    %c0_51 = arith.constant 0 : index
    %c0_52 = arith.constant 0 : index
    %c0_53 = arith.constant 0 : index
    %114 = vector.load %arg22[%c0_51, %c0_52, %c0_53] : memref<4x8x8xbf16, #tpu.memory_space<vmem>>, vector<4x8x8xbf16>
    %cst_54 = arith.constant -1.000000e+30 : f32
    %115 = vector.broadcast %cst_54 : f32 to vector<4x8x1xf32>
    %cst_55 = arith.constant 0.000000e+00 : f32
    %116 = vector.broadcast %cst_55 : f32 to vector<4x8x1xf32>
    %cst_56 = arith.constant 0.000000e+00 : f32
    %117 = vector.broadcast %cst_56 : f32 to vector<4x8x8xf32>
    %c0_i32 = arith.constant 0 : i32
    %118 = arith.subi %arg1, %c0_i32 : i32
    %119 = arith.addi %c0_i32, %118 : i32
    %c1_i32 = arith.constant 1 : i32
    %120:3 = scf.for %arg24 = %c0_i32 to %119 step %c1_i32 iter_args(%arg25 = %115, %arg26 = %116, %arg27 = %117) -> (vector<4x8x1xf32>, vector<4x8x1xf32>, vector<4x8x8xf32>)  : i32 {
      %c8_i32_105 = arith.constant 8 : i32
      %232 = arith.muli %arg24, %c8_i32_105 : i32
      %233 = tpu.assume_multiple %232, 8 : i32
      %c0_106 = arith.constant 0 : index
      %234 = arith.index_cast %233 : i32 to index
      %c0_107 = arith.constant 0 : index
      %235 = vector.load %arg20[%c0_106, %234, %c0_107] : memref<4x8x8xbf16, #tpu.memory_space<vmem>>, vector<4x8x8xbf16>
      %c0_108 = arith.constant 0 : index
      %236 = arith.index_cast %233 : i32 to index
      %c0_109 = arith.constant 0 : index
      %237 = vector.load %arg21[%c0_108, %236, %c0_109] : memref<4x8x8xbf16, #tpu.memory_space<vmem>>, vector<4x8x8xbf16>
      "tpu.trace_start"() <{level = 10 : i32, message = "hqd,hkd->hqk"}> : () -> ()
      %cst_110 = arith.constant dense<0.000000e+00> : vector<4x8x8xf32>
      %238 = tpu.matmul %114, %235, %cst_110 {dimension_numbers = #tpu.dot_dimension_numbers<[2], [2], [1], [1], [0, 0, 0, 1, 1, 1], [0], [0]>} : vector<4x8x8xbf16>, vector<4x8x8xbf16>, vector<4x8x8xf32> -> vector<4x8x8xf32>
      "tpu.trace_stop"() : () -> ()
      %cst_111 = arith.constant dense<0xFF800000> : vector<4x8xf32>
      %239 = vector.multi_reduction <maximumf>, %238, %cst_111 [2] : vector<4x8x8xf32> to vector<4x8xf32>
      %240 = vector.shape_cast %239 : vector<4x8xf32> to vector<4x8x1xf32>
      %241 = arith.maximumf %arg25, %240 : vector<4x8x1xf32>
      %242 = arith.subf %arg25, %241 : vector<4x8x1xf32>
      %243 = math.exp %242 : vector<4x8x1xf32>
      %244 = vector.broadcast %241 : vector<4x8x1xf32> to vector<4x8x8xf32>
      %245 = arith.subf %238, %244 : vector<4x8x8xf32>
      %246 = math.exp %245 : vector<4x8x8xf32>
      %247 = arith.mulf %243, %arg26 : vector<4x8x1xf32>
      %cst_112 = arith.constant dense<0.000000e+00> : vector<4x8xf32>
      %248 = vector.multi_reduction <add>, %246, %cst_112 [2] : vector<4x8x8xf32> to vector<4x8xf32>
      %249 = vector.shape_cast %248 : vector<4x8xf32> to vector<4x8x1xf32>
      %250 = arith.addf %247, %249 : vector<4x8x1xf32>
      %251 = vector.broadcast %243 : vector<4x8x1xf32> to vector<4x8x8xf32>
      %252 = arith.mulf %251, %arg27 : vector<4x8x8xf32>
      %253 = arith.truncf %246 : vector<4x8x8xf32> to vector<4x8x8xbf16>
      "tpu.trace_start"() <{level = 10 : i32, message = "hqk,hkd->hqd"}> : () -> ()
      %cst_113 = arith.constant dense<0.000000e+00> : vector<4x8x8xf32>
      %254 = tpu.matmul %253, %237, %cst_113 {dimension_numbers = #tpu.dot_dimension_numbers<[2], [1], [1], [2], [0, 0, 0, 1, 1, 2], [0], [0]>} : vector<4x8x8xbf16>, vector<4x8x8xbf16>, vector<4x8x8xf32> -> vector<4x8x8xf32>
      "tpu.trace_stop"() : () -> ()
      %255 = arith.addf %252, %254 : vector<4x8x8xf32>
      scf.yield %241, %250, %255 : vector<4x8x1xf32>, vector<4x8x1xf32>, vector<4x8x8xf32>
    }
    %c0_57 = arith.constant 0 : index
    %121 = arith.index_cast %45 : i32 to index
    %c0_58 = arith.constant 0 : index
    %122 = vector.load %arg20[%c0_57, %121, %c0_58] : memref<4x8x8xbf16, #tpu.memory_space<vmem>>, vector<4x8x8xbf16>
    %c0_59 = arith.constant 0 : index
    %123 = arith.index_cast %45 : i32 to index
    %c0_60 = arith.constant 0 : index
    %124 = vector.load %arg21[%c0_59, %123, %c0_60] : memref<4x8x8xbf16, #tpu.memory_space<vmem>>, vector<4x8x8xbf16>
    %125 = tpu.iota {dimensions = array<i32: 0>} : vector<8x8xi32>
    %126 = tpu.iota {dimensions = array<i32: 1>} : vector<8x8xi32>
    %127 = arith.cmpi sle, %126, %125 : vector<8x8xi32>
    %128 = vector.shape_cast %127 : vector<8x8xi1> to vector<1x8x8xi1>
    "tpu.trace_start"() <{level = 10 : i32, message = "hqd,hkd->hqk"}> : () -> ()
    %cst_61 = arith.constant dense<0.000000e+00> : vector<4x8x8xf32>
    %129 = tpu.matmul %114, %122, %cst_61 {dimension_numbers = #tpu.dot_dimension_numbers<[2], [2], [1], [1], [0, 0, 0, 1, 1, 1], [0], [0]>} : vector<4x8x8xbf16>, vector<4x8x8xbf16>, vector<4x8x8xf32> -> vector<4x8x8xf32>
    %cst_62 = arith.constant -1.000000e+30 : f32
    "tpu.trace_stop"() : () -> ()
    %130 = vector.shape_cast %128 : vector<1x8x8xi1> to vector<1x8x8xi1>
    %131 = vector.broadcast %130 : vector<1x8x8xi1> to vector<4x8x8xi1>
    %132 = vector.broadcast %cst_62 : f32 to vector<4x8x8xf32>
    %133 = arith.select %131, %129, %132 : vector<4x8x8xi1>, vector<4x8x8xf32>
    %cst_63 = arith.constant dense<0xFF800000> : vector<4x8xf32>
    %134 = vector.multi_reduction <maximumf>, %133, %cst_63 [2] : vector<4x8x8xf32> to vector<4x8xf32>
    %135 = vector.shape_cast %134 : vector<4x8xf32> to vector<4x8x1xf32>
    %136 = arith.maximumf %120#0, %135 : vector<4x8x1xf32>
    %137 = arith.subf %120#0, %136 : vector<4x8x1xf32>
    %138 = math.exp %137 : vector<4x8x1xf32>
    %139 = vector.broadcast %136 : vector<4x8x1xf32> to vector<4x8x8xf32>
    %140 = arith.subf %133, %139 : vector<4x8x8xf32>
    %141 = math.exp %140 : vector<4x8x8xf32>
    %142 = arith.mulf %138, %120#1 : vector<4x8x1xf32>
    %cst_64 = arith.constant dense<0.000000e+00> : vector<4x8xf32>
    %143 = vector.multi_reduction <add>, %141, %cst_64 [2] : vector<4x8x8xf32> to vector<4x8xf32>
    %144 = vector.shape_cast %143 : vector<4x8xf32> to vector<4x8x1xf32>
    %145 = arith.addf %142, %144 : vector<4x8x1xf32>
    %146 = vector.broadcast %138 : vector<4x8x1xf32> to vector<4x8x8xf32>
    %147 = arith.mulf %146, %120#2 : vector<4x8x8xf32>
    %148 = arith.truncf %141 : vector<4x8x8xf32> to vector<4x8x8xbf16>
    "tpu.trace_start"() <{level = 10 : i32, message = "hqk,hkd->hqd"}> : () -> ()
    %cst_65 = arith.constant dense<0.000000e+00> : vector<4x8x8xf32>
    %149 = tpu.matmul %148, %124, %cst_65 {dimension_numbers = #tpu.dot_dimension_numbers<[2], [1], [1], [2], [0, 0, 0, 1, 1, 2], [0], [0]>} : vector<4x8x8xbf16>, vector<4x8x8xbf16>, vector<4x8x8xf32> -> vector<4x8x8xf32>
    "tpu.trace_stop"() : () -> ()
    %150 = arith.addf %147, %149 : vector<4x8x8xf32>
    %151 = tpu.reciprocal %145 : vector<4x8x1xf32> -> vector<4x8x1xf32>
    %152 = vector.broadcast %151 : vector<4x8x1xf32> to vector<4x8x8xf32>
    %153 = arith.mulf %150, %152 : vector<4x8x8xf32>
    %154 = vector.extract_strided_slice %153 {offsets = [0, 0, 0], sizes = [1, 8, 8], strides = [1, 1, 1]} : vector<4x8x8xf32> to vector<1x8x8xf32>
    %155 = vector.shape_cast %154 : vector<1x8x8xf32> to vector<8x8xf32>
    %156 = arith.truncf %155 : vector<8x8xf32> to vector<8x8xbf16>
    %c0_66 = arith.constant 0 : index
    %c0_67 = arith.constant 0 : index
    %157 = vector.load %arg23[%c0_66, %c0_67] : memref<8x32xbf16, #tpu.memory_space<vmem>>, vector<8x8xbf16>
    tpu.vector_store %arg23[%c0_66, %c0_67], %156 {strides = array<i32>} : memref<8x32xbf16, #tpu.memory_space<vmem>>, vector<8x8xbf16>,
    %158 = vector.extract_strided_slice %153 {offsets = [1, 0, 0], sizes = [1, 8, 8], strides = [1, 1, 1]} : vector<4x8x8xf32> to vector<1x8x8xf32>
    %159 = vector.shape_cast %158 : vector<1x8x8xf32> to vector<8x8xf32>
    %160 = arith.truncf %159 : vector<8x8xf32> to vector<8x8xbf16>
    %c0_68 = arith.constant 0 : index
    %c8 = arith.constant 8 : index
    %161 = vector.load %arg23[%c0_68, %c8] : memref<8x32xbf16, #tpu.memory_space<vmem>>, vector<8x8xbf16>
    tpu.vector_store %arg23[%c0_68, %c8], %160 {strides = array<i32>} : memref<8x32xbf16, #tpu.memory_space<vmem>>, vector<8x8xbf16>,
    %162 = vector.extract_strided_slice %153 {offsets = [2, 0, 0], sizes = [1, 8, 8], strides = [1, 1, 1]} : vector<4x8x8xf32> to vector<1x8x8xf32>
    %163 = vector.shape_cast %162 : vector<1x8x8xf32> to vector<8x8xf32>
    %164 = arith.truncf %163 : vector<8x8xf32> to vector<8x8xbf16>
    %c0_69 = arith.constant 0 : index
    %c16 = arith.constant 16 : index
    %165 = vector.load %arg23[%c0_69, %c16] : memref<8x32xbf16, #tpu.memory_space<vmem>>, vector<8x8xbf16>
    tpu.vector_store %arg23[%c0_69, %c16], %164 {strides = array<i32>} : memref<8x32xbf16, #tpu.memory_space<vmem>>, vector<8x8xbf16>,
    %166 = vector.extract_strided_slice %153 {offsets = [3, 0, 0], sizes = [1, 8, 8], strides = [1, 1, 1]} : vector<4x8x8xf32> to vector<1x8x8xf32>
    %167 = vector.shape_cast %166 : vector<1x8x8xf32> to vector<8x8xf32>
    %168 = arith.truncf %167 : vector<8x8xf32> to vector<8x8xbf16>
    %c0_70 = arith.constant 0 : index
    %c24 = arith.constant 24 : index
    %169 = vector.load %arg23[%c0_70, %c24] : memref<8x32xbf16, #tpu.memory_space<vmem>>, vector<8x8xbf16>
    tpu.vector_store %arg23[%c0_70, %c24], %168 {strides = array<i32>} : memref<8x32xbf16, #tpu.memory_space<vmem>>, vector<8x8xbf16>,
    %c0_71 = arith.constant 0 : index
    %c0_72 = arith.constant 0 : index
    %170 = vector.load %arg23[%c0_71, %c0_72] : memref<8x32xbf16, #tpu.memory_space<vmem>>, vector<8x32xbf16>
    %c0_73 = arith.constant 0 : index
    %c0_74 = arith.constant 0 : index
    %171 = vector.load %arg11[%c0_73, %c0_74] : memref<32x32xbf16, #tpu.memory_space<vmem>>, vector<32x32xbf16>
    %cst_75 = arith.constant dense<0.000000e+00> : vector<8x32xf32>
    %172 = tpu.matmul %170, %171, %cst_75 {dimension_numbers = #tpu.dot_dimension_numbers<[1], [0], [0], [1], [0, 0, 1, 1], [], []>} : vector<8x32xbf16>, vector<32x32xbf16>, vector<8x32xf32> -> vector<8x32xf32>
    %c0_76 = arith.constant 0 : index
    %c0_77 = arith.constant 0 : index
    %173 = vector.load %arg12[%c0_76, %c0_77] : memref<1x32xf32, #tpu.memory_space<vmem>>, vector<1x32xf32>
    %174 = vector.broadcast %173 : vector<1x32xf32> to vector<8x32xf32>
    %175 = arith.addf %172, %174 : vector<8x32xf32>
    %176 = arith.addf %175, %1 : vector<8x32xf32>
    %c0_78 = arith.constant 0 : index
    %c0_79 = arith.constant 0 : index
    %177 = vector.load %arg13[%c0_78, %c0_79] : memref<1x32xf32, #tpu.memory_space<vmem>>, vector<1x32xf32>
    %c0_80 = arith.constant 0 : index
    %c0_81 = arith.constant 0 : index
    %178 = vector.load %arg14[%c0_80, %c0_81] : memref<1x32xf32, #tpu.memory_space<vmem>>, vector<1x32xf32>
    %cst_82 = arith.constant dense<0.000000e+00> : vector<8xf32>
    %179 = vector.multi_reduction <add>, %176, %cst_82 [1] : vector<8x32xf32> to vector<8xf32>
    %180 = vector.shape_cast %179 : vector<8xf32> to vector<8x1xf32>
    %cst_83 = arith.constant 3.200000e+01 : f32
    %181 = vector.broadcast %cst_83 : f32 to vector<8x1xf32>
    %182 = arith.divf %180, %181 : vector<8x1xf32>
    %183 = vector.broadcast %182 : vector<8x1xf32> to vector<8x32xf32>
    %184 = arith.subf %176, %183 : vector<8x32xf32>
    %185 = arith.mulf %184, %184 : vector<8x32xf32>
    %cst_84 = arith.constant dense<0.000000e+00> : vector<8xf32>
    %186 = vector.multi_reduction <add>, %185, %cst_84 [1] : vector<8x32xf32> to vector<8xf32>
    %187 = vector.shape_cast %186 : vector<8xf32> to vector<8x1xf32>
    %cst_85 = arith.constant 3.200000e+01 : f32
    %188 = vector.broadcast %cst_85 : f32 to vector<8x1xf32>
    %189 = arith.divf %187, %188 : vector<8x1xf32>
    %190 = vector.broadcast %182 : vector<8x1xf32> to vector<8x32xf32>
    %191 = arith.subf %176, %190 : vector<8x32xf32>
    %cst_86 = arith.constant 9.99999974E-6 : f32
    %192 = vector.broadcast %cst_86 : f32 to vector<8x1xf32>
    %193 = arith.addf %189, %192 : vector<8x1xf32>
    %194 = math.rsqrt %193 : vector<8x1xf32>
    %195 = vector.broadcast %194 : vector<8x1xf32> to vector<8x32xf32>
    %196 = arith.mulf %191, %195 : vector<8x32xf32>
    %197 = vector.broadcast %177 : vector<1x32xf32> to vector<8x32xf32>
    %198 = arith.mulf %196, %197 : vector<8x32xf32>
    %199 = vector.broadcast %178 : vector<1x32xf32> to vector<8x32xf32>
    %200 = arith.addf %198, %199 : vector<8x32xf32>
    %201 = arith.truncf %200 : vector<8x32xf32> to vector<8x32xbf16>
    %cst_87 = arith.constant 0.000000e+00 : f32
    %202 = vector.broadcast %cst_87 : f32 to vector<8x32xf32>
    %c0_88 = arith.constant 0 : index
    %c0_89 = arith.constant 0 : index
    %203 = vector.load %arg15[%c0_88, %c0_89] : memref<32x128xbf16, #tpu.memory_space<vmem>>, vector<32x128xbf16>
    %cst_90 = arith.constant dense<0.000000e+00> : vector<8x128xf32>
    %204 = tpu.matmul %201, %203, %cst_90 {dimension_numbers = #tpu.dot_dimension_numbers<[1], [0], [0], [1], [0, 0, 1, 1], [], []>} : vector<8x32xbf16>, vector<32x128xbf16>, vector<8x128xf32> -> vector<8x128xf32>
    %c0_91 = arith.constant 0 : index
    %c0_92 = arith.constant 0 : index
    %205 = vector.load %arg16[%c0_91, %c0_92] : memref<1x128xf32, #tpu.memory_space<vmem>>, vector<1x128xf32>
    %206 = vector.broadcast %205 : vector<1x128xf32> to vector<8x128xf32>
    %207 = arith.addf %204, %206 : vector<8x128xf32>
    %cst_93 = arith.constant 5.000000e-01 : f32
    %208 = vector.broadcast %cst_93 : f32 to vector<8x128xf32>
    %209 = arith.mulf %208, %207 : vector<8x128xf32>
    %cst_94 = arith.constant 4.471500e-02 : f32
    %210 = vector.broadcast %cst_94 : f32 to vector<8x128xf32>
    %211 = arith.mulf %210, %207 : vector<8x128xf32>
    %212 = arith.mulf %211, %207 : vector<8x128xf32>
    %213 = arith.mulf %212, %207 : vector<8x128xf32>
    %214 = arith.addf %207, %213 : vector<8x128xf32>
    %cst_95 = arith.constant 0.797884583 : f32
    %215 = vector.broadcast %cst_95 : f32 to vector<8x128xf32>
    %216 = arith.mulf %215, %214 : vector<8x128xf32>
    %217 = math.tanh %216 : vector<8x128xf32>
    %cst_96 = arith.constant 1.000000e+00 : f32
    %218 = vector.broadcast %cst_96 : f32 to vector<8x128xf32>
    %219 = arith.addf %218, %217 : vector<8x128xf32>
    %220 = arith.mulf %209, %219 : vector<8x128xf32>
    %221 = arith.truncf %220 : vector<8x128xf32> to vector<8x128xbf16>
    %c0_97 = arith.constant 0 : index
    %c0_98 = arith.constant 0 : index
    %222 = vector.load %arg17[%c0_97, %c0_98] : memref<128x32xbf16, #tpu.memory_space<vmem>>, vector<128x32xbf16>
    %cst_99 = arith.constant dense<0.000000e+00> : vector<8x32xf32>
    %223 = tpu.matmul %221, %222, %cst_99 {dimension_numbers = #tpu.dot_dimension_numbers<[1], [0], [0], [1], [0, 0, 1, 1], [], []>} : vector<8x128xbf16>, vector<128x32xbf16>, vector<8x32xf32> -> vector<8x32xf32>
    %224 = arith.addf %202, %223 : vector<8x32xf32>
    %c0_100 = arith.constant 0 : index
    %c0_101 = arith.constant 0 : index
    %225 = vector.load %arg18[%c0_100, %c0_101] : memref<1x32xf32, #tpu.memory_space<vmem>>, vector<1x32xf32>
    %226 = vector.broadcast %225 : vector<1x32xf32> to vector<8x32xf32>
    %227 = arith.addf %224, %226 : vector<8x32xf32>
    %228 = arith.addf %227, %176 : vector<8x32xf32>
    %c0_102 = arith.constant 0 : index
    %c0_103 = arith.constant 0 : index
    %c0_104 = arith.constant 0 : index
    %229 = vector.load %arg19[%c0_102, %c0_103, %c0_104] : memref<1x8x32xf32, #tpu.memory_space<vmem>>, vector<1x8x32xf32>
    %230 = vector.shape_cast %229 : vector<1x8x32xf32> to vector<8x32xf32>
    %231 = vector.shape_cast %228 : vector<8x32xf32> to vector<1x8x32xf32>
    tpu.vector_store %arg19[%c0_102, %c0_103, %c0_104], %231 {strides = array<i32>} : memref<1x8x32xf32, #tpu.memory_space<vmem>>, vector<1x8x32xf32>,
    return
  }
  func.func @transform_0(%arg0: i32, %arg1: i32) -> (i32, i32, i32) {
    %c0_i32 = arith.constant 0 : i32
    %c0_i32_0 = arith.constant 0 : i32
    return %arg0, %arg1, %c0_i32 : i32, i32, i32
  }
  func.func @transform_1(%arg0: i32, %arg1: i32) -> (i32, i32) {
    %c0_i32 = arith.constant 0 : i32
    %c0_i32_0 = arith.constant 0 : i32
    %c0_i32_1 = arith.constant 0 : i32
    return %c0_i32, %c0_i32_0 : i32, i32
  }
  func.func @transform_2(%arg0: i32, %arg1: i32) -> (i32, i32) {
    %c0_i32 = arith.constant 0 : i32
    %c0_i32_0 = arith.constant 0 : i32
    %c0_i32_1 = arith.constant 0 : i32
    return %c0_i32, %c0_i32_0 : i32, i32
  }
  func.func @transform_3(%arg0: i32, %arg1: i32) -> (i32, i32) {
    %c0_i32 = arith.constant 0 : i32
    %c0_i32_0 = arith.constant 0 : i32
    %c0_i32_1 = arith.constant 0 : i32
    return %c0_i32, %c0_i32_0 : i32, i32
  }
  func.func @transform_4(%arg0: i32, %arg1: i32) -> (i32, i32) {
    %c0_i32 = arith.constant 0 : i32
    %c0_i32_0 = arith.constant 0 : i32
    %c0_i32_1 = arith.constant 0 : i32
    return %c0_i32, %c0_i32_0 : i32, i32
  }
  func.func @transform_5(%arg0: i32, %arg1: i32) -> (i32, i32) {
    %c0_i32 = arith.constant 0 : i32
    %c0_i32_0 = arith.constant 0 : i32
    %c0_i32_1 = arith.constant 0 : i32
    return %c0_i32, %c0_i32_0 : i32, i32
  }
  func.func @transform_6(%arg0: i32, %arg1: i32) -> (i32, i32) {
    %c0_i32 = arith.constant 0 : i32
    %c0_i32_0 = arith.constant 0 : i32
    %c0_i32_1 = arith.constant 0 : i32
    return %c0_i32, %c0_i32_0 : i32, i32
  }
  func.func @transform_7(%arg0: i32, %arg1: i32) -> (i32, i32) {
    %c0_i32 = arith.constant 0 : i32
    %c0_i32_0 = arith.constant 0 : i32
    %c0_i32_1 = arith.constant 0 : i32
    return %c0_i32, %c0_i32_0 : i32, i32
  }
  func.func @transform_8(%arg0: i32, %arg1: i32) -> (i32, i32) {
    %c0_i32 = arith.constant 0 : i32
    %c0_i32_0 = arith.constant 0 : i32
    %c0_i32_1 = arith.constant 0 : i32
    return %c0_i32, %c0_i32_0 : i32, i32
  }
  func.func @transform_9(%arg0: i32, %arg1: i32) -> (i32, i32) {
    %c0_i32 = arith.constant 0 : i32
    %c0_i32_0 = arith.constant 0 : i32
    %c0_i32_1 = arith.constant 0 : i32
    return %c0_i32, %c0_i32_0 : i32, i32
  }
  func.func @transform_10(%arg0: i32, %arg1: i32) -> (i32, i32) {
    %c0_i32 = arith.constant 0 : i32
    %c0_i32_0 = arith.constant 0 : i32
    %c0_i32_1 = arith.constant 0 : i32
    return %c0_i32, %c0_i32_0 : i32, i32
  }
  func.func @transform_11(%arg0: i32, %arg1: i32) -> (i32, i32) {
    %c0_i32 = arith.constant 0 : i32
    %c0_i32_0 = arith.constant 0 : i32
    %c0_i32_1 = arith.constant 0 : i32
    return %c0_i32, %c0_i32_0 : i32, i32
  }
  func.func @transform_12(%arg0: i32, %arg1: i32) -> (i32, i32) {
    %c0_i32 = arith.constant 0 : i32
    %c0_i32_0 = arith.constant 0 : i32
    %c0_i32_1 = arith.constant 0 : i32
    return %c0_i32, %c0_i32_0 : i32, i32
  }
  func.func @transform_13(%arg0: i32, %arg1: i32) -> (i32, i32) {
    %c0_i32 = arith.constant 0 : i32
    %c0_i32_0 = arith.constant 0 : i32
    %c0_i32_1 = arith.constant 0 : i32
    return %c0_i32, %c0_i32_0 : i32, i32
  }
  func.func @transform_14(%arg0: i32, %arg1: i32) -> (i32, i32) {
    %c0_i32 = arith.constant 0 : i32
    %c0_i32_0 = arith.constant 0 : i32
    %c0_i32_1 = arith.constant 0 : i32
    return %c0_i32, %c0_i32_0 : i32, i32
  }
  func.func @transform_15(%arg0: i32, %arg1: i32) -> (i32, i32) {
    %c0_i32 = arith.constant 0 : i32
    %c0_i32_0 = arith.constant 0 : i32
    %c0_i32_1 = arith.constant 0 : i32
    return %c0_i32, %c0_i32_0 : i32, i32
  }
  func.func @transform_16(%arg0: i32, %arg1: i32) -> (i32, i32) {
    %c0_i32 = arith.constant 0 : i32
    %c0_i32_0 = arith.constant 0 : i32
    %c0_i32_1 = arith.constant 0 : i32
    return %c0_i32, %c0_i32_0 : i32, i32
  }
  func.func @transform_17(%arg0: i32, %arg1: i32) -> (i32, i32, i32) {
    %c0_i32 = arith.constant 0 : i32
    %c0_i32_0 = arith.constant 0 : i32
    return %arg0, %arg1, %c0_i32 : i32, i32, i32
  }
}

module attributes {stable_mosaic.version = 11 : i64} {
  func.func @transformer_block_kernel(%arg0: i32, %arg1: i32, %arg2: memref<1x8x32xf32, #tpu.memory_space<vmem>>, %arg3: memref<1x32xf32, #tpu.memory_space<vmem>>, %arg4: memref<1x32xf32, #tpu.memory_space<vmem>>, %arg5: memref<32x32xbf16, #tpu.memory_space<vmem>>, %arg6: memref<1x32xf32, #tpu.memory_space<vmem>>, %arg7: memref<32x32xbf16, #tpu.memory_space<vmem>>, %arg8: memref<1x32xf32, #tpu.memory_space<vmem>>, %arg9: memref<32x32xbf16, #tpu.memory_space<vmem>>, %arg10: memref<1x32xf32, #tpu.memory_space<vmem>>, %arg11: memref<32x32xbf16, #tpu.memory_space<vmem>>, %arg12: memref<1x32xf32, #tpu.memory_space<vmem>>, %arg13: memref<1x32xf32, #tpu.memory_space<vmem>>, %arg14: memref<1x32xf32, #tpu.memory_space<vmem>>, %arg15: memref<32x128xbf16, #tpu.memory_space<vmem>>, %arg16: memref<1x128xf32, #tpu.memory_space<vmem>>, %arg17: memref<128x32xbf16, #tpu.memory_space<vmem>>, %arg18: memref<1x32xf32, #tpu.memory_space<vmem>>, %arg19: memref<1x8x32xf32, #tpu.memory_space<vmem>>, %arg20: memref<4x8x8xbf16, #tpu.memory_space<vmem>>, %arg21: memref<4x8x8xbf16, #tpu.memory_space<vmem>>, %arg22: memref<4x8x8xbf16, #tpu.memory_space<vmem>>, %arg23: memref<8x32xbf16, #tpu.memory_space<vmem>>) attributes {dimension_semantics = [#tpu.dimension_semantics<parallel>, #tpu.dimension_semantics<arbitrary>], iteration_bounds = array<i64: 2, 1>, scalar_prefetch = 0 : i64, scratch_operands = 4 : i64, tpu.core_type = #tpu.core_type<tc>, window_params = [{transform_indices = @transform_0, window_bounds = array<i64: 1, 8, 32>}, {pipeline_mode = #tpu.pipeline_mode<synchronous>, transform_indices = @transform_1, window_bounds = array<i64: 1, 32>}, {pipeline_mode = #tpu.pipeline_mode<synchronous>, transform_indices = @transform_2, window_bounds = array<i64: 1, 32>}, {pipeline_mode = #tpu.pipeline_mode<synchronous>, transform_indices = @transform_3, window_bounds = array<i64: 32, 32>}, {pipeline_mode = #tpu.pipeline_mode<synchronous>, transform_indices = @transform_4, window_bounds = array<i64: 1, 32>}, {pipeline_mode = #tpu.pipeline_mode<synchronous>, transform_indices = @transform_5, window_bounds = array<i64: 32, 32>}, {pipeline_mode = #tpu.pipeline_mode<synchronous>, transform_indices = @transform_6, window_bounds = array<i64: 1, 32>}, {pipeline_mode = #tpu.pipeline_mode<synchronous>, transform_indices = @transform_7, window_bounds = array<i64: 32, 32>}, {pipeline_mode = #tpu.pipeline_mode<synchronous>, transform_indices = @transform_8, window_bounds = array<i64: 1, 32>}, {pipeline_mode = #tpu.pipeline_mode<synchronous>, transform_indices = @transform_9, window_bounds = array<i64: 32, 32>}, {pipeline_mode = #tpu.pipeline_mode<synchronous>, transform_indices = @transform_10, window_bounds = array<i64: 1, 32>}, {pipeline_mode = #tpu.pipeline_mode<synchronous>, transform_indices = @transform_11, window_bounds = array<i64: 1, 32>}, {pipeline_mode = #tpu.pipeline_mode<synchronous>, transform_indices = @transform_12, window_bounds = array<i64: 1, 32>}, {pipeline_mode = #tpu.pipeline_mode<synchronous>, transform_indices = @transform_13, window_bounds = array<i64: 32, 128>}, {pipeline_mode = #tpu.pipeline_mode<synchronous>, transform_indices = @transform_14, window_bounds = array<i64: 1, 128>}, {pipeline_mode = #tpu.pipeline_mode<synchronous>, transform_indices = @transform_15, window_bounds = array<i64: 128, 32>}, {pipeline_mode = #tpu.pipeline_mode<synchronous>, transform_indices = @transform_16, window_bounds = array<i64: 1, 32>}, {transform_indices = @transform_17, window_bounds = array<i64: 1, 8, 32>}]} {
    %c0 = arith.constant 0 : index
    %c0_0 = arith.constant 0 : index
    %c0_1 = arith.constant 0 : index
    %0 = vector.load %arg2[%c0, %c0_0, %c0_1] : memref<1x8x32xf32, #tpu.memory_space<vmem>>, vector<1x8x32xf32>
    %1 = vector.shape_cast %0 : vector<1x8x32xf32> to vector<8x32xf32>
    %c0_2 = arith.constant 0 : index
    %c0_3 = arith.constant 0 : index
    %2 = vector.load %arg3[%c0_2, %c0_3] : memref<1x32xf32, #tpu.memory_space<vmem>>, vector<1x32xf32>
    %c0_4 = arith.constant 0 : index
    %c0_5 = arith.constant 0 : index
    %3 = vector.load %arg4[%c0_4, %c0_5] : memref<1x32xf32, #tpu.memory_space<vmem>>, vector<1x32xf32>
    %cst = arith.constant dense<0.000000e+00> : vector<8xf32>
    %4 = vector.multi_reduction <add>, %1, %cst [1] : vector<8x32xf32> to vector<8xf32>
    %5 = vector.shape_cast %4 : vector<8xf32> to vector<8x1xf32>
    %cst_6 = arith.constant 3.200000e+01 : f32
    %6 = vector.broadcast %cst_6 : f32 to vector<8x1xf32>
    %7 = arith.divf %5, %6 : vector<8x1xf32>
    %8 = vector.broadcast %7 : vector<8x1xf32> to vector<8x32xf32>
    %9 = arith.subf %1, %8 : vector<8x32xf32>
    %10 = arith.mulf %9, %9 : vector<8x32xf32>
    %cst_7 = arith.constant dense<0.000000e+00> : vector<8xf32>
    %11 = vector.multi_reduction <add>, %10, %cst_7 [1] : vector<8x32xf32> to vector<8xf32>
    %12 = vector.shape_cast %11 : vector<8xf32> to vector<8x1xf32>
    %cst_8 = arith.constant 3.200000e+01 : f32
    %13 = vector.broadcast %cst_8 : f32 to vector<8x1xf32>
    %14 = arith.divf %12, %13 : vector<8x1xf32>
    %15 = vector.broadcast %7 : vector<8x1xf32> to vector<8x32xf32>
    %16 = arith.subf %1, %15 : vector<8x32xf32>
    %cst_9 = arith.constant 9.99999974E-6 : f32
    %17 = vector.broadcast %cst_9 : f32 to vector<8x1xf32>
    %18 = arith.addf %14, %17 : vector<8x1xf32>
    %19 = math.rsqrt %18 : vector<8x1xf32>
    %20 = vector.broadcast %19 : vector<8x1xf32> to vector<8x32xf32>
    %21 = arith.mulf %16, %20 : vector<8x32xf32>
    %22 = vector.broadcast %2 : vector<1x32xf32> to vector<8x32xf32>
    %23 = arith.mulf %21, %22 : vector<8x32xf32>
    %24 = vector.broadcast %3 : vector<1x32xf32> to vector<8x32xf32>
    %25 = arith.addf %23, %24 : vector<8x32xf32>
    %26 = arith.truncf %25 : vector<8x32xf32> to vector<8x32xbf16>
    %c0_10 = arith.constant 0 : index
    %c0_11 = arith.constant 0 : index
    %27 = vector.load %arg5[%c0_10, %c0_11] : memref<32x32xbf16, #tpu.memory_space<vmem>>, vector<32x32xbf16>
    %cst_12 = arith.constant dense<0.000000e+00> : vector<8x32xf32>
    %28 = tpu.matmul %26, %27, %cst_12 {dimension_numbers = #tpu.dot_dimension_numbers<[1], [0], [0], [1], [0, 0, 1, 1], [], []>} : vector<8x32xbf16>, vector<32x32xbf16>, vector<8x32xf32> -> vector<8x32xf32>
    %c0_13 = arith.constant 0 : index
    %c0_14 = arith.constant 0 : index
    %29 = vector.load %arg6[%c0_13, %c0_14] : memref<1x32xf32, #tpu.memory_space<vmem>>, vector<1x32xf32>
    %30 = vector.broadcast %29 : vector<1x32xf32> to vector<8x32xf32>
    %31 = arith.addf %28, %30 : vector<8x32xf32>
    %c0_15 = arith.constant 0 : index
    %c0_16 = arith.constant 0 : index
    %32 = vector.load %arg7[%c0_15, %c0_16] : memref<32x32xbf16, #tpu.memory_space<vmem>>, vector<32x32xbf16>
    %cst_17 = arith.constant dense<0.000000e+00> : vector<8x32xf32>
    %33 = tpu.matmul %26, %32, %cst_17 {dimension_numbers = #tpu.dot_dimension_numbers<[1], [0], [0], [1], [0, 0, 1, 1], [], []>} : vector<8x32xbf16>, vector<32x32xbf16>, vector<8x32xf32> -> vector<8x32xf32>
    %c0_18 = arith.constant 0 : index
    %c0_19 = arith.constant 0 : index
    %34 = vector.load %arg8[%c0_18, %c0_19] : memref<1x32xf32, #tpu.memory_space<vmem>>, vector<1x32xf32>
    %35 = vector.broadcast %34 : vector<1x32xf32> to vector<8x32xf32>
    %36 = arith.addf %33, %35 : vector<8x32xf32>
    %c0_20 = arith.constant 0 : index
    %c0_21 = arith.constant 0 : index
    %37 = vector.load %arg9[%c0_20, %c0_21] : memref<32x32xbf16, #tpu.memory_space<vmem>>, vector<32x32xbf16>
    %cst_22 = arith.constant dense<0.000000e+00> : vector<8x32xf32>
    %38 = tpu.matmul %26, %37, %cst_22 {dimension_numbers = #tpu.dot_dimension_numbers<[1], [0], [0], [1], [0, 0, 1, 1], [], []>} : vector<8x32xbf16>, vector<32x32xbf16>, vector<8x32xf32> -> vector<8x32xf32>
    %c0_23 = arith.constant 0 : index
    %c0_24 = arith.constant 0 : index
    %39 = vector.load %arg10[%c0_23, %c0_24] : memref<1x32xf32, #tpu.memory_space<vmem>>, vector<1x32xf32>
    %40 = vector.broadcast %39 : vector<1x32xf32> to vector<8x32xf32>
    %41 = arith.addf %38, %40 : vector<8x32xf32>
    %cst_25 = arith.constant 0.353553385 : f32
    %42 = vector.broadcast %cst_25 : f32 to vector<8x32xf32>
    %43 = arith.mulf %31, %42 : vector<8x32xf32>
    %c8_i32 = arith.constant 8 : i32
    %44 = arith.muli %arg1, %c8_i32 : i32
    %45 = tpu.assume_multiple %44, 8 : i32
    %46 = vector.extract_strided_slice %36 {offsets = [0, 0], sizes = [8, 8], strides = [1, 1]} : vector<8x32xf32> to vector<8x8xf32>
    %47 = arith.truncf %46 : vector<8x8xf32> to vector<8x8xbf16>
    %c0_26 = arith.constant 0 : index
    %48 = arith.index_cast %45 : i32 to index
    %c0_27 = arith.constant 0 : index
    %49 = vector.load %arg20[%c0_26, %48, %c0_27] : memref<4x8x8xbf16, #tpu.memory_space<vmem>>, vector<1x8x8xbf16>
    %50 = vector.shape_cast %49 : vector<1x8x8xbf16> to vector<8x8xbf16>
    %51 = vector.shape_cast %47 : vector<8x8xbf16> to vector<1x8x8xbf16>
    tpu.vector_store %arg20[%c0_26, %48, %c0_27], %51 {strides = array<i32>} : memref<4x8x8xbf16, #tpu.memory_space<vmem>>, vector<1x8x8xbf16>,
    %52 = vector.extract_strided_slice %41 {offsets = [0, 0], sizes = [8, 8], strides = [1, 1]} : vector<8x32xf32> to vector<8x8xf32>
    %53 = arith.truncf %52 : vector<8x8xf32> to vector<8x8xbf16>
    %c0_28 = arith.constant 0 : index
    %54 = arith.index_cast %45 : i32 to index
    %c0_29 = arith.constant 0 : index
    %55 = vector.load %arg21[%c0_28, %54, %c0_29] : memref<4x8x8xbf16, #tpu.memory_space<vmem>>, vector<1x8x8xbf16>
    %56 = vector.shape_cast %55 : vector<1x8x8xbf16> to vector<8x8xbf16>
    %57 = vector.shape_cast %53 : vector<8x8xbf16> to vector<1x8x8xbf16>
    tpu.vector_store %arg21[%c0_28, %54, %c0_29], %57 {strides = array<i32>} : memref<4x8x8xbf16, #tpu.memory_space<vmem>>, vector<1x8x8xbf16>,
    %58 = vector.extract_strided_slice %43 {offsets = [0, 0], sizes = [8, 8], strides = [1, 1]} : vector<8x32xf32> to vector<8x8xf32>
    %59 = arith.truncf %58 : vector<8x8xf32> to vector<8x8xbf16>
    %c0_30 = arith.constant 0 : index
    %c0_31 = arith.constant 0 : index
    %c0_32 = arith.constant 0 : index
    %60 = vector.load %arg22[%c0_30, %c0_31, %c0_32] : memref<4x8x8xbf16, #tpu.memory_space<vmem>>, vector<1x8x8xbf16>
    %61 = vector.shape_cast %60 : vector<1x8x8xbf16> to vector<8x8xbf16>
    %62 = vector.shape_cast %59 : vector<8x8xbf16> to vector<1x8x8xbf16>
    tpu.vector_store %arg22[%c0_30, %c0_31, %c0_32], %62 {strides = array<i32>} : memref<4x8x8xbf16, #tpu.memory_space<vmem>>, vector<1x8x8xbf16>,
    %63 = vector.extract_strided_slice %36 {offsets = [0, 8], sizes = [8, 8], strides = [1, 1]} : vector<8x32xf32> to vector<8x8xf32>
    %64 = arith.truncf %63 : vector<8x8xf32> to vector<8x8xbf16>
    %c1 = arith.constant 1 : index
    %65 = arith.index_cast %45 : i32 to index
    %c0_33 = arith.constant 0 : index
    %66 = vector.load %arg20[%c1, %65, %c0_33] : memref<4x8x8xbf16, #tpu.memory_space<vmem>>, vector<1x8x8xbf16>
    %67 = vector.shape_cast %66 : vector<1x8x8xbf16> to vector<8x8xbf16>
    %68 = vector.shape_cast %64 : vector<8x8xbf16> to vector<1x8x8xbf16>
    tpu.vector_store %arg20[%c1, %65, %c0_33], %68 {strides = array<i32>} : memref<4x8x8xbf16, #tpu.memory_space<vmem>>, vector<1x8x8xbf16>,
    %69 = vector.extract_strided_slice %41 {offsets = [0, 8], sizes = [8, 8], strides = [1, 1]} : vector<8x32xf32> to vector<8x8xf32>
    %70 = arith.truncf %69 : vector<8x8xf32> to vector<8x8xbf16>
    %c1_34 = arith.constant 1 : index
    %71 = arith.index_cast %45 : i32 to index
    %c0_35 = arith.constant 0 : index
    %72 = vector.load %arg21[%c1_34, %71, %c0_35] : memref<4x8x8xbf16, #tpu.memory_space<vmem>>, vector<1x8x8xbf16>
    %73 = vector.shape_cast %72 : vector<1x8x8xbf16> to vector<8x8xbf16>
    %74 = vector.shape_cast %70 : vector<8x8xbf16> to vector<1x8x8xbf16>
    tpu.vector_store %arg21[%c1_34, %71, %c0_35], %74 {strides = array<i32>} : memref<4x8x8xbf16, #tpu.memory_space<vmem>>, vector<1x8x8xbf16>,
    %75 = vector.extract_strided_slice %43 {offsets = [0, 8], sizes = [8, 8], strides = [1, 1]} : vector<8x32xf32> to vector<8x8xf32>
    %76 = arith.truncf %75 : vector<8x8xf32> to vector<8x8xbf16>
    %c1_36 = arith.constant 1 : index
    %c0_37 = arith.constant 0 : index
    %c0_38 = arith.constant 0 : index
    %77 = vector.load %arg22[%c1_36, %c0_37, %c0_38] : memref<4x8x8xbf16, #tpu.memory_space<vmem>>, vector<1x8x8xbf16>
    %78 = vector.shape_cast %77 : vector<1x8x8xbf16> to vector<8x8xbf16>
    %79 = vector.shape_cast %76 : vector<8x8xbf16> to vector<1x8x8xbf16>
    tpu.vector_store %arg22[%c1_36, %c0_37, %c0_38], %79 {strides = array<i32>} : memref<4x8x8xbf16, #tpu.memory_space<vmem>>, vector<1x8x8xbf16>,
    %80 = vector.extract_strided_slice %36 {offsets = [0, 16], sizes = [8, 8], strides = [1, 1]} : vector<8x32xf32> to vector<8x8xf32>
    %81 = arith.truncf %80 : vector<8x8xf32> to vector<8x8xbf16>
    %c2 = arith.constant 2 : index
    %82 = arith.index_cast %45 : i32 to index
    %c0_39 = arith.constant 0 : index
    %83 = vector.load %arg20[%c2, %82, %c0_39] : memref<4x8x8xbf16, #tpu.memory_space<vmem>>, vector<1x8x8xbf16>
    %84 = vector.shape_cast %83 : vector<1x8x8xbf16> to vector<8x8xbf16>
    %85 = vector.shape_cast %81 : vector<8x8xbf16> to vector<1x8x8xbf16>
    tpu.vector_store %arg20[%c2, %82, %c0_39], %85 {strides = array<i32>} : memref<4x8x8xbf16, #tpu.memory_space<vmem>>, vector<1x8x8xbf16>,
    %86 = vector.extract_strided_slice %41 {offsets = [0, 16], sizes = [8, 8], strides = [1, 1]} : vector<8x32xf32> to vector<8x8xf32>
    %87 = arith.truncf %86 : vector<8x8xf32> to vector<8x8xbf16>
    %c2_40 = arith.constant 2 : index
    %88 = arith.index_cast %45 : i32 to index
    %c0_41 = arith.constant 0 : index
    %89 = vector.load %arg21[%c2_40, %88, %c0_41] : memref<4x8x8xbf16, #tpu.memory_space<vmem>>, vector<1x8x8xbf16>
    %90 = vector.shape_cast %89 : vector<1x8x8xbf16> to vector<8x8xbf16>
    %91 = vector.shape_cast %87 : vector<8x8xbf16> to vector<1x8x8xbf16>
    tpu.vector_store %arg21[%c2_40, %88, %c0_41], %91 {strides = array<i32>} : memref<4x8x8xbf16, #tpu.memory_space<vmem>>, vector<1x8x8xbf16>,
    %92 = vector.extract_strided_slice %43 {offsets = [0, 16], sizes = [8, 8], strides = [1, 1]} : vector<8x32xf32> to vector<8x8xf32>
    %93 = arith.truncf %92 : vector<8x8xf32> to vector<8x8xbf16>
    %c2_42 = arith.constant 2 : index
    %c0_43 = arith.constant 0 : index
    %c0_44 = arith.constant 0 : index
    %94 = vector.load %arg22[%c2_42, %c0_43, %c0_44] : memref<4x8x8xbf16, #tpu.memory_space<vmem>>, vector<1x8x8xbf16>
    %95 = vector.shape_cast %94 : vector<1x8x8xbf16> to vector<8x8xbf16>
    %96 = vector.shape_cast %93 : vector<8x8xbf16> to vector<1x8x8xbf16>
    tpu.vector_store %arg22[%c2_42, %c0_43, %c0_44], %96 {strides = array<i32>} : memref<4x8x8xbf16, #tpu.memory_space<vmem>>, vector<1x8x8xbf16>,
    %97 = vector.extract_strided_slice %36 {offsets = [0, 24], sizes = [8, 8], strides = [1, 1]} : vector<8x32xf32> to vector<8x8xf32>
    %98 = arith.truncf %97 : vector<8x8xf32> to vector<8x8xbf16>
    %c3 = arith.constant 3 : index
    %99 = arith.index_cast %45 : i32 to index
    %c0_45 = arith.constant 0 : index
    %100 = vector.load %arg20[%c3, %99, %c0_45] : memref<4x8x8xbf16, #tpu.memory_space<vmem>>, vector<1x8x8xbf16>
    %101 = vector.shape_cast %100 : vector<1x8x8xbf16> to vector<8x8xbf16>
    %102 = vector.shape_cast %98 : vector<8x8xbf16> to vector<1x8x8xbf16>
    tpu.vector_store %arg20[%c3, %99, %c0_45], %102 {strides = array<i32>} : memref<4x8x8xbf16, #tpu.memory_space<vmem>>, vector<1x8x8xbf16>,
    %103 = vector.extract_strided_slice %41 {offsets = [0, 24], sizes = [8, 8], strides = [1, 1]} : vector<8x32xf32> to vector<8x8xf32>
    %104 = arith.truncf %103 : vector<8x8xf32> to vector<8x8xbf16>
    %c3_46 = arith.constant 3 : index
    %105 = arith.index_cast %45 : i32 to index
    %c0_47 = arith.constant 0 : index
    %106 = vector.load %arg21[%c3_46, %105, %c0_47] : memref<4x8x8xbf16, #tpu.memory_space<vmem>>, vector<1x8x8xbf16>
    %107 = vector.shape_cast %106 : vector<1x8x8xbf16> to vector<8x8xbf16>
    %108 = vector.shape_cast %104 : vector<8x8xbf16> to vector<1x8x8xbf16>
    tpu.vector_store %arg21[%c3_46, %105, %c0_47], %108 {strides = array<i32>} : memref<4x8x8xbf16, #tpu.memory_space<vmem>>, vector<1x8x8xbf16>,
    %109 = vector.extract_strided_slice %43 {offsets = [0, 24], sizes = [8, 8], strides = [1, 1]} : vector<8x32xf32> to vector<8x8xf32>
    %110 = arith.truncf %109 : vector<8x8xf32> to vector<8x8xbf16>
    %c3_48 = arith.constant 3 : index
    %c0_49 = arith.constant 0 : index
    %c0_50 = arith.constant 0 : index
    %111 = vector.load %arg22[%c3_48, %c0_49, %c0_50] : memref<4x8x8xbf16, #tpu.memory_space<vmem>>, vector<1x8x8xbf16>
    %112 = vector.shape_cast %111 : vector<1x8x8xbf16> to vector<8x8xbf16>
    %113 = vector.shape_cast %110 : vector<8x8xbf16> to vector<1x8x8xbf16>
    tpu.vector_store %arg22[%c3_48, %c0_49, %c0_50], %113 {strides = array<i32>} : memref<4x8x8xbf16, #tpu.memory_space<vmem>>, vector<1x8x8xbf16>,
    %c0_51 = arith.constant 0 : index
    %c0_52 = arith.constant 0 : index
    %c0_53 = arith.constant 0 : index
    %114 = vector.load %arg22[%c0_51, %c0_52, %c0_53] : memref<4x8x8xbf16, #tpu.memory_space<vmem>>, vector<4x8x8xbf16>
    %cst_54 = arith.constant -1.000000e+30 : f32
    %115 = vector.broadcast %cst_54 : f32 to vector<4x8x1xf32>
    %cst_55 = arith.constant 0.000000e+00 : f32
    %116 = vector.broadcast %cst_55 : f32 to vector<4x8x1xf32>
    %cst_56 = arith.constant 0.000000e+00 : f32
    %117 = vector.broadcast %cst_56 : f32 to vector<4x8x8xf32>
    %c0_i32 = arith.constant 0 : i32
    %118 = arith.subi %arg1, %c0_i32 : i32
    %119 = arith.addi %c0_i32, %118 : i32
    %c1_i32 = arith.constant 1 : i32
    %120:3 = scf.for %arg24 = %c0_i32 to %119 step %c1_i32 iter_args(%arg25 = %115, %arg26 = %116, %arg27 = %117) -> (vector<4x8x1xf32>, vector<4x8x1xf32>, vector<4x8x8xf32>)  : i32 {
      %c8_i32_105 = arith.constant 8 : i32
      %232 = arith.muli %arg24, %c8_i32_105 : i32
      %233 = tpu.assume_multiple %232, 8 : i32
      %c0_106 = arith.constant 0 : index
      %234 = arith.index_cast %233 : i32 to index
      %c0_107 = arith.constant 0 : index
      %235 = vector.load %arg20[%c0_106, %234, %c0_107] : memref<4x8x8xbf16, #tpu.memory_space<vmem>>, vector<4x8x8xbf16>
      %c0_108 = arith.constant 0 : index
      %236 = arith.index_cast %233 : i32 to index
      %c0_109 = arith.constant 0 : index
      %237 = vector.load %arg21[%c0_108, %236, %c0_109] : memref<4x8x8xbf16, #tpu.memory_space<vmem>>, vector<4x8x8xbf16>
      "tpu.trace_start"() <{level = 10 : i32, message = "hqd,hkd->hqk"}> : () -> ()
      %cst_110 = arith.constant dense<0.000000e+00> : vector<4x8x8xf32>
      %238 = tpu.matmul %114, %235, %cst_110 {dimension_numbers = #tpu.dot_dimension_numbers<[2], [2], [1], [1], [0, 0, 0, 1, 1, 1], [0], [0]>} : vector<4x8x8xbf16>, vector<4x8x8xbf16>, vector<4x8x8xf32> -> vector<4x8x8xf32>
      "tpu.trace_stop"() : () -> ()
      %cst_111 = arith.constant dense<0xFF800000> : vector<4x8xf32>
      %239 = vector.multi_reduction <maximumf>, %238, %cst_111 [2] : vector<4x8x8xf32> to vector<4x8xf32>
      %240 = vector.shape_cast %239 : vector<4x8xf32> to vector<4x8x1xf32>
      %241 = arith.maximumf %arg25, %240 : vector<4x8x1xf32>
      %242 = arith.subf %arg25, %241 : vector<4x8x1xf32>
      %243 = math.exp %242 : vector<4x8x1xf32>
      %244 = vector.broadcast %241 : vector<4x8x1xf32> to vector<4x8x8xf32>
      %245 = arith.subf %238, %244 : vector<4x8x8xf32>
      %246 = math.exp %245 : vector<4x8x8xf32>
      %247 = arith.mulf %243, %arg26 : vector<4x8x1xf32>
      %cst_112 = arith.constant dense<0.000000e+00> : vector<4x8xf32>
      %248 = vector.multi_reduction <add>, %246, %cst_112 [2] : vector<4x8x8xf32> to vector<4x8xf32>
      %249 = vector.shape_cast %248 : vector<4x8xf32> to vector<4x8x1xf32>
      %250 = arith.addf %247, %249 : vector<4x8x1xf32>
      %251 = vector.broadcast %243 : vector<4x8x1xf32> to vector<4x8x8xf32>
      %252 = arith.mulf %251, %arg27 : vector<4x8x8xf32>
      %253 = arith.truncf %246 : vector<4x8x8xf32> to vector<4x8x8xbf16>
      "tpu.trace_start"() <{level = 10 : i32, message = "hqk,hkd->hqd"}> : () -> ()
      %cst_113 = arith.constant dense<0.000000e+00> : vector<4x8x8xf32>
      %254 = tpu.matmul %253, %237, %cst_113 {dimension_numbers = #tpu.dot_dimension_numbers<[2], [1], [1], [2], [0, 0, 0, 1, 1, 2], [0], [0]>} : vector<4x8x8xbf16>, vector<4x8x8xbf16>, vector<4x8x8xf32> -> vector<4x8x8xf32>
      "tpu.trace_stop"() : () -> ()
      %255 = arith.addf %252, %254 : vector<4x8x8xf32>
      scf.yield %241, %250, %255 : vector<4x8x1xf32>, vector<4x8x1xf32>, vector<4x8x8xf32>
    }
    %c0_57 = arith.constant 0 : index
    %121 = arith.index_cast %45 : i32 to index
    %c0_58 = arith.constant 0 : index
    %122 = vector.load %arg20[%c0_57, %121, %c0_58] : memref<4x8x8xbf16, #tpu.memory_space<vmem>>, vector<4x8x8xbf16>
    %c0_59 = arith.constant 0 : index
    %123 = arith.index_cast %45 : i32 to index
    %c0_60 = arith.constant 0 : index
    %124 = vector.load %arg21[%c0_59, %123, %c0_60] : memref<4x8x8xbf16, #tpu.memory_space<vmem>>, vector<4x8x8xbf16>
    %125 = tpu.iota {dimensions = array<i32: 0>} : vector<8x8xi32>
    %126 = tpu.iota {dimensions = array<i32: 1>} : vector<8x8xi32>
    %127 = arith.cmpi sle, %126, %125 : vector<8x8xi32>
    %128 = vector.shape_cast %127 : vector<8x8xi1> to vector<1x8x8xi1>
    "tpu.trace_start"() <{level = 10 : i32, message = "hqd,hkd->hqk"}> : () -> ()
    %cst_61 = arith.constant dense<0.000000e+00> : vector<4x8x8xf32>
    %129 = tpu.matmul %114, %122, %cst_61 {dimension_numbers = #tpu.dot_dimension_numbers<[2], [2], [1], [1], [0, 0, 0, 1, 1, 1], [0], [0]>} : vector<4x8x8xbf16>, vector<4x8x8xbf16>, vector<4x8x8xf32> -> vector<4x8x8xf32>
    %cst_62 = arith.constant -1.000000e+30 : f32
    "tpu.trace_stop"() : () -> ()
    %130 = vector.shape_cast %128 : vector<1x8x8xi1> to vector<1x8x8xi1>
    %131 = vector.broadcast %130 : vector<1x8x8xi1> to vector<4x8x8xi1>
    %132 = vector.broadcast %cst_62 : f32 to vector<4x8x8xf32>
    %133 = arith.select %131, %129, %132 : vector<4x8x8xi1>, vector<4x8x8xf32>
    %cst_63 = arith.constant dense<0xFF800000> : vector<4x8xf32>
    %134 = vector.multi_reduction <maximumf>, %133, %cst_63 [2] : vector<4x8x8xf32> to vector<4x8xf32>
    %135 = vector.shape_cast %134 : vector<4x8xf32> to vector<4x8x1xf32>
    %136 = arith.maximumf %120#0, %135 : vector<4x8x1xf32>
    %137 = arith.subf %120#0, %136 : vector<4x8x1xf32>
    %138 = math.exp %137 : vector<4x8x1xf32>
    %139 = vector.broadcast %136 : vector<4x8x1xf32> to vector<4x8x8xf32>
    %140 = arith.subf %133, %139 : vector<4x8x8xf32>
    %141 = math.exp %140 : vector<4x8x8xf32>
    %142 = arith.mulf %138, %120#1 : vector<4x8x1xf32>
    %cst_64 = arith.constant dense<0.000000e+00> : vector<4x8xf32>
    %143 = vector.multi_reduction <add>, %141, %cst_64 [2] : vector<4x8x8xf32> to vector<4x8xf32>
    %144 = vector.shape_cast %143 : vector<4x8xf32> to vector<4x8x1xf32>
    %145 = arith.addf %142, %144 : vector<4x8x1xf32>
    %146 = vector.broadcast %138 : vector<4x8x1xf32> to vector<4x8x8xf32>
    %147 = arith.mulf %146, %120#2 : vector<4x8x8xf32>
    %148 = arith.truncf %141 : vector<4x8x8xf32> to vector<4x8x8xbf16>
    "tpu.trace_start"() <{level = 10 : i32, message = "hqk,hkd->hqd"}> : () -> ()
    %cst_65 = arith.constant dense<0.000000e+00> : vector<4x8x8xf32>
    %149 = tpu.matmul %148, %124, %cst_65 {dimension_numbers = #tpu.dot_dimension_numbers<[2], [1], [1], [2], [0, 0, 0, 1, 1, 2], [0], [0]>} : vector<4x8x8xbf16>, vector<4x8x8xbf16>, vector<4x8x8xf32> -> vector<4x8x8xf32>
    "tpu.trace_stop"() : () -> ()
    %150 = arith.addf %147, %149 : vector<4x8x8xf32>
    %151 = tpu.reciprocal %145 : vector<4x8x1xf32> -> vector<4x8x1xf32>
    %152 = vector.broadcast %151 : vector<4x8x1xf32> to vector<4x8x8xf32>
    %153 = arith.mulf %150, %152 : vector<4x8x8xf32>
    %154 = vector.extract_strided_slice %153 {offsets = [0, 0, 0], sizes = [1, 8, 8], strides = [1, 1, 1]} : vector<4x8x8xf32> to vector<1x8x8xf32>
    %155 = vector.shape_cast %154 : vector<1x8x8xf32> to vector<8x8xf32>
    %156 = arith.truncf %155 : vector<8x8xf32> to vector<8x8xbf16>
    %c0_66 = arith.constant 0 : index
    %c0_67 = arith.constant 0 : index
    %157 = vector.load %arg23[%c0_66, %c0_67] : memref<8x32xbf16, #tpu.memory_space<vmem>>, vector<8x8xbf16>
    tpu.vector_store %arg23[%c0_66, %c0_67], %156 {strides = array<i32>} : memref<8x32xbf16, #tpu.memory_space<vmem>>, vector<8x8xbf16>,
    %158 = vector.extract_strided_slice %153 {offsets = [1, 0, 0], sizes = [1, 8, 8], strides = [1, 1, 1]} : vector<4x8x8xf32> to vector<1x8x8xf32>
    %159 = vector.shape_cast %158 : vector<1x8x8xf32> to vector<8x8xf32>
    %160 = arith.truncf %159 : vector<8x8xf32> to vector<8x8xbf16>
    %c0_68 = arith.constant 0 : index
    %c8 = arith.constant 8 : index
    %161 = vector.load %arg23[%c0_68, %c8] : memref<8x32xbf16, #tpu.memory_space<vmem>>, vector<8x8xbf16>
    tpu.vector_store %arg23[%c0_68, %c8], %160 {strides = array<i32>} : memref<8x32xbf16, #tpu.memory_space<vmem>>, vector<8x8xbf16>,
    %162 = vector.extract_strided_slice %153 {offsets = [2, 0, 0], sizes = [1, 8, 8], strides = [1, 1, 1]} : vector<4x8x8xf32> to vector<1x8x8xf32>
    %163 = vector.shape_cast %162 : vector<1x8x8xf32> to vector<8x8xf32>
    %164 = arith.truncf %163 : vector<8x8xf32> to vector<8x8xbf16>
    %c0_69 = arith.constant 0 : index
    %c16 = arith.constant 16 : index
    %165 = vector.load %arg23[%c0_69, %c16] : memref<8x32xbf16, #tpu.memory_space<vmem>>, vector<8x8xbf16>
    tpu.vector_store %arg23[%c0_69, %c16], %164 {strides = array<i32>} : memref<8x32xbf16, #tpu.memory_space<vmem>>, vector<8x8xbf16>,
    %166 = vector.extract_strided_slice %153 {offsets = [3, 0, 0], sizes = [1, 8, 8], strides = [1, 1, 1]} : vector<4x8x8xf32> to vector<1x8x8xf32>
    %167 = vector.shape_cast %166 : vector<1x8x8xf32> to vector<8x8xf32>
    %168 = arith.truncf %167 : vector<8x8xf32> to vector<8x8xbf16>
    %c0_70 = arith.constant 0 : index
    %c24 = arith.constant 24 : index
    %169 = vector.load %arg23[%c0_70, %c24] : memref<8x32xbf16, #tpu.memory_space<vmem>>, vector<8x8xbf16>
    tpu.vector_store %arg23[%c0_70, %c24], %168 {strides = array<i32>} : memref<8x32xbf16, #tpu.memory_space<vmem>>, vector<8x8xbf16>,
    %c0_71 = arith.constant 0 : index
    %c0_72 = arith.constant 0 : index
    %170 = vector.load %arg23[%c0_71, %c0_72] : memref<8x32xbf16, #tpu.memory_space<vmem>>, vector<8x32xbf16>
    %c0_73 = arith.constant 0 : index
    %c0_74 = arith.constant 0 : index
    %171 = vector.load %arg11[%c0_73, %c0_74] : memref<32x32xbf16, #tpu.memory_space<vmem>>, vector<32x32xbf16>
    %cst_75 = arith.constant dense<0.000000e+00> : vector<8x32xf32>
    %172 = tpu.matmul %170, %171, %cst_75 {dimension_numbers = #tpu.dot_dimension_numbers<[1], [0], [0], [1], [0, 0, 1, 1], [], []>} : vector<8x32xbf16>, vector<32x32xbf16>, vector<8x32xf32> -> vector<8x32xf32>
    %c0_76 = arith.constant 0 : index
    %c0_77 = arith.constant 0 : index
    %173 = vector.load %arg12[%c0_76, %c0_77] : memref<1x32xf32, #tpu.memory_space<vmem>>, vector<1x32xf32>
    %174 = vector.broadcast %173 : vector<1x32xf32> to vector<8x32xf32>
    %175 = arith.addf %172, %174 : vector<8x32xf32>
    %176 = arith.addf %175, %1 : vector<8x32xf32>
    %c0_78 = arith.constant 0 : index
    %c0_79 = arith.constant 0 : index
    %177 = vector.load %arg13[%c0_78, %c0_79] : memref<1x32xf32, #tpu.memory_space<vmem>>, vector<1x32xf32>
    %c0_80 = arith.constant 0 : index
    %c0_81 = arith.constant 0 : index
    %178 = vector.load %arg14[%c0_80, %c0_81] : memref<1x32xf32, #tpu.memory_space<vmem>>, vector<1x32xf32>
    %cst_82 = arith.constant dense<0.000000e+00> : vector<8xf32>
    %179 = vector.multi_reduction <add>, %176, %cst_82 [1] : vector<8x32xf32> to vector<8xf32>
    %180 = vector.shape_cast %179 : vector<8xf32> to vector<8x1xf32>
    %cst_83 = arith.constant 3.200000e+01 : f32
    %181 = vector.broadcast %cst_83 : f32 to vector<8x1xf32>
    %182 = arith.divf %180, %181 : vector<8x1xf32>
    %183 = vector.broadcast %182 : vector<8x1xf32> to vector<8x32xf32>
    %184 = arith.subf %176, %183 : vector<8x32xf32>
    %185 = arith.mulf %184, %184 : vector<8x32xf32>
    %cst_84 = arith.constant dense<0.000000e+00> : vector<8xf32>
    %186 = vector.multi_reduction <add>, %185, %cst_84 [1] : vector<8x32xf32> to vector<8xf32>
    %187 = vector.shape_cast %186 : vector<8xf32> to vector<8x1xf32>
    %cst_85 = arith.constant 3.200000e+01 : f32
    %188 = vector.broadcast %cst_85 : f32 to vector<8x1xf32>
    %189 = arith.divf %187, %188 : vector<8x1xf32>
    %190 = vector.broadcast %182 : vector<8x1xf32> to vector<8x32xf32>
    %191 = arith.subf %176, %190 : vector<8x32xf32>
    %cst_86 = arith.constant 9.99999974E-6 : f32
    %192 = vector.broadcast %cst_86 : f32 to vector<8x1xf32>
    %193 = arith.addf %189, %192 : vector<8x1xf32>
    %194 = math.rsqrt %193 : vector<8x1xf32>
    %195 = vector.broadcast %194 : vector<8x1xf32> to vector<8x32xf32>
    %196 = arith.mulf %191, %195 : vector<8x32xf32>
    %197 = vector.broadcast %177 : vector<1x32xf32> to vector<8x32xf32>
    %198 = arith.mulf %196, %197 : vector<8x32xf32>
    %199 = vector.broadcast %178 : vector<1x32xf32> to vector<8x32xf32>
    %200 = arith.addf %198, %199 : vector<8x32xf32>
    %201 = arith.truncf %200 : vector<8x32xf32> to vector<8x32xbf16>
    %cst_87 = arith.constant 0.000000e+00 : f32
    %202 = vector.broadcast %cst_87 : f32 to vector<8x32xf32>
    %c0_88 = arith.constant 0 : index
    %c0_89 = arith.constant 0 : index
    %203 = vector.load %arg15[%c0_88, %c0_89] : memref<32x128xbf16, #tpu.memory_space<vmem>>, vector<32x128xbf16>
    %cst_90 = arith.constant dense<0.000000e+00> : vector<8x128xf32>
    %204 = tpu.matmul %201, %203, %cst_90 {dimension_numbers = #tpu.dot_dimension_numbers<[1], [0], [0], [1], [0, 0, 1, 1], [], []>} : vector<8x32xbf16>, vector<32x128xbf16>, vector<8x128xf32> -> vector<8x128xf32>
    %c0_91 = arith.constant 0 : index
    %c0_92 = arith.constant 0 : index
    %205 = vector.load %arg16[%c0_91, %c0_92] : memref<1x128xf32, #tpu.memory_space<vmem>>, vector<1x128xf32>
    %206 = vector.broadcast %205 : vector<1x128xf32> to vector<8x128xf32>
    %207 = arith.addf %204, %206 : vector<8x128xf32>
    %cst_93 = arith.constant 5.000000e-01 : f32
    %208 = vector.broadcast %cst_93 : f32 to vector<8x128xf32>
    %209 = arith.mulf %208, %207 : vector<8x128xf32>
    %cst_94 = arith.constant 4.471500e-02 : f32
    %210 = vector.broadcast %cst_94 : f32 to vector<8x128xf32>
    %211 = arith.mulf %210, %207 : vector<8x128xf32>
    %212 = arith.mulf %211, %207 : vector<8x128xf32>
    %213 = arith.mulf %212, %207 : vector<8x128xf32>
    %214 = arith.addf %207, %213 : vector<8x128xf32>
    %cst_95 = arith.constant 0.797884583 : f32
    %215 = vector.broadcast %cst_95 : f32 to vector<8x128xf32>
    %216 = arith.mulf %215, %214 : vector<8x128xf32>
    %217 = math.tanh %216 : vector<8x128xf32>
    %cst_96 = arith.constant 1.000000e+00 : f32
    %218 = vector.broadcast %cst_96 : f32 to vector<8x128xf32>
    %219 = arith.addf %218, %217 : vector<8x128xf32>
    %220 = arith.mulf %209, %219 : vector<8x128xf32>
    %221 = arith.truncf %220 : vector<8x128xf32> to vector<8x128xbf16>
    %c0_97 = arith.constant 0 : index
    %c0_98 = arith.constant 0 : index
    %222 = vector.load %arg17[%c0_97, %c0_98] : memref<128x32xbf16, #tpu.memory_space<vmem>>, vector<128x32xbf16>
    %cst_99 = arith.constant dense<0.000000e+00> : vector<8x32xf32>
    %223 = tpu.matmul %221, %222, %cst_99 {dimension_numbers = #tpu.dot_dimension_numbers<[1], [0], [0], [1], [0, 0, 1, 1], [], []>} : vector<8x128xbf16>, vector<128x32xbf16>, vector<8x32xf32> -> vector<8x32xf32>
    %224 = arith.addf %202, %223 : vector<8x32xf32>
    %c0_100 = arith.constant 0 : index
    %c0_101 = arith.constant 0 : index
    %225 = vector.load %arg18[%c0_100, %c0_101] : memref<1x32xf32, #tpu.memory_space<vmem>>, vector<1x32xf32>
    %226 = vector.broadcast %225 : vector<1x32xf32> to vector<8x32xf32>
    %227 = arith.addf %224, %226 : vector<8x32xf32>
    %228 = arith.addf %227, %176 : vector<8x32xf32>
    %c0_102 = arith.constant 0 : index
    %c0_103 = arith.constant 0 : index
    %c0_104 = arith.constant 0 : index
    %229 = vector.load %arg19[%c0_102, %c0_103, %c0_104] : memref<1x8x32xf32, #tpu.memory_space<vmem>>, vector<1x8x32xf32>
    %230 = vector.shape_cast %229 : vector<1x8x32xf32> to vector<8x32xf32>
    %231 = vector.shape_cast %228 : vector<8x32xf32> to vector<1x8x32xf32>
    tpu.vector_store %arg19[%c0_102, %c0_103, %c0_104], %231 {strides = array<i32>} : memref<1x8x32xf32, #tpu.memory_space<vmem>>, vector<1x8x32xf32>,
    return
  }
  func.func @transform_0(%arg0: i32, %arg1: i32) -> (i32, i32, i32) {
    %c0_i32 = arith.constant 0 : i32
    %c0_i32_0 = arith.constant 0 : i32
    return %arg0, %arg1, %c0_i32 : i32, i32, i32
  }
  func.func @transform_1(%arg0: i32, %arg1: i32) -> (i32, i32) {
    %c0_i32 = arith.constant 0 : i32
    %c0_i32_0 = arith.constant 0 : i32
    %c0_i32_1 = arith.constant 0 : i32
    return %c0_i32, %c0_i32_0 : i32, i32
  }
  func.func @transform_2(%arg0: i32, %arg1: i32) -> (i32, i32) {
    %c0_i32 = arith.constant 0 : i32
    %c0_i32_0 = arith.constant 0 : i32
    %c0_i32_1 = arith.constant 0 : i32
    return %c0_i32, %c0_i32_0 : i32, i32
  }
  func.func @transform_3(%arg0: i32, %arg1: i32) -> (i32, i32) {
    %c0_i32 = arith.constant 0 : i32
    %c0_i32_0 = arith.constant 0 : i32
    %c0_i32_1 = arith.constant 0 : i32
    return %c0_i32, %c0_i32_0 : i32, i32
  }
  func.func @transform_4(%arg0: i32, %arg1: i32) -> (i32, i32) {
    %c0_i32 = arith.constant 0 : i32
    %c0_i32_0 = arith.constant 0 : i32
    %c0_i32_1 = arith.constant 0 : i32
    return %c0_i32, %c0_i32_0 : i32, i32
  }
  func.func @transform_5(%arg0: i32, %arg1: i32) -> (i32, i32) {
    %c0_i32 = arith.constant 0 : i32
    %c0_i32_0 = arith.constant 0 : i32
    %c0_i32_1 = arith.constant 0 : i32
    return %c0_i32, %c0_i32_0 : i32, i32
  }
  func.func @transform_6(%arg0: i32, %arg1: i32) -> (i32, i32) {
    %c0_i32 = arith.constant 0 : i32
    %c0_i32_0 = arith.constant 0 : i32
    %c0_i32_1 = arith.constant 0 : i32
    return %c0_i32, %c0_i32_0 : i32, i32
  }
  func.func @transform_7(%arg0: i32, %arg1: i32) -> (i32, i32) {
    %c0_i32 = arith.constant 0 : i32
    %c0_i32_0 = arith.constant 0 : i32
    %c0_i32_1 = arith.constant 0 : i32
    return %c0_i32, %c0_i32_0 : i32, i32
  }
  func.func @transform_8(%arg0: i32, %arg1: i32) -> (i32, i32) {
    %c0_i32 = arith.constant 0 : i32
    %c0_i32_0 = arith.constant 0 : i32
    %c0_i32_1 = arith.constant 0 : i32
    return %c0_i32, %c0_i32_0 : i32, i32
  }
  func.func @transform_9(%arg0: i32, %arg1: i32) -> (i32, i32) {
    %c0_i32 = arith.constant 0 : i32
    %c0_i32_0 = arith.constant 0 : i32
    %c0_i32_1 = arith.constant 0 : i32
    return %c0_i32, %c0_i32_0 : i32, i32
  }
  func.func @transform_10(%arg0: i32, %arg1: i32) -> (i32, i32) {
    %c0_i32 = arith.constant 0 : i32
    %c0_i32_0 = arith.constant 0 : i32
    %c0_i32_1 = arith.constant 0 : i32
    return %c0_i32, %c0_i32_0 : i32, i32
  }
  func.func @transform_11(%arg0: i32, %arg1: i32) -> (i32, i32) {
    %c0_i32 = arith.constant 0 : i32
    %c0_i32_0 = arith.constant 0 : i32
    %c0_i32_1 = arith.constant 0 : i32
    return %c0_i32, %c0_i32_0 : i32, i32
  }
  func.func @transform_12(%arg0: i32, %arg1: i32) -> (i32, i32) {
    %c0_i32 = arith.constant 0 : i32
    %c0_i32_0 = arith.constant 0 : i32
    %c0_i32_1 = arith.constant 0 : i32
    return %c0_i32, %c0_i32_0 : i32, i32
  }
  func.func @transform_13(%arg0: i32, %arg1: i32) -> (i32, i32) {
    %c0_i32 = arith.constant 0 : i32
    %c0_i32_0 = arith.constant 0 : i32
    %c0_i32_1 = arith.constant 0 : i32
    return %c0_i32, %c0_i32_0 : i32, i32
  }
  func.func @transform_14(%arg0: i32, %arg1: i32) -> (i32, i32) {
    %c0_i32 = arith.constant 0 : i32
    %c0_i32_0 = arith.constant 0 : i32
    %c0_i32_1 = arith.constant 0 : i32
    return %c0_i32, %c0_i32_0 : i32, i32
  }
  func.func @transform_15(%arg0: i32, %arg1: i32) -> (i32, i32) {
    %c0_i32 = arith.constant 0 : i32
    %c0_i32_0 = arith.constant 0 : i32
    %c0_i32_1 = arith.constant 0 : i32
    return %c0_i32, %c0_i32_0 : i32, i32
  }
  func.func @transform_16(%arg0: i32, %arg1: i32) -> (i32, i32) {
    %c0_i32 = arith.constant 0 : i32
    %c0_i32_0 = arith.constant 0 : i32
    %c0_i32_1 = arith.constant 0 : i32
    return %c0_i32, %c0_i32_0 : i32, i32
  }
  func.func @transform_17(%arg0: i32, %arg1: i32) -> (i32, i32, i32) {
    %c0_i32 = arith.constant 0 : i32
    %c0_i32_0 = arith.constant 0 : i32
    return %arg0, %arg1, %c0_i32 : i32, i32, i32
  }
}

</mosaic_0001>

<bundles_post_ra>
// kernel: tpu_custom_call.1
= control target key start
LH: loop header
LB: loop body
LE: loop exit
PB: predicated region body
PF: predicated region fallthrough
CT: control target
= control target key end

     0   :  { %s3431_s0 = inlined_call_operand.vmem [shape: f32[2,8,32], index: 0, kind: input, shape index: {}]   ;;  %s3432_s1 = inlined_call_operand.vmem [shape: f32[1,32], index: 1, kind: input, shape index: {}]   ;;  %s3433_s2 = inlined_call_operand.vmem [shape: f32[1,32], index: 2, kind: input, shape index: {}]   ;;  %s3434_s3 = inlined_call_operand.vmem [shape: bf16[32,32], index: 3, kind: input, shape index: {}]   ;;  %s3435_s4 = inlined_call_operand.hbm [shape: f32[1,32], index: 4, kind: input, shape index: {}]   ;;  %s3436_s5 = inlined_call_operand.vmem [shape: bf16[32,32], index: 5, kind: input, shape index: {}]   ;;  %s3437_s6 = inlined_call_operand.hbm [shape: f32[1,32], index: 6, kind: input, shape index: {}]   ;;  %s3438_s7 = inlined_call_operand.vmem [shape: bf16[32,32], index: 7, kind: input, shape index: {}]   ;;  %s3439_s8 = inlined_call_operand.hbm [shape: f32[1,32], index: 8, kind: input, shape index: {}]   ;;  %s3440_s9 = inlined_call_operand.vmem [shape: bf16[32,32], index: 9, kind: input, shape index: {}]   ;;  %s3441_s10 = inlined_call_operand.vmem [shape: f32[1,32], index: 10, kind: input, shape index: {}]   ;;  %s3442_s11 = inlined_call_operand.vmem [shape: f32[1,32], index: 11, kind: input, shape index: {}]   ;;  %s3443_s12 = inlined_call_operand.vmem [shape: f32[1,32], index: 12, kind: input, shape index: {}]   ;;  %s3444_s13 = inlined_call_operand.vmem [shape: bf16[32,128], index: 13, kind: input, shape index: {}]   ;;  %s3445_s14 = inlined_call_operand.vmem [shape: f32[1,128], index: 14, kind: input, shape index: {}]   ;;  %s3446_s15 = inlined_call_operand.vmem [shape: bf16[128,32], index: 15, kind: input, shape index: {}]   ;;  %s3447_s16 = inlined_call_operand.vmem [shape: f32[1,32], index: 16, kind: input, shape index: {}]   ;;  %s3448_s17 = inlined_call_operand.hbm [shape: f32[2,8,32], index: 17, kind: output, shape index: {}]  }
   0x1   :  { %3463 = sst [smem:[#allocation24_spill]] %s3431_s0 }
   0x2   :  { %3464 = sst [smem:[#allocation25_spill]] %s3432_s1 }
   0x3   :  { %3465 = sst [smem:[#allocation26_spill]] %s3437_s6 }
   0x4   :  { %3466 = sst [smem:[#allocation27_spill]] %s3447_s16 }
   0x5   :  { %3467 = sst [smem:[#allocation28_spill]] %s3448_s17 }
   0x6   :  { %22 = vsyncpa [#allocation7], 0 }
   0x7   :  { %23 = vsyncpa [#allocation10], 0 }
   0x8   :  { %24 = vsyncpa [#allocation8], 0 }
   0x9   :  { %26 = vsyncpa [#allocation8 + $0x1], 0  ;;  %s3010_s24 = smov 0   ;;  %s3012_s25 = smov 0  }
   0xa   :  { %s3014_s26 = smov 0   ;;  %s3016_s27 = smov 0  }
   0xb   :  { %s3018_s28 = smov 0   ;;  %s3020_s29 = smov 0  }
   0xc LB: > { %3468 = sst [smem:[#allocation16_spill]] %s2886_s24  ;;  %s2359_s0 = sadd.s32 4294967295, %s2906_s29   ;;  %s2906_s29 = sphi %s3020_s29, %s32_s29   ;;  %s2902_s28 = sphi %s3018_s28, %s3498_s28   ;;  %s2898_s27 = sphi %s3016_s27, %s3497_s27   ;;  %s2894_s26 = sphi %s3014_s26, %s3496_s26   ;;  %s2890_s25 = sphi %s3012_s25, %s3500_s25   ;;  %s2886_s24 = sphi %s3010_s24, %s3499_s24  }
   0xd   : > { %3469 = sst [smem:[#allocation17_spill]] %s2894_s26  ;;  %s2360_s30 = sadd.s32 4294967294, %s2906_s29  }
   0xe   : > { %3470 = sst [smem:[#allocation18_spill]] %s2902_s28  ;;  %s44_s18 = sadd.s32 1, %s2902_s28 }
   0xf   : > { %3471 = sst [smem:[#allocation19_spill]] %s2906_s29  ;;  %s417_s19 = sadd.s32 1, %s2894_s26 }
  0x10   : > { %p46_p0 = scmp.ge.s32.totalorder %s44_s18, 2  ;;  %p427_p1 = scmp.ne.s32.totalorder %s2894_s26, %s2890_s25 }
  0x11   : > { %p428_p2 = scmp.eq.s32.totalorder %s2359_s0, 1  ;;  %p433_p3 = scmp.ne.s32.totalorder %s2890_s25, %s2886_s24 }
  0x12   : > { %s3502_s18 = smov (%p46_p0, %s44_s18), 0  ;;  %p434_p5 = scmp.eq.s32.totalorder %s2360_s30, 1 }
  0x13   : > { %3472 = sst [smem:[#allocation20_spill]] %s3502_s18  ;;  %p3050_p4 = por %p428_p2, %p427_p1 }
  0x14   : > { %s412_s20 = ssub.s32 %s2902_s28, %s3502_s18  ;;  %p2361_p6 = scmp.ge.s32.totalorder %s2906_s29, 1 }
  0x15   : > { %s3473_s1 = scalar_select %p3050_p4, 1, 0 }
  0x16   : > { %p415_p7 = scmp.eq.s32.totalorder %s412_s20, 0  ;;  %p3057_p8 = por %p434_p5, %p433_p3 }
  0x17   : > { %3474 = sst [smem:[#allocation21_spill]] %s3473_s1  ;;  %p441_p9 = scmp.lt.s32.totalorder %s2906_s29, 3 }
  0x18   : > { %s3475_s21 = scalar_select %p3057_p8, 1, 0 }
  0x19   : > { %s3063_s22 = scalar_select %p415_p7, %s2894_s26, %s417_s19  }
  0x1a   : > { %3476 = sst [smem:[#allocation22_spill]] %s3475_s21  ;;  %p3065_p10 = pnand %p2361_p6, %p441_p9 }
  0x1b   : > { %3477 = sst [smem:[#allocation23_spill]] %s3063_s22  ;;  %p3069_p11 = scmp.eq.s32.totalorder %s2359_s0, 0 }
  0x1c   : > { %s3478_s23 = scalar_select %p3065_p10, 1, 0 }
  0x1d   : > { %s3479_s24 = scalar_select %p3069_p11, 1, 0 }
  0x1e   : > { %p2608_p12 = pneg %p3065_p10  ;;  %s2908_s30 = smov [#allocation9]  }
  0x1f   : > { %s477_s20 = sshll.u32 %s2908_s30, 4  ;;  %s2909_s19 = smov [#allocation6]   ;;  %s478_s20 = int_to_ptr.vmem [resolvable:$true] %s477_s20 }
  0x20   : > { %p3077_p13 = pnand %p3069_p11, %p2608_p12  ;;  %s463_s28 = sshll.u32 %s2909_s19, 4  ;;  %s3081_s28 = int_to_ptr.vmem [resolvable:$true] %s463_s28 }
  0x21   : > { %s3481_s6 = sld [smem:[#allocation26_spill]] }
  0x22   : > { %p3091_p1 = pneg %p3077_p13 }
  0x27   : > { %s2736_s26 = scalar_lea.hbm %s3481_s6, 16 }
  0x28   : > { %p2737_p0 = scmp.ne.s32.totalorder %s3481_s6, %s2736_s26  ;;  %p2743_p5 = scmp.lt.u32.totalorder %s2736_s26, %s3481_s6 }
  0x2a   : > { %p2739_p2 = pnand %p3091_p1, %p2737_p0 }
  0x2c   : > { %p2740_p3 = pneg %p2739_p2 }
  0x2e   : > { %p2745_p6 = pnand %p2743_p5, %p2740_p3 }
  0x30   : > { %2748 = shalt.err (!%p2745_p6)
}
  0x31   : > { %s2749_s22 = scalar_lea.vmem %s478_s20, 16  ;;  %s2756_s29 = scalar_lea.vmem %s478_s20, 32 }
  0x32   : > { %p2750_p7 = scmp.ne.s32.totalorder %s478_s20, %s2749_s22  ;;  %p2757_p8 = scmp.lt.s32.totalorder %s478_s20, %s478_s20 }
  0x33   : > { %p2758_p4 = scmp.lt.s32.totalorder %s2756_s29, %s2749_s22 }
  0x34   : > { %p2752_p9 = pnand %p2750_p7, %p3091_p1 }
  0x35   : > { %p2759_p11 = por %p2758_p4, %p2757_p8 }
  0x36   : > { %p2753_p12 = pneg %p2752_p9 }
  0x38   : > { %p2760_p10 = pnand %p2759_p11, %p2753_p12 }
  0x3a   : > { %2763 = shalt.err (!%p2760_p10)
}
  0x3b   : > { %2614 = dma.hbm_to_vmem [thread:$0]  (!%p3077_p13), %s3481_s6, 16, %s478_s20, [#allocation10]  }
  0x3c   : > { %s2764_s19 = scalar_lea.hbm %s3435_s4, 16 }
  0x3d   : > { %p2765_p0 = scmp.ne.s32.totalorder %s3435_s4, %s2764_s19  ;;  %p2771_p8 = scmp.lt.u32.totalorder %s2764_s19, %s3435_s4 }
  0x3f   : > { %p2767_p2 = pnand %p2765_p0, %p3091_p1 }
  0x41   : > { %p2768_p4 = pneg %p2767_p2 }
  0x43   : > { %p2773_p10 = pnand %p2771_p8, %p2768_p4 }
  0x45   : > { %2776 = shalt.err (!%p2773_p10)
}
  0x46   : > { %s2777_s20 = scalar_lea.vmem %s3081_s28, 16  ;;  %s2784_s16 = scalar_lea.vmem %s3081_s28, 32 }
  0x47   : > { %p2778_p11 = scmp.ne.s32.totalorder %s3081_s28, %s2777_s20  ;;  %p2785_p6 = scmp.lt.s32.totalorder %s3081_s28, %s3081_s28 }
  0x48   : > { %p2786_p7 = scmp.lt.s32.totalorder %s2784_s16, %s2777_s20 }
  0x49   : > { %p2780_p3 = pnand %p2778_p11, %p3091_p1 }
  0x4a   : > { %p2787_p9 = por %p2786_p7, %p2785_p6 }
  0x4b   : > { %p2781_p5 = pneg %p2780_p3 }
  0x4d   : > { %p2788_p12 = pnand %p2787_p9, %p2781_p5 }
  0x4f   : > { %2791 = shalt.err (!%p2788_p12)
}
  0x50   : > { %2611 = dma.hbm_to_vmem [thread:$0]  (!%p3077_p13), %s3435_s4, 16, %s3081_s28, [#allocation7]  }
  0x51   : > { %s2910_s0 = smov [#allocation11]   ;;  %s2792_s22 = scalar_lea.hbm %s3439_s8, 16 }
  0x52   : > { %s491_s17 = sshll.u32 %s2910_s0, 4  ;;  %p2793_p0 = scmp.ne.s32.totalorder %s3439_s8, %s2792_s22  ;;  %s492_s17 = int_to_ptr.vmem [resolvable:$true] %s491_s17 }
  0x53   : > { %p2799_p8 = scmp.lt.u32.totalorder %s2792_s22, %s3439_s8 }
  0x54   : > { %p2795_p2 = pnand %p2793_p0, %p3091_p1 }
  0x56   : > { %p2796_p4 = pneg %p2795_p2 }
  0x58   : > { %p2801_p10 = pnand %p2799_p8, %p2796_p4 }
  0x5a   : > { %2804 = shalt.err (!%p2801_p10)
}
  0x5b   : > { %s2805_s28 = scalar_lea.vmem %s492_s17, 16  ;;  %s2812_s1 = scalar_lea.vmem %s492_s17, 32 }
  0x5c   : > { %p2806_p11 = scmp.ne.s32.totalorder %s492_s17, %s2805_s28  ;;  %p2813_p6 = scmp.lt.s32.totalorder %s492_s17, %s492_s17 }
  0x5d   : > { %p2814_p7 = scmp.lt.s32.totalorder %s2812_s1, %s2805_s28 }
  0x5e   : > { %p2808_p3 = pnand %p2806_p11, %p3091_p1 }
  0x5f   : > { %p2815_p9 = por %p2814_p7, %p2813_p6 }
  0x60   : > { %p2809_p5 = pneg %p2808_p3 }
  0x62   : > { %p2816_p12 = pnand %p2815_p9, %p2809_p5 }
  0x64   : > { %2819 = shalt.err (!%p2816_p12)
}
  0x65   : > { %2617 = dma.hbm_to_vmem [thread:$0]  (!%p3077_p13), %s3439_s8, 16, %s492_s17, [#allocation10]  }
  0x66   : > { %p3483_p0 = scmp.ne.s32.totalorder %s3478_s23, 0 }
  0x67   : > { %p3484_p2 = scmp.ne.s32.totalorder (!%p3483_p0), %s3479_s24, 0 }
  0x68   : > { %538 = sbr.rel (%p3483_p0) target bundleno = 2518 (0x9d6), region = 88 }
  0x6f   : > { %2873 = dma.done.wait (%p3484_p2), [#allocation7], 16  }
  0x70   : > { %2875 = vsyncadd (%p3484_p2), [#allocation7], 4294967280 }
  0x71   : > { %2877 = dma.done.wait (%p3484_p2), [#allocation10], 32  }
  0x72   : > { %2879 = vsyncadd (%p3484_p2), [#allocation10], 4294967264  ;;  %p600_p1 = scmp.lt.s32.totalorder %s2898_s27, 1  ;;  %s3485_s17 = sld [smem:[#allocation24_spill]]  ;;  %vm611_vm0 = vcmask 261120   ;;  %v2688_v7 = vld [vmem:[%s3434_s3] sm:$0xff]  }
  0x73   : > { %v2911_v8 = vmov 0.0   ;;  %vm2912_vm1 = vmmov 0   ;;  %v2689_v9 = vld [vmem:[%s3434_s3 + $0x8] sm:$0xff]   ;;  %s3486_s28 = sld [smem:[#allocation25_spill]]  ;;  %v2373_v16 = vld [vmem:[%s3433_s2] ss:$0 sm:$0xff] }
  0x74   : > { %s601_s6 = scalar_select %p600_p1, %s2898_s27, 1  ;;  %2486 = vmatprep.subr.bf16.mxu0 %v2911_v8  ;;  %2490 = vmatprep.mubr.msk.bf16.mxu0 %vm2912_vm1, %v2911_v8  ;;  %v2690_v19 = vld [vmem:[%s3436_s5] sm:$0xff]   ;;  %v2691_v21 = vld [vmem:[%s3436_s5 + $0x8] sm:$0xff]   ;;  %v2374_v24 = vld [vmem:[#allocation6] ss:$0 sm:$0xff]  ;;  %vm840_vm2 = vcmask 60416  }
  0x75   : > { %2487 = vmatpush3.bf16.msra.mxu0 %v2688_v7  ;;  %2510 = vmatprep.subr.bf16.mxu1 %v2911_v8  ;;  %v2692_v22 = vld [vmem:[%s3438_s7] sm:$0xff]   ;;  %v2693_v23 = vld [vmem:[%s3438_s7 + $0x8] sm:$0xff]   ;;  %v2378_v32 = vld [vmem:[#allocation9] ss:$0 sm:$0xff]  ;;  %s2913_s19 = smov 120   ;;  %s2914_s22 = smov 112  }
  0x76   : > { %s2371_s18 = sshll.u32 %s601_s6, 3  ;;  %2488 = vmatprep.subr.bf16.mxu0 %v2911_v8  ;;  %2512 = vmatprep.mubr.msk.bf16.mxu1 %vm2912_vm1, %v2911_v8  ;;  %v2382_v39 = vld [vmem:[#allocation11] ss:$0 sm:$0xff]  ;;  %vm1403_vm3 = vcmask 64512   ;;  %s2915_s29 = smov 104   ;;  %vm1665_vm4 = vcmask 1043456  }
  0x77   : > { %s2916_s21 = smov 8   ;;  %s2917_s0 = smov 16   ;;  %vm1868_vm6 = vcmask 126016   ;;  %vm1877_vm7 = vcmask 191616   ;;  %vm1886_vm8 = vcmask 257216  }
  0x78   : > { %s606_s26 = scalar_lea.vmem %s3485_s17, %s2371_s18  ;;  %s2918_s6 = smov 24  }
  0x79   : > { %v3164_v0 = vld [vmem:[%s606_s26] sm:$0xff]  ;;  %2489 = vmatpush3.bf16.msra.mxu0 %v2689_v9  ;;  %s597_s1 = sand.u32 1, %s2890_s25   ;;  %s3487_s18 = sld [smem:[#allocation27_spill]] }
  0x7a   : > { %v612_v1 = vsel %vm611_vm0, %v3164_v0, 0.0  ;;  %2494 = vmatprep.subr.bf16.mxu0 %v2911_v8  ;;  %v2372_v14 = vld [vmem:[%s3486_s28] ss:$0 sm:$0xff]  ;;  %s3488_s30 = sld [smem:[#allocation21_spill]]  ;;  %s2437_s23 = sshll.u32 %s2898_s27, 7 }
  0x7b   : > { %613 = vadd.xlane.f32.xlu0 %v612_v1  ;;  %s2176_s27 = scalar_lea.sflag [#allocation8], %s597_s1  ;;  %s2919_s16 = smov [#allocation12]  }
  0x7c   : > { %s2824_s28 = sshll.u32 %s2919_s16, 4  ;;  %s2825_s28 = int_to_ptr.vmem [resolvable:$false] %s2824_s28 }
  0x80   : > { %p3490_p4 = scmp.ne.s32.totalorder %s3488_s30, 0 }
 0x108   : > { %v614_v2 = vpop.xlane.xlu0 %613 }
 0x109   : > { %v616_v3 = vmul.f32 0.03125, %v614_v2 }
 0x10b   : > { %v617_v4 = vsub.f32 %v3164_v0, %v616_v3  ;;  %v1398_v3 = vlaneseq }
 0x10d   : > { %v618_v5 = vmul.f32 %v617_v4, %v617_v4 }
 0x10f   : > { %v619_v6 = vsel %vm611_vm0, %v618_v5, 0.0  ;;  %v1401_v5 = vand.u32 127, %v1398_v3 }
 0x110   : > { %620 = vadd.xlane.f32.xlu0 %v619_v6 }
 0x19d   : > { %v621_v10 = vpop.xlane.xlu0 %620 }
 0x19e   : > { %v622_v11 = vmul.f32 0.03125, %v621_v10 }
 0x1a0   : > { %v623_v12 = vadd.f32 1e-05, %v622_v11 }
 0x1a2   : > { %2706 = vrsqrt.f32 %v623_v12 }
 0x1ac   : > { %v2707_v13 = vpop.eup %2706 }
 0x1ad   : > { %v625_v15 = vmul.f32 %v2707_v13, %v617_v4  ;;  %v1399_v4 = vshrl.u32 %v1398_v3, 7 }
 0x1af   : > { %v632_v17 = vmul.f32 %v2372_v14, %v625_v15  ;;  %vm1402_vm5 = vcmp.le.s32.totalorder %v1401_v5, %v1399_v4 }
 0x1b1   : > { %v639_v18 = vadd.f32 %v2373_v16, %v632_v17 }
 0x1b3   : > { %v640_v20 = vpack.c.bf16 %v639_v18, %v639_v18 }
 0x1b5   : > { %2491 = vmatmul.mubr.msk.bf16.vlgmr.msra.gmra.mrb[0].mxu0 %vm611_vm0, %v640_v20 }
 0x1b6   : > { %2495 = vmatpush3.bf16.msra.mxu0 %v2690_v19  ;;  %2498 = vmatprep.mubr.msk.bf16.mxu0 %vm2912_vm1, %v2911_v8 }
 0x1b7   : > { %2496 = vmatprep.subr.bf16.mxu0 %v2911_v8 }
 0x1ba   : > { %2497 = vmatpush3.bf16.msra.mxu0 %v2691_v21 }
 0x1bb   : > { %2502 = vmatprep.subr.bf16.mxu0 %v2911_v8 }
 0x1bd   : > { %2499 = vmatmul.mubr.msk.bf16.vlgmr.msra.gmra.mrb[4].mxu0 %vm611_vm0, %v640_v20 }
 0x1be   : > { %2503 = vmatpush3.bf16.msra.mxu0 %v2692_v22  ;;  %2506 = vmatprep.mubr.msk.bf16.mxu0 %vm2912_vm1, %v2911_v8 }
 0x1bf   : > { %2504 = vmatprep.subr.bf16.mxu0 %v2911_v8 }
 0x1c2   : > { %2505 = vmatpush3.bf16.msra.mxu0 %v2693_v23 }
 0x1c3   : > { %2516 = vmatprep.subr.bf16.mxu0 %v2911_v8 }
 0x1c5   : > { %2507 = vmatmul.mubr.msk.bf16.vlgmr.msra.gmra.mrb[8].mxu0 %vm611_vm0, %v640_v20 }
 0x1c6   : > { %2518 = vmatprep.mubr.msk.bf16.mxu0 %vm2912_vm1, %v2911_v8 }
 0x288   : > { %v701_v25 = vpop.f32.mrb[0].mxu0 }
 0x289   : > { %v702_v26 = vadd.f32 %v2374_v24, %v701_v25  ;;  %v2492_v27 = vpop.f32.mrb[1].mxu0 }
 0x28a   : > { %v704_v28 = vpop.f32.mrb[2].mxu0 }
 0x28b   : > { %v833_v29 = vmul.f32 0.35355338, %v702_v26  ;;  %v2493_v30 = vpop.f32.mrb[3].mxu0 }
 0x28d   : > { %v846_v31 = vpack.c.bf16 %v833_v29, %v833_v29 }
 0x28f   : > { %847 = vst.msk [vmem:[#allocation4] sm:$0xf] %vm840_vm2, %v846_v31  ;;  %870 = vrot.lane.b32.xlu0 %v846_v31, %s2913_s19 }
 0x290   : > { %v764_v33 = vpop.f32.mrb[4].mxu0 }
 0x291   : > { %v765_v34 = vadd.f32 %v2378_v32, %v764_v33  ;;  %v2500_v35 = vpop.f32.mrb[5].mxu0 }
 0x292   : > { %v767_v36 = vpop.f32.mrb[6].mxu0 }
 0x293   : > { %v835_v37 = vpack.c.bf16 %v765_v34, %v765_v34  ;;  %v2501_v38 = vpop.f32.mrb[7].mxu0 }
 0x295   : > { %841 = vst.msk [vmem:[#allocation2] sm:$0xf] %vm840_vm2, %v835_v37  ;;  %851 = vrot.lane.b32.xlu1 %v835_v37, %s2913_s19 }
 0x296   : > { %v911_v48 = vld [vmem:[#allocation4] sm:$0xf] }
 0x298   : > { %v827_v40 = vpop.f32.mrb[8].mxu0 }
 0x299   : > { %v828_v41 = vadd.f32 %v2382_v39, %v827_v40  ;;  %875 = vrot.lane.b32.xlu1 %v835_v37, %s2914_s22  ;;  %v2508_v42 = vpop.f32.mrb[9].mxu0 }
 0x29a   : > { %v830_v43 = vpop.f32.mrb[10].mxu0 }
 0x29b   : > { %v3220_v44 = vpack.c.bf16 %v828_v41, %v828_v41  ;;  %v2509_v45 = vpop.f32.mrb[11].mxu0 }
 0x29c   : > { %v1390_v46 = vld [vmem:[#allocation2] sm:$0xf] }
 0x29d   : > { %845 = vst.msk [vmem:[#allocation3] sm:$0xf] %vm840_vm2, %v3220_v44  ;;  %893 = vrot.lane.b32.xlu1 %v835_v37, %s2915_s29  ;;  %v1408_v47 = vsel %vm1403_vm3, %v1390_v46, 0 }
 0x29e   : > { %2511 = vmatpush3.bf16.xpose.msra.mxu1 %v1408_v47 }
 0x29f   : > { %2522 = vmatprep.subr.bf16.mxu1 %v2911_v8 }
 0x2a1   : > { %888 = vrot.lane.b32.xlu1 %v846_v31, %s2914_s22 }
 0x2a4   : > { %v1394_v62 = vld [vmem:[#allocation3] sm:$0xf] }
 0x2a5   : > { %906 = vrot.lane.b32.xlu1 %v846_v31, %s2915_s29  ;;  %2513 = vmatmul.mubr.msk.bf16.vlgmr.msra.gmra.mrb[0].mxu1 %vm1403_vm3, %v911_v48  ;;  %v1667_v1 = vsel %vm1665_vm4, %v1394_v62, 0 }
 0x2a6   : > { %2524 = vmatprep.mubr.msk.bf16.mxu1 %vm2912_vm1, %v2911_v8 }
 0x301   : > { %v871_v49 = vpop.permute.xlu0 %870 }
 0x302   : > { %874 = vst.msk [vmem:[#allocation4 + $0x4] sm:$0xf] %vm840_vm2, %v871_v49 }
 0x307   : > { %v852_v50 = vpop.permute.xlu1 %851 }
 0x308   : > { %2387 = vst.msk [vmem:[#allocation2 + $0x4] sm:$0xf] %vm840_vm2, %v852_v50 }
 0x309   : > { %v912_v59 = vld [vmem:[#allocation4 + $0x4] sm:$0xf] }
 0x30b   : > { %v876_v51 = vpop.permute.xlu1 %875 }
 0x30c   : > { %2391 = vst.msk [vmem:[#allocation2 + $0x8] sm:$0xf] %vm840_vm2, %v876_v51 }
 0x30f   : > { %v894_v52 = vpop.permute.xlu1 %893  ;;  %v1391_v53 = vld [vmem:[#allocation2 + $0x4] sm:$0xf] }
 0x310   : > { %2393 = vst.msk [vmem:[#allocation2 + $0xc] sm:$0xf] %vm840_vm2, %v894_v52  ;;  %v1454_v54 = vsel %vm1403_vm3, %v1391_v53, 0 }
 0x311   : > { %2517 = vmatpush3.bf16.xpose.msra.mxu0 %v1454_v54 }
 0x312   : > { %2528 = vmatprep.subr.bf16.mxu0 %v2911_v8 }
 0x313   : > { %v889_v55 = vpop.permute.xlu1 %888  ;;  %v1392_v56 = vld [vmem:[#allocation2 + $0x8] sm:$0xf] }
 0x314   : > { %892 = vst.msk [vmem:[#allocation4 + $0x8] sm:$0xf] %vm840_vm2, %v889_v55  ;;  %v1500_v57 = vsel %vm1403_vm3, %v1392_v56, 0 }
 0x315   : > { %2523 = vmatpush3.bf16.xpose.msra.mxu1 %v1500_v57 }
 0x316   : > { %2534 = vmatprep.subr.bf16.mxu1 %v2911_v8 }
 0x317   : > { %v907_v58 = vpop.permute.xlu1 %906  ;;  %v1393_v60 = vld [vmem:[#allocation2 + $0xc] sm:$0xf] }
 0x318   : > { %910 = vst.msk [vmem:[#allocation4 + $0xc] sm:$0xf] %vm840_vm2, %v907_v58  ;;  %2519 = vmatmul.mubr.msk.bf16.vlgmr.msra.gmra.mrb[12].mxu0 %vm1403_vm3, %v912_v59  ;;  %v1546_v61 = vsel %vm1403_vm3, %v1393_v60, 0 }
 0x319   : > { %2529 = vmatpush3.bf16.xpose.msra.mxu0 %v1546_v61  ;;  %2530 = vmatprep.mubr.msk.bf16.mxu0 %vm2912_vm1, %v2911_v8 }
 0x31a   : > { %2540 = vmatprep.subr.bf16.mxu0 %v2911_v8 }
 0x31b   : > { %v913_v63 = vld [vmem:[#allocation4 + $0x8] sm:$0xf] }
 0x31c   : > { %2525 = vmatmul.mubr.msk.bf16.vlgmr.msra.gmra.mrb[4].mxu1 %vm1403_vm3, %v913_v63 }
 0x31d   : > { %2535 = vmatpush3.bf16.msra.mxu1 %v1667_v1  ;;  %2536 = vmatprep.mubr.msk.bf16.mxu1 %vm2912_vm1, %v2911_v8 }
 0x31e   : > { %2546 = vmatprep.subr.bf16.mxu1 %v2911_v8 }
 0x31f   : > { %v914_v2 = vld [vmem:[#allocation4 + $0xc] sm:$0xf] }
 0x320   : > { %2531 = vmatmul.mubr.msk.bf16.vlgmr.msra.gmra.mrb[16].mxu0 %vm1403_vm3, %v914_v2 }
 0x321   : > { %2542 = vmatprep.mubr.msk.bf16.mxu0 %vm2912_vm1, %v2911_v8 }
 0x378   : > { %v1444_v6 = vpop.f32.mrb[0].mxu1 }
 0x379   : > { %v1590_v7 = vsel %vm1402_vm5, %v1444_v6, -1e+30  ;;  %v2514_v9 = vpop.f32.mrb[1].mxu1 }
 0x37a   : > { %v1447_v10 = vpop.f32.mrb[2].mxu1  ;;  %v1594_v11 = vsel %vm1403_vm3, %v1590_v7, -inf }
 0x37b   : > { %1595 = vmax.xlane.f32.xlu1 %v1594_v11  ;;  %v2515_v12 = vpop.f32.mrb[3].mxu1 }
 0x38c   : > { %882 = vrot.lane.b32.xlu1 %v3220_v44, %s2914_s22  ;;  %s3489_s22 = sld [smem:[#allocation28_spill]] }
 0x3eb   : > { %v1490_v13 = vpop.f32.mrb[12].mxu0 }
 0x3ec   : > { %v1591_v14 = vsel %vm1402_vm5, %v1490_v13, -1e+30  ;;  %v2520_v15 = vpop.f32.mrb[13].mxu0 }
 0x3ed   : > { %v1493_v16 = vpop.f32.mrb[14].mxu0  ;;  %v1597_v17 = vsel %vm1403_vm3, %v1591_v14, -inf }
 0x3ee   : > { %1598 = vmax.xlane.f32.xlu0 %v1597_v17  ;;  %v2521_v18 = vpop.f32.mrb[15].mxu0 }
 0x3ef   : > { %v1536_v19 = vpop.f32.mrb[4].mxu1 }
 0x3f0   : > { %v1592_v20 = vsel %vm1402_vm5, %v1536_v19, -1e+30  ;;  %v2526_v21 = vpop.f32.mrb[5].mxu1 }
 0x3f1   : > { %v1539_v22 = vpop.f32.mrb[6].mxu1  ;;  %v1600_v23 = vsel %vm1403_vm3, %v1592_v20, -inf }
 0x3f2   : > { %v2527_v24 = vpop.f32.mrb[7].mxu1  ;;  %1601 = vmax.xlane.f32.xlu1 %v1600_v23 }
 0x3f3   : > { %v1582_v25 = vpop.f32.mrb[16].mxu0 }
 0x3f4   : > { %v1593_v26 = vsel %vm1402_vm5, %v1582_v25, -1e+30  ;;  %v2532_v27 = vpop.f32.mrb[17].mxu0 }
 0x3f5   : > { %v1585_v28 = vpop.f32.mrb[18].mxu0  ;;  %v1603_v29 = vsel %vm1403_vm3, %v1593_v26, -inf }
 0x3f6   : > { %1604 = vmax.xlane.f32.xlu1 %v1603_v29  ;;  %v2533_v30 = vpop.f32.mrb[19].mxu0 }
 0x404   : > { %861 = vrot.lane.b32.xlu0 %v3220_v44, %s2913_s19 }
 0x407   : > { %900 = vrot.lane.b32.xlu1 %v3220_v44, %s2915_s29  ;;  %s3383_s29 = scalar_lea.hbm %s3489_s22, %s2437_s23 }
 0x408   : > { %v1596_v31 = vpop.xlane.xlu1 %1595 }
 0x409   : > { %v1606_v32 = vmax.f32 %v1596_v31, -1e+30 }
 0x40b   : > { %v1622_v33 = vsub.f32 %v1590_v7, %v1606_v32  ;;  %v1610_v5 = vsub.f32 -1e+30, %v1606_v32 }
 0x40c   : > { %v883_v34 = vpop.permute.xlu1 %882 }
 0x40d   : > { %v1626_v35 = vmul.f32 1.442695, %v1622_v33  ;;  %2392 = vst.msk [vmem:[#allocation3 + $0x8] sm:$0xf] %vm840_vm2, %v883_v34  ;;  %v1614_v6 = vmul.f32 1.442695, %v1610_v5 }
 0x40e   : > { %v2417_v5 = vld [vmem:[%s3441_s10] ss:$0 sm:$0xff] }
 0x40f   : > { %2708 = vpow2.f32 %v1626_v35 }
 0x414   : > { %v1396_v37 = vld [vmem:[#allocation3 + $0x8] sm:$0xf] }
 0x415   : > { %v1759_v39 = vsel %vm1665_vm4, %v1396_v37, 0 }
 0x419   : > { %v2709_v36 = vpop.eup %2708 }
 0x41a   : > { %v1658_v38 = vpack.c.bf16 %v2709_v36, %v2709_v36  ;;  %v1638_v4 = vsel %vm1403_vm3, %v2709_v36, 0.0 }
 0x41c   : > { %2537 = vmatmul.mubr.msk.bf16.vlgmr.msra.gmra.mrb[8].mxu1 %vm1403_vm3, %v1658_v38 }
 0x41d   : > { %2547 = vmatpush3.bf16.msra.mxu1 %v1759_v39  ;;  %2548 = vmatprep.mubr.msk.bf16.mxu1 %vm2912_vm1, %v2911_v8 }
 0x41e   : > { %2558 = vmatprep.subr.bf16.mxu1 %v2911_v8 }
 0x47b   : > { %v3275_v40 = vpop.xlane.xlu0 %1598 }
 0x47c   : > { %v1607_v41 = vmax.f32 %v3275_v40, -1e+30 }
 0x47e   : > { %v1623_v42 = vsub.f32 %v1591_v14, %v1607_v41  ;;  %v1611_v22 = vsub.f32 -1e+30, %v1607_v41 }
 0x47f   : > { %v3280_v43 = vpop.xlane.xlu1 %1601  ;;  %v862_v44 = vpop.permute.xlu0 %861 }
 0x480   : > { %v1628_v45 = vmul.f32 1.442695, %v1623_v42  ;;  %v1608_v46 = vmax.f32 %v3280_v43, -1e+30  ;;  %2389 = vst.msk [vmem:[#allocation3 + $0x4] sm:$0xf] %vm840_vm2, %v862_v44 }
 0x481   : > { %v1616_v23 = vmul.f32 1.442695, %v1611_v22  ;;  %v2694_v43 = vld [vmem:[%s3440_s9] sm:$0xff]  }
 0x482   : > { %v1624_v47 = vsub.f32 %v1592_v20, %v1608_v46  ;;  %2710 = vpow2.f32 %v1628_v45  ;;  %v1612_v24 = vsub.f32 -1e+30, %v1608_v46 }
 0x483   : > { %v1605_v48 = vpop.xlane.xlu1 %1604 }
 0x484   : > { %v1630_v49 = vmul.f32 1.442695, %v1624_v47  ;;  %v1609_v50 = vmax.f32 %v1605_v48, -1e+30  ;;  %v1618_v25 = vmul.f32 1.442695, %v1612_v24 }
 0x485   : > { %v2695_v47 = vld [vmem:[%s3440_s9 + $0x8] sm:$0xff]  }
 0x486   : > { %v1625_v51 = vsub.f32 %v1593_v26, %v1609_v50  ;;  %2712 = vpow2.f32 %v1630_v49  ;;  %v1613_v26 = vsub.f32 -1e+30, %v1609_v50 }
 0x487   : > { %v901_v52 = vpop.permute.xlu1 %900  ;;  %v1395_v53 = vld [vmem:[#allocation3 + $0x4] sm:$0xf] }
 0x488   : > { %v1632_v54 = vmul.f32 1.442695, %v1625_v51  ;;  %2394 = vst.msk [vmem:[#allocation3 + $0xc] sm:$0xf] %vm840_vm2, %v901_v52  ;;  %v1713_v55 = vsel %vm1665_vm4, %v1395_v53, 0 }
 0x489   : > { %2541 = vmatpush3.bf16.msra.mxu0 %v1713_v55  ;;  %v1620_v27 = vmul.f32 1.442695, %v1613_v26 }
 0x48a   : > { %2552 = vmatprep.subr.bf16.mxu0 %v2911_v8  ;;  %2714 = vpow2.f32 %v1632_v54 }
 0x48b   : > { %2716 = vpow2.f32 %v1614_v6 }
 0x48c   : > { %v2711_v56 = vpop.eup %2710 }
 0x48d   : > { %v1641_v57 = vsel %vm1403_vm3, %v2711_v56, 0.0  ;;  %v1659_v58 = vpack.c.bf16 %v2711_v56, %v2711_v56 }
 0x48e   : > { %1642 = vadd.xlane.f32.xlu0 %v1641_v57 }
 0x48f   : > { %v1397_v59 = vld [vmem:[#allocation3 + $0xc] sm:$0xf]  ;;  %2543 = vmatmul.mubr.msk.bf16.vlgmr.msra.gmra.mrb[20].mxu0 %vm1403_vm3, %v1659_v58 }
 0x490   : > { %v1805_v60 = vsel %vm1665_vm4, %v1397_v59, 0  ;;  %v2713_v61 = vpop.eup %2712  ;;  %2554 = vmatprep.mubr.msk.bf16.mxu0 %vm2912_vm1, %v2911_v8 }
 0x491   : > { %2553 = vmatpush3.bf16.msra.mxu0 %v1805_v60  ;;  %v1644_v62 = vsel %vm1403_vm3, %v2713_v61, 0.0  ;;  %v1660_v63 = vpack.c.bf16 %v2713_v61, %v2713_v61 }
 0x492   : > { %2566 = vmatprep.subr.bf16.mxu0 %v2911_v8  ;;  %1645 = vadd.xlane.f32.xlu1 %v1644_v62 }
 0x493   : > { %2549 = vmatmul.mubr.msk.bf16.vlgmr.msra.gmra.mrb[12].mxu1 %vm1403_vm3, %v1660_v63 }
 0x494   : > { %v2715_v1 = vpop.eup %2714  ;;  %2562 = vmatprep.mubr.msk.bf16.mxu1 %vm2912_vm1, %v2911_v8  ;;  %2559 = vmatpush3.bf16.msra.mxu1 %v2694_v43 }
 0x495   : > { %v1647_v2 = vsel %vm1403_vm3, %v2715_v1, 0.0  ;;  %v1661_v3 = vpack.c.bf16 %v2715_v1, %v2715_v1  ;;  %v2717_v7 = vpop.eup %2716  ;;  %2560 = vmatprep.subr.bf16.mxu1 %v2911_v8 }
 0x496   : > { %1648 = vadd.xlane.f32.xlu0 %v1647_v2  ;;  %v1634_v9 = vmul.f32 0.0, %v2717_v7 }
 0x497   : > { %2555 = vmatmul.mubr.msk.bf16.vlgmr.msra.gmra.mrb[24].mxu0 %vm1403_vm3, %v1661_v3 }
 0x498   : > { %2570 = vmatprep.mubr.msk.bf16.mxu0 %vm2912_vm1, %v2911_v8  ;;  %2561 = vmatpush3.bf16.msra.mxu1 %v2695_v47 }
 0x499   : > { %2574 = vmatprep.subr.bf16.mxu1 %v2911_v8 }
 0x49a   : > { %1639 = vadd.xlane.f32.xlu0 %v1638_v4 }
 0x4ef   : > { %v1703_v10 = vpop.f32.mrb[8].mxu1 }
 0x4f0   : > { %v1847_v11 = vadd.f32 %v1703_v10, %v1634_v9  ;;  %v2538_v12 = vpop.f32.mrb[9].mxu1 }
 0x4f1   : > { %v1706_v13 = vpop.f32.mrb[10].mxu1 }
 0x4f2   : > { %v2539_v14 = vpop.f32.mrb[11].mxu1 }
 0x51b   : > { %v1643_v15 = vpop.xlane.xlu0 %1642 }
 0x51f   : > { %v1646_v32 = vpop.xlane.xlu1 %1645 }
 0x523   : > { %v1649_v16 = vpop.xlane.xlu0 %1648 }
 0x527   : > { %v1640_v17 = vpop.xlane.xlu0 %1639 }
 0x528   : > { %v1650_v18 = vadd.f32 %v1640_v17, %v1634_v9 }
 0x52a   : > { %2718 = vrcp.f32 %v1650_v18 }
 0x52b   : > { %2720 = vpow2.f32 %v1616_v23 }
 0x52c   : > { %2722 = vpow2.f32 %v1618_v25  ;;  %v2421_v25 = vld [vmem:[%s3442_s11] ss:$0 sm:$0xff] }
 0x52d   : > { %2724 = vpow2.f32 %v1620_v27  ;;  %v2422_v27 = vld [vmem:[%s3443_s12] ss:$0 sm:$0xff] }
 0x534   : > { %v2719_v19 = vpop.eup %2718 }
 0x535   : > { %v1855_v20 = vmul.f32 %v2719_v19, %v1847_v11  ;;  %v2721_v28 = vpop.eup %2720  ;;  %v2696_v19 = vld [vmem:[%s3444_s13] sm:$0xff]  }
 0x536   : > { %v1635_v29 = vmul.f32 0.0, %v2721_v28  ;;  %v2723_v30 = vpop.eup %2722  ;;  %2567 = vmatpush3.bf16.msra.mxu0 %v2696_v19 }
 0x537   : > { %v1859_v21 = vpack.c.bf16 %v1855_v20, %v1855_v20  ;;  %v1636_v33 = vmul.f32 0.0, %v2723_v30  ;;  %v2725_v34 = vpop.eup %2724  ;;  %2568 = vmatprep.subr.bf16.mxu0 %v2911_v8  ;;  %v2698_v20 = vld [vmem:[%s3446_s15] sm:$0xff]  }
 0x538   : > { %v1651_v31 = vadd.f32 %v1643_v15, %v1635_v29  ;;  %v1637_v36 = vmul.f32 0.0, %v2725_v34  ;;  %v2702_v34 = vld [vmem:[%s3446_s15 + $0x20] sm:$0xff]  }
 0x539   : > { %1860 = vst.msk [vmem:[#allocation5] sm:$0xf] %vm840_vm2, %v1859_v21  ;;  %v1652_v35 = vadd.f32 %v1646_v32, %v1636_v33  ;;  %v2700_v32 = vld [vmem:[%s3446_s15 + $0x10] sm:$0xff]  }
 0x53a   : > { %2726 = vrcp.f32 %v1651_v31  ;;  %v1653_v37 = vadd.f32 %v1649_v16, %v1637_v36  ;;  %v2699_v31 = vld [vmem:[%s3446_s15 + $0x8] sm:$0xff]  }
 0x53b   : > { %2728 = vrcp.f32 %v1652_v35  ;;  %v2703_v35 = vld [vmem:[%s3446_s15 + $0x28] sm:$0xff]  }
 0x53c   : > { %2730 = vrcp.f32 %v1653_v37  ;;  %v2705_v37 = vld [vmem:[%s3446_s15 + $0x38] sm:$0xff]  }
 0x544   : > { %v2727_v41 = vpop.eup %2726 }
 0x545   : > { %v2729_v51 = vpop.eup %2728 }
 0x546   : > { %v2731_v59 = vpop.eup %2730 }
 0x562   : > { %v1749_v38 = vpop.f32.mrb[20].mxu0 }
 0x563   : > { %v1848_v39 = vadd.f32 %v1749_v38, %v1635_v29  ;;  %v2544_v40 = vpop.f32.mrb[21].mxu0  ;;  %v2423_v38 = vld [vmem:[%s3445_s14] ss:$0 sm:$0xff] }
 0x564   : > { %v1752_v42 = vpop.f32.mrb[22].mxu0 }
 0x565   : > { %v1856_v44 = vmul.f32 %v2727_v41, %v1848_v39  ;;  %v2545_v45 = vpop.f32.mrb[23].mxu0 }
 0x566   : > { %v1795_v46 = vpop.f32.mrb[12].mxu1 }
 0x567   : > { %v2443_v48 = vpack.c.bf16 %v1856_v44, %v1856_v44  ;;  %v1849_v49 = vadd.f32 %v1795_v46, %v1636_v33  ;;  %v2550_v50 = vpop.f32.mrb[13].mxu1  ;;  %v2701_v33 = vld [vmem:[%s3446_s15 + $0x18] sm:$0xff]  }
 0x568   : > { %v1798_v52 = vpop.f32.mrb[14].mxu1 }
 0x569   : > { %v1857_v53 = vmul.f32 %v2729_v51, %v1849_v49  ;;  %v2551_v54 = vpop.f32.mrb[15].mxu1  ;;  %1865 = vrot.lane.b32.xlu1 %v2443_v48, %s2916_s21  ;;  %s2370_s21 = sshll.u32 %s597_s1, 3 }
 0x56a   : > { %v1841_v55 = vpop.f32.mrb[24].mxu0  ;;  %s599_s17 = scalar_lea.vmem [#allocation12], %s2370_s21  ;;  %s2826_s21 = scalar_lea.vmem %s2825_s28, 256 }
 0x56b   : > { %v2444_v56 = vpack.c.bf16 %v1857_v53, %v1857_v53  ;;  %v1850_v57 = vadd.f32 %v1841_v55, %v1637_v36  ;;  %v2556_v58 = vpop.f32.mrb[25].mxu0  ;;  %v2704_v36 = vld [vmem:[%s3446_s15 + $0x30] sm:$0xff]   ;;  %v2427_v53 = vld [vmem:[%s3487_s18] ss:$0 sm:$0xff]  ;;  %s2190_s26 = sshll.u32 %s599_s17, 4  ;;  %s3385_s26 = int_to_ptr.vmem [resolvable:$true] %s2190_s26 }
 0x56c   : > { %v1844_v60 = vpop.f32.mrb[26].mxu0  ;;  %s2820_s20 = scalar_lea.vmem %s3385_s26, 128  ;;  %p2827_p11 = scmp.lt.s32.totalorder %s3385_s26, %s2825_s28 }
 0x56d   : > { %v1858_v61 = vmul.f32 %v2731_v59, %v1850_v57  ;;  %1874 = vrot.lane.b32.xlu0 %v2444_v56, %s2917_s0  ;;  %v2557_v62 = vpop.f32.mrb[27].mxu0  ;;  %p2821_p13 = scmp.ne.s32.totalorder %s3385_s26, %s2820_s20  ;;  %p2828_p3 = scmp.lt.s32.totalorder %s2826_s21, %s2820_s20 }
 0x56f   : > { %v2445_v63 = vpack.c.bf16 %v1858_v61, %v1858_v61  ;;  %p2822_p8 = pnand %p2821_p13, %p3490_p4  ;;  %p2829_p5 = por %p2828_p3, %p2827_p11 }
 0x571   : > { %1883 = vrot.lane.b32.xlu1 %v2445_v63, %s2918_s6  ;;  %p2823_p10 = pneg %p2822_p8 }
 0x573   : > { %p2830_p6 = pnand %p2829_p5, %p2823_p10 }
 0x5db   : > { %v1866_v1 = vpop.permute.xlu1 %1865 }
 0x5dc   : > { %1869 = vst.msk [vmem:[#allocation5] sm:$0xf] %vm1868_vm6, %v1866_v1 }
 0x5df   : > { %v1875_v2 = vpop.permute.xlu0 %1874 }
 0x5e0   : > { %1878 = vst.msk [vmem:[#allocation5] sm:$0xf] %vm1877_vm7, %v1875_v2 }
 0x5e3   : > { %v1884_v3 = vpop.permute.xlu1 %1883 }
 0x5e4   : > { %1887 = vst.msk [vmem:[#allocation5] sm:$0xf] %vm1886_vm8, %v1884_v3 }
 0x5eb   : > { %v1888_v4 = vld [vmem:[#allocation5] sm:$0xf] }
 0x5ec   : > { %2563 = vmatmul.mubr.msk.bf16.vlgmr.msra.gmra.mrb[16].mxu1 %vm611_vm0, %v1888_v4 }
 0x5ed   : > { %2590 = vmatprep.mubr.msk.bf16.mxu1 %vm2912_vm1, %v2911_v8  ;;  %2575 = vmatpush3.bf16.msra.mxu1 %v2698_v20 }
 0x5ee   : > { %2576 = vmatprep.subr.bf16.mxu1 %v2911_v8 }
 0x5f1   : > { %2577 = vmatpush3.bf16.msra.mxu1 %v2699_v31 }
 0x5f2   : > { %2578 = vmatprep.subr.bf16.mxu1 %v2911_v8 }
 0x5f5   : > { %2579 = vmatpush3.bf16.msra.mxu1 %v2700_v32 }
 0x5f6   : > { %2580 = vmatprep.subr.bf16.mxu1 %v2911_v8 }
 0x5f9   : > { %2581 = vmatpush3.bf16.msra.mxu1 %v2701_v33 }
 0x5fa   : > { %2582 = vmatprep.subr.bf16.mxu1 %v2911_v8 }
 0x5fd   : > { %2583 = vmatpush3.bf16.msra.mxu1 %v2702_v34 }
 0x5fe   : > { %2584 = vmatprep.subr.bf16.mxu1 %v2911_v8 }
 0x601   : > { %2585 = vmatpush3.bf16.msra.mxu1 %v2703_v35 }
 0x602   : > { %2586 = vmatprep.subr.bf16.mxu1 %v2911_v8 }
 0x605   : > { %2587 = vmatpush3.bf16.msra.mxu1 %v2704_v36 }
 0x606   : > { %2588 = vmatprep.subr.bf16.mxu1 %v2911_v8 }
 0x609   : > { %2589 = vmatpush3.bf16.msra.mxu1 %v2705_v37 }
 0x6bf   : > { %v1949_v6 = vpop.f32.mrb[16].mxu1 }
 0x6c0   : > { %v1950_v7 = vadd.f32 %v2417_v5, %v1949_v6  ;;  %v2564_v9 = vpop.f32.mrb[17].mxu1 }
 0x6c1   : > { %v1952_v10 = vpop.f32.mrb[18].mxu1 }
 0x6c2   : > { %v3320_v11 = vadd.f32 %v1950_v7, %v3164_v0  ;;  %v2565_v12 = vpop.f32.mrb[19].mxu1  ;;  %v2697_v0 = vld [vmem:[%s3444_s13 + $0x8] sm:$0xff]  }
 0x6c3   : > { %2569 = vmatpush3.bf16.msra.mxu0 %v2697_v0 }
 0x6c4   : > { %v1958_v13 = vsel %vm611_vm0, %v3320_v11, 0.0 }
 0x6c5   : > { %1959 = vadd.xlane.f32.xlu1 %v1958_v13 }
 0x752   : > { %v1960_v14 = vpop.xlane.xlu1 %1959 }
 0x753   : > { %v1961_v15 = vmul.f32 0.03125, %v1960_v14 }
 0x755   : > { %v1962_v16 = vsub.f32 %v3320_v11, %v1961_v15 }
 0x757   : > { %v1963_v17 = vmul.f32 %v1962_v16, %v1962_v16 }
 0x759   : > { %v1964_v18 = vsel %vm611_vm0, %v1963_v17, 0.0 }
 0x75a   : > { %1965 = vadd.xlane.f32.xlu0 %v1964_v18 }
 0x7e7   : > { %v1966_v21 = vpop.xlane.xlu0 %1965 }
 0x7e8   : > { %v1967_v22 = vmul.f32 0.03125, %v1966_v21 }
 0x7ea   : > { %v1968_v23 = vadd.f32 1e-05, %v1967_v22 }
 0x7ec   : > { %2732 = vrsqrt.f32 %v1968_v23 }
 0x7f6   : > { %v2733_v24 = vpop.eup %2732 }
 0x7f7   : > { %v1970_v26 = vmul.f32 %v2733_v24, %v1962_v16 }
 0x7f9   : > { %v1977_v28 = vmul.f32 %v2421_v25, %v1970_v26 }
 0x7fb   : > { %v1984_v29 = vadd.f32 %v2422_v27, %v1977_v28 }
 0x7fd   : > { %v1985_v30 = vpack.c.bf16 %v1984_v29, %v1984_v29 }
 0x7ff   : > { %2571 = vmatmul.mubr.msk.bf16.vlgmr.msra.gmra.mrb[28].mxu0 %vm611_vm0, %v1985_v30 }
 0x8d2   : > { %v2046_v39 = vpop.f32.mrb[28].mxu0 }
 0x8d3   : > { %v2047_v40 = vadd.f32 %v2423_v38, %v2046_v39  ;;  %v2572_v41 = vpop.f32.mrb[29].mxu0 }
 0x8d4   : > { %v2049_v42 = vpop.f32.mrb[30].mxu0 }
 0x8d5   : > { %v2053_v43 = vmul.f32 0.044715, %v2047_v40  ;;  %v2573_v44 = vpop.f32.mrb[31].mxu0  ;;  %v2052_v8 = vmul.f32 0.5, %v2047_v40 }
 0x8d7   : > { %v2054_v45 = vmul.f32 %v2053_v43, %v2047_v40 }
 0x8d9   : > { %v2055_v46 = vmul.f32 %v2054_v45, %v2047_v40 }
 0x8db   : > { %v2056_v47 = vadd.f32 %v2055_v46, %v2047_v40 }
 0x8dd   : > { %v2057_v48 = vmul.f32 0.7978846, %v2056_v47 }
 0x8df   : > { %2734 = vtanh.f32 %v2057_v48 }
 0x8e9   : > { %v2735_v49 = vpop.eup %2734 }
 0x8ea   : > { %v2059_v50 = vadd.f32 1.0, %v2735_v49 }
 0x8ec   : > { %v2060_v51 = vmul.f32 %v2059_v50, %v2052_v8 }
 0x8ee   : > { %v2061_v52 = vpack.c.bf16 %v2060_v51, %v2060_v51 }
 0x8f0   : > { %2591 = vmatmul.mubr.bf16.vlgmr.msra.gmra.mrb[20].mxu1 %v2061_v52 }
 0x9c3   : > { %v2167_v54 = vpop.f32.mrb[20].mxu1 }
 0x9c4   : > { %v2168_v55 = vadd.f32 %v2427_v53, %v2167_v54  ;;  %v2592_v56 = vpop.f32.mrb[21].mxu1 }
 0x9c5   : > { %v2170_v57 = vpop.f32.mrb[22].mxu1 }
 0x9c6   : > { %v2173_v58 = vadd.f32 %v2168_v55, %v3320_v11  ;;  %v2593_v59 = vpop.f32.mrb[23].mxu1 }
 0x9c8   : > { %2174 = vst.msk [vmem:[%s599_s17] sm:$0xff] %vm611_vm0, %v2173_v58 }
 0x9c9   : > { %2833 = shalt.err (!%p2830_p6)
}
 0x9ca   : > { %s2834_s1 = scalar_lea.hbm %s3383_s29, 128  ;;  %s2838_s18 = scalar_lea.hbm %s3489_s22, 256 }
 0x9cb   : > { %p2835_p7 = scmp.ne.s32.totalorder %s3383_s29, %s2834_s1  ;;  %p2839_p0 = scmp.lt.u32.totalorder %s3383_s29, %s3489_s22 }
 0x9cc   : > { %p2840_p2 = scmp.lt.u32.totalorder %s2838_s18, %s2834_s1  ;;  %p2842_p13 = scmp.lt.u32.totalorder %s2834_s1, %s3383_s29 }
 0x9cd   : > { %p2836_p9 = pnand %p2835_p7, %p3490_p4 }
 0x9ce   : > { %p2841_p1 = por %p2840_p2, %p2839_p0 }
 0x9cf   : > { %p2837_p12 = pneg %p2836_p9 }
 0x9d0   : > { %p2843_p8 = por %p2842_p13, %p2841_p1 }
 0x9d2   : > { %p2844_p10 = pnand %p2843_p8, %p2837_p12 }
 0x9d4   : > { %2847 = shalt.err (!%p2844_p10)
}
 0x9d5   : > { %2606 = dma.vmem_to_hbm [thread:$0]  (%p3490_p4), %s3385_s26, 128, %s3383_s29, %s2176_s27  }
 0x9d6 PF: > { %s3491_s24 = sld [smem:[#allocation19_spill]]  ;;  %s3492_s19 = sld [smem:[#allocation16_spill]] }
 0x9d7   : > { %s3493_s20 = sld [smem:[#allocation22_spill]] }
 0x9dc   : > { %p2628_p11 = scmp.ge.s32.totalorder %s3491_s24, 2  ;;  %s2202_s16 = sand.u32 1, %s3492_s19  }
 0x9dd   : > { %p3494_p3 = scmp.ne.s32.totalorder %s3493_s20, 0  ;;  %s2203_s28 = scalar_lea.sflag [#allocation8], %s2202_s16 }
 0x9df   : > { %p2619_p5 = pnand %p2628_p11, %p3494_p3 }
 0x9e1   : > { %2881 = dma.done.wait (!%p2619_p5), %s2203_s28, 128  }
 0x9e2   : > { %2883 = vsyncadd (!%p2619_p5), %s2203_s28, 4294967168  ;;  %s32_s29 = sadd.s32 1, %s3491_s24   ;;  %s3495_s21 = sld [smem:[#allocation17_spill]] }
 0x9e3   : > { %p29_p6 = scmp.ge.s32.totalorder %s32_s29, 4   ;;  %s3496_s26 = sld [smem:[#allocation23_spill]] }
 0x9e4   : > { %s3497_s27 = sld [smem:[#allocation18_spill]]  ;;  %s3498_s28 = sld [smem:[#allocation20_spill]] }
 0x9e5   : > { %s3499_s24 = smov %s2890_s25  ;;  %31 = sbr.rel (!%p29_p6) target bundleno = 12 (0xc), region = 167 }
 0x9e8   : > { %s3500_s25 = smov %s3495_s21 }
 0x9ec   :  { %2208 = vsyncpa [#allocation7], 1 }
 0x9ed   :  { %2210 = vsyncpa [#allocation7 + $0x1], 1 }
 0x9ee   :  { %2211 = vsyncpa [#allocation10], 1 }
 0x9ef   :  { %2212 = vsyncpa [#allocation8], 1 }
 0x9f0   :  { %2214 = vsyncpa [#allocation8 + $0x1], 1 }

// kernel: tpu_custom_call.1
= control target key start
LH: loop header
LB: loop body
LE: loop exit
PB: predicated region body
PF: predicated region fallthrough
CT: control target
= control target key end

     0   :  { %s3431_s0 = inlined_call_operand.vmem [shape: f32[2,8,32], index: 0, kind: input, shape index: {}]   ;;  %s3432_s1 = inlined_call_operand.vmem [shape: f32[1,32], index: 1, kind: input, shape index: {}]   ;;  %s3433_s2 = inlined_call_operand.vmem [shape: f32[1,32], index: 2, kind: input, shape index: {}]   ;;  %s3434_s3 = inlined_call_operand.vmem [shape: bf16[32,32], index: 3, kind: input, shape index: {}]   ;;  %s3435_s4 = inlined_call_operand.hbm [shape: f32[1,32], index: 4, kind: input, shape index: {}]   ;;  %s3436_s5 = inlined_call_operand.vmem [shape: bf16[32,32], index: 5, kind: input, shape index: {}]   ;;  %s3437_s6 = inlined_call_operand.hbm [shape: f32[1,32], index: 6, kind: input, shape index: {}]   ;;  %s3438_s7 = inlined_call_operand.vmem [shape: bf16[32,32], index: 7, kind: input, shape index: {}]   ;;  %s3439_s8 = inlined_call_operand.hbm [shape: f32[1,32], index: 8, kind: input, shape index: {}]   ;;  %s3440_s9 = inlined_call_operand.vmem [shape: bf16[32,32], index: 9, kind: input, shape index: {}]   ;;  %s3441_s10 = inlined_call_operand.vmem [shape: f32[1,32], index: 10, kind: input, shape index: {}]   ;;  %s3442_s11 = inlined_call_operand.vmem [shape: f32[1,32], index: 11, kind: input, shape index: {}]   ;;  %s3443_s12 = inlined_call_operand.vmem [shape: f32[1,32], index: 12, kind: input, shape index: {}]   ;;  %s3444_s13 = inlined_call_operand.vmem [shape: bf16[32,128], index: 13, kind: input, shape index: {}]   ;;  %s3445_s14 = inlined_call_operand.vmem [shape: f32[1,128], index: 14, kind: input, shape index: {}]   ;;  %s3446_s15 = inlined_call_operand.vmem [shape: bf16[128,32], index: 15, kind: input, shape index: {}]   ;;  %s3447_s16 = inlined_call_operand.vmem [shape: f32[1,32], index: 16, kind: input, shape index: {}]   ;;  %s3448_s17 = inlined_call_operand.hbm [shape: f32[2,8,32], index: 17, kind: output, shape index: {}]  }
   0x1   :  { %3463 = sst [smem:[#allocation24_spill]] %s3431_s0 }
   0x2   :  { %3464 = sst [smem:[#allocation25_spill]] %s3432_s1 }
   0x3   :  { %3465 = sst [smem:[#allocation26_spill]] %s3437_s6 }
   0x4   :  { %3466 = sst [smem:[#allocation27_spill]] %s3447_s16 }
   0x5   :  { %3467 = sst [smem:[#allocation28_spill]] %s3448_s17 }
   0x6   :  { %22 = vsyncpa [#allocation7], 0 }
   0x7   :  { %23 = vsyncpa [#allocation10], 0 }
   0x8   :  { %24 = vsyncpa [#allocation8], 0 }
   0x9   :  { %26 = vsyncpa [#allocation8 + $0x1], 0  ;;  %s3010_s24 = smov 0   ;;  %s3012_s25 = smov 0  }
   0xa   :  { %s3014_s26 = smov 0   ;;  %s3016_s27 = smov 0  }
   0xb   :  { %s3018_s28 = smov 0   ;;  %s3020_s29 = smov 0  }
   0xc LB: > { %3468 = sst [smem:[#allocation16_spill]] %s2886_s24  ;;  %s2359_s0 = sadd.s32 4294967295, %s2906_s29   ;;  %s2906_s29 = sphi %s3020_s29, %s32_s29   ;;  %s2902_s28 = sphi %s3018_s28, %s3498_s28   ;;  %s2898_s27 = sphi %s3016_s27, %s3497_s27   ;;  %s2894_s26 = sphi %s3014_s26, %s3496_s26   ;;  %s2890_s25 = sphi %s3012_s25, %s3500_s25   ;;  %s2886_s24 = sphi %s3010_s24, %s3499_s24  }
   0xd   : > { %3469 = sst [smem:[#allocation17_spill]] %s2894_s26  ;;  %s2360_s30 = sadd.s32 4294967294, %s2906_s29  }
   0xe   : > { %3470 = sst [smem:[#allocation18_spill]] %s2902_s28  ;;  %s44_s18 = sadd.s32 1, %s2902_s28 }
   0xf   : > { %3471 = sst [smem:[#allocation19_spill]] %s2906_s29  ;;  %s417_s19 = sadd.s32 1, %s2894_s26 }
  0x10   : > { %p46_p0 = scmp.ge.s32.totalorder %s44_s18, 2  ;;  %p427_p1 = scmp.ne.s32.totalorder %s2894_s26, %s2890_s25 }
  0x11   : > { %p428_p2 = scmp.eq.s32.totalorder %s2359_s0, 1  ;;  %p433_p3 = scmp.ne.s32.totalorder %s2890_s25, %s2886_s24 }
  0x12   : > { %s3502_s18 = smov (%p46_p0, %s44_s18), 0  ;;  %p434_p5 = scmp.eq.s32.totalorder %s2360_s30, 1 }
  0x13   : > { %3472 = sst [smem:[#allocation20_spill]] %s3502_s18  ;;  %p3050_p4 = por %p428_p2, %p427_p1 }
  0x14   : > { %s412_s20 = ssub.s32 %s2902_s28, %s3502_s18  ;;  %p2361_p6 = scmp.ge.s32.totalorder %s2906_s29, 1 }
  0x15   : > { %s3473_s1 = scalar_select %p3050_p4, 1, 0 }
  0x16   : > { %p415_p7 = scmp.eq.s32.totalorder %s412_s20, 0  ;;  %p3057_p8 = por %p434_p5, %p433_p3 }
  0x17   : > { %3474 = sst [smem:[#allocation21_spill]] %s3473_s1  ;;  %p441_p9 = scmp.lt.s32.totalorder %s2906_s29, 3 }
  0x18   : > { %s3475_s21 = scalar_select %p3057_p8, 1, 0 }
  0x19   : > { %s3063_s22 = scalar_select %p415_p7, %s2894_s26, %s417_s19  }
  0x1a   : > { %3476 = sst [smem:[#allocation22_spill]] %s3475_s21  ;;  %p3065_p10 = pnand %p2361_p6, %p441_p9 }
  0x1b   : > { %3477 = sst [smem:[#allocation23_spill]] %s3063_s22  ;;  %p3069_p11 = scmp.eq.s32.totalorder %s2359_s0, 0 }
  0x1c   : > { %s3478_s23 = scalar_select %p3065_p10, 1, 0 }
  0x1d   : > { %s3479_s24 = scalar_select %p3069_p11, 1, 0 }
  0x1e   : > { %p2608_p12 = pneg %p3065_p10  ;;  %s2908_s30 = smov [#allocation9]  }
  0x1f   : > { %s477_s20 = sshll.u32 %s2908_s30, 4  ;;  %s2909_s19 = smov [#allocation6]   ;;  %s478_s20 = int_to_ptr.vmem [resolvable:$true] %s477_s20 }
  0x20   : > { %p3077_p13 = pnand %p3069_p11, %p2608_p12  ;;  %s463_s28 = sshll.u32 %s2909_s19, 4  ;;  %s3081_s28 = int_to_ptr.vmem [resolvable:$true] %s463_s28 }
  0x21   : > { %s3481_s6 = sld [smem:[#allocation26_spill]] }
  0x22   : > { %p3091_p1 = pneg %p3077_p13 }
  0x27   : > { %s2736_s26 = scalar_lea.hbm %s3481_s6, 16 }
  0x28   : > { %p2737_p0 = scmp.ne.s32.totalorder %s3481_s6, %s2736_s26  ;;  %p2743_p5 = scmp.lt.u32.totalorder %s2736_s26, %s3481_s6 }
  0x2a   : > { %p2739_p2 = pnand %p3091_p1, %p2737_p0 }
  0x2c   : > { %p2740_p3 = pneg %p2739_p2 }
  0x2e   : > { %p2745_p6 = pnand %p2743_p5, %p2740_p3 }
  0x30   : > { %2748 = shalt.err (!%p2745_p6)
}
  0x31   : > { %s2749_s22 = scalar_lea.vmem %s478_s20, 16  ;;  %s2756_s29 = scalar_lea.vmem %s478_s20, 32 }
  0x32   : > { %p2750_p7 = scmp.ne.s32.totalorder %s478_s20, %s2749_s22  ;;  %p2757_p8 = scmp.lt.s32.totalorder %s478_s20, %s478_s20 }
  0x33   : > { %p2758_p4 = scmp.lt.s32.totalorder %s2756_s29, %s2749_s22 }
  0x34   : > { %p2752_p9 = pnand %p2750_p7, %p3091_p1 }
  0x35   : > { %p2759_p11 = por %p2758_p4, %p2757_p8 }
  0x36   : > { %p2753_p12 = pneg %p2752_p9 }
  0x38   : > { %p2760_p10 = pnand %p2759_p11, %p2753_p12 }
  0x3a   : > { %2763 = shalt.err (!%p2760_p10)
}
  0x3b   : > { %2614 = dma.hbm_to_vmem [thread:$0]  (!%p3077_p13), %s3481_s6, 16, %s478_s20, [#allocation10]  }
  0x3c   : > { %s2764_s19 = scalar_lea.hbm %s3435_s4, 16 }
  0x3d   : > { %p2765_p0 = scmp.ne.s32.totalorder %s3435_s4, %s2764_s19  ;;  %p2771_p8 = scmp.lt.u32.totalorder %s2764_s19, %s3435_s4 }
  0x3f   : > { %p2767_p2 = pnand %p2765_p0, %p3091_p1 }
  0x41   : > { %p2768_p4 = pneg %p2767_p2 }
  0x43   : > { %p2773_p10 = pnand %p2771_p8, %p2768_p4 }
  0x45   : > { %2776 = shalt.err (!%p2773_p10)
}
  0x46   : > { %s2777_s20 = scalar_lea.vmem %s3081_s28, 16  ;;  %s2784_s16 = scalar_lea.vmem %s3081_s28, 32 }
  0x47   : > { %p2778_p11 = scmp.ne.s32.totalorder %s3081_s28, %s2777_s20  ;;  %p2785_p6 = scmp.lt.s32.totalorder %s3081_s28, %s3081_s28 }
  0x48   : > { %p2786_p7 = scmp.lt.s32.totalorder %s2784_s16, %s2777_s20 }
  0x49   : > { %p2780_p3 = pnand %p2778_p11, %p3091_p1 }
  0x4a   : > { %p2787_p9 = por %p2786_p7, %p2785_p6 }
  0x4b   : > { %p2781_p5 = pneg %p2780_p3 }
  0x4d   : > { %p2788_p12 = pnand %p2787_p9, %p2781_p5 }
  0x4f   : > { %2791 = shalt.err (!%p2788_p12)
}
  0x50   : > { %2611 = dma.hbm_to_vmem [thread:$0]  (!%p3077_p13), %s3435_s4, 16, %s3081_s28, [#allocation7]  }
  0x51   : > { %s2910_s0 = smov [#allocation11]   ;;  %s2792_s22 = scalar_lea.hbm %s3439_s8, 16 }
  0x52   : > { %s491_s17 = sshll.u32 %s2910_s0, 4  ;;  %p2793_p0 = scmp.ne.s32.totalorder %s3439_s8, %s2792_s22  ;;  %s492_s17 = int_to_ptr.vmem [resolvable:$true] %s491_s17 }
  0x53   : > { %p2799_p8 = scmp.lt.u32.totalorder %s2792_s22, %s3439_s8 }
  0x54   : > { %p2795_p2 = pnand %p2793_p0, %p3091_p1 }
  0x56   : > { %p2796_p4 = pneg %p2795_p2 }
  0x58   : > { %p2801_p10 = pnand %p2799_p8, %p2796_p4 }
  0x5a   : > { %2804 = shalt.err (!%p2801_p10)
}
  0x5b   : > { %s2805_s28 = scalar_lea.vmem %s492_s17, 16  ;;  %s2812_s1 = scalar_lea.vmem %s492_s17, 32 }
  0x5c   : > { %p2806_p11 = scmp.ne.s32.totalorder %s492_s17, %s2805_s28  ;;  %p2813_p6 = scmp.lt.s32.totalorder %s492_s17, %s492_s17 }
  0x5d   : > { %p2814_p7 = scmp.lt.s32.totalorder %s2812_s1, %s2805_s28 }
  0x5e   : > { %p2808_p3 = pnand %p2806_p11, %p3091_p1 }
  0x5f   : > { %p2815_p9 = por %p2814_p7, %p2813_p6 }
  0x60   : > { %p2809_p5 = pneg %p2808_p3 }
  0x62   : > { %p2816_p12 = pnand %p2815_p9, %p2809_p5 }
  0x64   : > { %2819 = shalt.err (!%p2816_p12)
}
  0x65   : > { %2617 = dma.hbm_to_vmem [thread:$0]  (!%p3077_p13), %s3439_s8, 16, %s492_s17, [#allocation10]  }
  0x66   : > { %p3483_p0 = scmp.ne.s32.totalorder %s3478_s23, 0 }
  0x67   : > { %p3484_p2 = scmp.ne.s32.totalorder (!%p3483_p0), %s3479_s24, 0 }
  0x68   : > { %538 = sbr.rel (%p3483_p0) target bundleno = 2518 (0x9d6), region = 88 }
  0x6f   : > { %2873 = dma.done.wait (%p3484_p2), [#allocation7], 16  }
  0x70   : > { %2875 = vsyncadd (%p3484_p2), [#allocation7], 4294967280 }
  0x71   : > { %2877 = dma.done.wait (%p3484_p2), [#allocation10], 32  }
  0x72   : > { %2879 = vsyncadd (%p3484_p2), [#allocation10], 4294967264  ;;  %p600_p1 = scmp.lt.s32.totalorder %s2898_s27, 1  ;;  %s3485_s17 = sld [smem:[#allocation24_spill]]  ;;  %vm611_vm0 = vcmask 261120   ;;  %v2688_v7 = vld [vmem:[%s3434_s3] sm:$0xff]  }
  0x73   : > { %v2911_v8 = vmov 0.0   ;;  %vm2912_vm1 = vmmov 0   ;;  %v2689_v9 = vld [vmem:[%s3434_s3 + $0x8] sm:$0xff]   ;;  %s3486_s28 = sld [smem:[#allocation25_spill]]  ;;  %v2373_v16 = vld [vmem:[%s3433_s2] ss:$0 sm:$0xff] }
  0x74   : > { %s601_s6 = scalar_select %p600_p1, %s2898_s27, 1  ;;  %2486 = vmatprep.subr.bf16.mxu0 %v2911_v8  ;;  %2490 = vmatprep.mubr.msk.bf16.mxu0 %vm2912_vm1, %v2911_v8  ;;  %v2690_v19 = vld [vmem:[%s3436_s5] sm:$0xff]   ;;  %v2691_v21 = vld [vmem:[%s3436_s5 + $0x8] sm:$0xff]   ;;  %v2374_v24 = vld [vmem:[#allocation6] ss:$0 sm:$0xff]  ;;  %vm840_vm2 = vcmask 60416  }
  0x75   : > { %2487 = vmatpush3.bf16.msra.mxu0 %v2688_v7  ;;  %2510 = vmatprep.subr.bf16.mxu1 %v2911_v8  ;;  %v2692_v22 = vld [vmem:[%s3438_s7] sm:$0xff]   ;;  %v2693_v23 = vld [vmem:[%s3438_s7 + $0x8] sm:$0xff]   ;;  %v2378_v32 = vld [vmem:[#allocation9] ss:$0 sm:$0xff]  ;;  %s2913_s19 = smov 120   ;;  %s2914_s22 = smov 112  }
  0x76   : > { %s2371_s18 = sshll.u32 %s601_s6, 3  ;;  %2488 = vmatprep.subr.bf16.mxu0 %v2911_v8  ;;  %2512 = vmatprep.mubr.msk.bf16.mxu1 %vm2912_vm1, %v2911_v8  ;;  %v2382_v39 = vld [vmem:[#allocation11] ss:$0 sm:$0xff]  ;;  %vm1403_vm3 = vcmask 64512   ;;  %s2915_s29 = smov 104   ;;  %vm1665_vm4 = vcmask 1043456  }
  0x77   : > { %s2916_s21 = smov 8   ;;  %s2917_s0 = smov 16   ;;  %vm1868_vm6 = vcmask 126016   ;;  %vm1877_vm7 = vcmask 191616   ;;  %vm1886_vm8 = vcmask 257216  }
  0x78   : > { %s606_s26 = scalar_lea.vmem %s3485_s17, %s2371_s18  ;;  %s2918_s6 = smov 24  }
  0x79   : > { %v3164_v0 = vld [vmem:[%s606_s26] sm:$0xff]  ;;  %2489 = vmatpush3.bf16.msra.mxu0 %v2689_v9  ;;  %s597_s1 = sand.u32 1, %s2890_s25   ;;  %s3487_s18 = sld [smem:[#allocation27_spill]] }
  0x7a   : > { %v612_v1 = vsel %vm611_vm0, %v3164_v0, 0.0  ;;  %2494 = vmatprep.subr.bf16.mxu0 %v2911_v8  ;;  %v2372_v14 = vld [vmem:[%s3486_s28] ss:$0 sm:$0xff]  ;;  %s3488_s30 = sld [smem:[#allocation21_spill]]  ;;  %s2437_s23 = sshll.u32 %s2898_s27, 7 }
  0x7b   : > { %613 = vadd.xlane.f32.xlu0 %v612_v1  ;;  %s2176_s27 = scalar_lea.sflag [#allocation8], %s597_s1  ;;  %s2919_s16 = smov [#allocation12]  }
  0x7c   : > { %s2824_s28 = sshll.u32 %s2919_s16, 4  ;;  %s2825_s28 = int_to_ptr.vmem [resolvable:$false] %s2824_s28 }
  0x80   : > { %p3490_p4 = scmp.ne.s32.totalorder %s3488_s30, 0 }
 0x108   : > { %v614_v2 = vpop.xlane.xlu0 %613 }
 0x109   : > { %v616_v3 = vmul.f32 0.03125, %v614_v2 }
 0x10b   : > { %v617_v4 = vsub.f32 %v3164_v0, %v616_v3  ;;  %v1398_v3 = vlaneseq }
 0x10d   : > { %v618_v5 = vmul.f32 %v617_v4, %v617_v4 }
 0x10f   : > { %v619_v6 = vsel %vm611_vm0, %v618_v5, 0.0  ;;  %v1401_v5 = vand.u32 127, %v1398_v3 }
 0x110   : > { %620 = vadd.xlane.f32.xlu0 %v619_v6 }
 0x19d   : > { %v621_v10 = vpop.xlane.xlu0 %620 }
 0x19e   : > { %v622_v11 = vmul.f32 0.03125, %v621_v10 }
 0x1a0   : > { %v623_v12 = vadd.f32 1e-05, %v622_v11 }
 0x1a2   : > { %2706 = vrsqrt.f32 %v623_v12 }
 0x1ac   : > { %v2707_v13 = vpop.eup %2706 }
 0x1ad   : > { %v625_v15 = vmul.f32 %v2707_v13, %v617_v4  ;;  %v1399_v4 = vshrl.u32 %v1398_v3, 7 }
 0x1af   : > { %v632_v17 = vmul.f32 %v2372_v14, %v625_v15  ;;  %vm1402_vm5 = vcmp.le.s32.totalorder %v1401_v5, %v1399_v4 }
 0x1b1   : > { %v639_v18 = vadd.f32 %v2373_v16, %v632_v17 }
 0x1b3   : > { %v640_v20 = vpack.c.bf16 %v639_v18, %v639_v18 }
 0x1b5   : > { %2491 = vmatmul.mubr.msk.bf16.vlgmr.msra.gmra.mrb[0].mxu0 %vm611_vm0, %v640_v20 }
 0x1b6   : > { %2495 = vmatpush3.bf16.msra.mxu0 %v2690_v19  ;;  %2498 = vmatprep.mubr.msk.bf16.mxu0 %vm2912_vm1, %v2911_v8 }
 0x1b7   : > { %2496 = vmatprep.subr.bf16.mxu0 %v2911_v8 }
 0x1ba   : > { %2497 = vmatpush3.bf16.msra.mxu0 %v2691_v21 }
 0x1bb   : > { %2502 = vmatprep.subr.bf16.mxu0 %v2911_v8 }
 0x1bd   : > { %2499 = vmatmul.mubr.msk.bf16.vlgmr.msra.gmra.mrb[4].mxu0 %vm611_vm0, %v640_v20 }
 0x1be   : > { %2503 = vmatpush3.bf16.msra.mxu0 %v2692_v22  ;;  %2506 = vmatprep.mubr.msk.bf16.mxu0 %vm2912_vm1, %v2911_v8 }
 0x1bf   : > { %2504 = vmatprep.subr.bf16.mxu0 %v2911_v8 }
 0x1c2   : > { %2505 = vmatpush3.bf16.msra.mxu0 %v2693_v23 }
 0x1c3   : > { %2516 = vmatprep.subr.bf16.mxu0 %v2911_v8 }
 0x1c5   : > { %2507 = vmatmul.mubr.msk.bf16.vlgmr.msra.gmra.mrb[8].mxu0 %vm611_vm0, %v640_v20 }
 0x1c6   : > { %2518 = vmatprep.mubr.msk.bf16.mxu0 %vm2912_vm1, %v2911_v8 }
 0x288   : > { %v701_v25 = vpop.f32.mrb[0].mxu0 }
 0x289   : > { %v702_v26 = vadd.f32 %v2374_v24, %v701_v25  ;;  %v2492_v27 = vpop.f32.mrb[1].mxu0 }
 0x28a   : > { %v704_v28 = vpop.f32.mrb[2].mxu0 }
 0x28b   : > { %v833_v29 = vmul.f32 0.35355338, %v702_v26  ;;  %v2493_v30 = vpop.f32.mrb[3].mxu0 }
 0x28d   : > { %v846_v31 = vpack.c.bf16 %v833_v29, %v833_v29 }
 0x28f   : > { %847 = vst.msk [vmem:[#allocation4] sm:$0xf] %vm840_vm2, %v846_v31  ;;  %870 = vrot.lane.b32.xlu0 %v846_v31, %s2913_s19 }
 0x290   : > { %v764_v33 = vpop.f32.mrb[4].mxu0 }
 0x291   : > { %v765_v34 = vadd.f32 %v2378_v32, %v764_v33  ;;  %v2500_v35 = vpop.f32.mrb[5].mxu0 }
 0x292   : > { %v767_v36 = vpop.f32.mrb[6].mxu0 }
 0x293   : > { %v835_v37 = vpack.c.bf16 %v765_v34, %v765_v34  ;;  %v2501_v38 = vpop.f32.mrb[7].mxu0 }
 0x295   : > { %841 = vst.msk [vmem:[#allocation2] sm:$0xf] %vm840_vm2, %v835_v37  ;;  %851 = vrot.lane.b32.xlu1 %v835_v37, %s2913_s19 }
 0x296   : > { %v911_v48 = vld [vmem:[#allocation4] sm:$0xf] }
 0x298   : > { %v827_v40 = vpop.f32.mrb[8].mxu0 }
 0x299   : > { %v828_v41 = vadd.f32 %v2382_v39, %v827_v40  ;;  %875 = vrot.lane.b32.xlu1 %v835_v37, %s2914_s22  ;;  %v2508_v42 = vpop.f32.mrb[9].mxu0 }
 0x29a   : > { %v830_v43 = vpop.f32.mrb[10].mxu0 }
 0x29b   : > { %v3220_v44 = vpack.c.bf16 %v828_v41, %v828_v41  ;;  %v2509_v45 = vpop.f32.mrb[11].mxu0 }
 0x29c   : > { %v1390_v46 = vld [vmem:[#allocation2] sm:$0xf] }
 0x29d   : > { %845 = vst.msk [vmem:[#allocation3] sm:$0xf] %vm840_vm2, %v3220_v44  ;;  %893 = vrot.lane.b32.xlu1 %v835_v37, %s2915_s29  ;;  %v1408_v47 = vsel %vm1403_vm3, %v1390_v46, 0 }
 0x29e   : > { %2511 = vmatpush3.bf16.xpose.msra.mxu1 %v1408_v47 }
 0x29f   : > { %2522 = vmatprep.subr.bf16.mxu1 %v2911_v8 }
 0x2a1   : > { %888 = vrot.lane.b32.xlu1 %v846_v31, %s2914_s22 }
 0x2a4   : > { %v1394_v62 = vld [vmem:[#allocation3] sm:$0xf] }
 0x2a5   : > { %906 = vrot.lane.b32.xlu1 %v846_v31, %s2915_s29  ;;  %2513 = vmatmul.mubr.msk.bf16.vlgmr.msra.gmra.mrb[0].mxu1 %vm1403_vm3, %v911_v48  ;;  %v1667_v1 = vsel %vm1665_vm4, %v1394_v62, 0 }
 0x2a6   : > { %2524 = vmatprep.mubr.msk.bf16.mxu1 %vm2912_vm1, %v2911_v8 }
 0x301   : > { %v871_v49 = vpop.permute.xlu0 %870 }
 0x302   : > { %874 = vst.msk [vmem:[#allocation4 + $0x4] sm:$0xf] %vm840_vm2, %v871_v49 }
 0x307   : > { %v852_v50 = vpop.permute.xlu1 %851 }
 0x308   : > { %2387 = vst.msk [vmem:[#allocation2 + $0x4] sm:$0xf] %vm840_vm2, %v852_v50 }
 0x309   : > { %v912_v59 = vld [vmem:[#allocation4 + $0x4] sm:$0xf] }
 0x30b   : > { %v876_v51 = vpop.permute.xlu1 %875 }
 0x30c   : > { %2391 = vst.msk [vmem:[#allocation2 + $0x8] sm:$0xf] %vm840_vm2, %v876_v51 }
 0x30f   : > { %v894_v52 = vpop.permute.xlu1 %893  ;;  %v1391_v53 = vld [vmem:[#allocation2 + $0x4] sm:$0xf] }
 0x310   : > { %2393 = vst.msk [vmem:[#allocation2 + $0xc] sm:$0xf] %vm840_vm2, %v894_v52  ;;  %v1454_v54 = vsel %vm1403_vm3, %v1391_v53, 0 }
 0x311   : > { %2517 = vmatpush3.bf16.xpose.msra.mxu0 %v1454_v54 }
 0x312   : > { %2528 = vmatprep.subr.bf16.mxu0 %v2911_v8 }
 0x313   : > { %v889_v55 = vpop.permute.xlu1 %888  ;;  %v1392_v56 = vld [vmem:[#allocation2 + $0x8] sm:$0xf] }
 0x314   : > { %892 = vst.msk [vmem:[#allocation4 + $0x8] sm:$0xf] %vm840_vm2, %v889_v55  ;;  %v1500_v57 = vsel %vm1403_vm3, %v1392_v56, 0 }
 0x315   : > { %2523 = vmatpush3.bf16.xpose.msra.mxu1 %v1500_v57 }
 0x316   : > { %2534 = vmatprep.subr.bf16.mxu1 %v2911_v8 }
 0x317   : > { %v907_v58 = vpop.permute.xlu1 %906  ;;  %v1393_v60 = vld [vmem:[#allocation2 + $0xc] sm:$0xf] }
 0x318   : > { %910 = vst.msk [vmem:[#allocation4 + $0xc] sm:$0xf] %vm840_vm2, %v907_v58  ;;  %2519 = vmatmul.mubr.msk.bf16.vlgmr.msra.gmra.mrb[12].mxu0 %vm1403_vm3, %v912_v59  ;;  %v1546_v61 = vsel %vm1403_vm3, %v1393_v60, 0 }
 0x319   : > { %2529 = vmatpush3.bf16.xpose.msra.mxu0 %v1546_v61  ;;  %2530 = vmatprep.mubr.msk.bf16.mxu0 %vm2912_vm1, %v2911_v8 }
 0x31a   : > { %2540 = vmatprep.subr.bf16.mxu0 %v2911_v8 }
 0x31b   : > { %v913_v63 = vld [vmem:[#allocation4 + $0x8] sm:$0xf] }
 0x31c   : > { %2525 = vmatmul.mubr.msk.bf16.vlgmr.msra.gmra.mrb[4].mxu1 %vm1403_vm3, %v913_v63 }
 0x31d   : > { %2535 = vmatpush3.bf16.msra.mxu1 %v1667_v1  ;;  %2536 = vmatprep.mubr.msk.bf16.mxu1 %vm2912_vm1, %v2911_v8 }
 0x31e   : > { %2546 = vmatprep.subr.bf16.mxu1 %v2911_v8 }
 0x31f   : > { %v914_v2 = vld [vmem:[#allocation4 + $0xc] sm:$0xf] }
 0x320   : > { %2531 = vmatmul.mubr.msk.bf16.vlgmr.msra.gmra.mrb[16].mxu0 %vm1403_vm3, %v914_v2 }
 0x321   : > { %2542 = vmatprep.mubr.msk.bf16.mxu0 %vm2912_vm1, %v2911_v8 }
 0x378   : > { %v1444_v6 = vpop.f32.mrb[0].mxu1 }
 0x379   : > { %v1590_v7 = vsel %vm1402_vm5, %v1444_v6, -1e+30  ;;  %v2514_v9 = vpop.f32.mrb[1].mxu1 }
 0x37a   : > { %v1447_v10 = vpop.f32.mrb[2].mxu1  ;;  %v1594_v11 = vsel %vm1403_vm3, %v1590_v7, -inf }
 0x37b   : > { %1595 = vmax.xlane.f32.xlu1 %v1594_v11  ;;  %v2515_v12 = vpop.f32.mrb[3].mxu1 }
 0x38c   : > { %882 = vrot.lane.b32.xlu1 %v3220_v44, %s2914_s22  ;;  %s3489_s22 = sld [smem:[#allocation28_spill]] }
 0x3eb   : > { %v1490_v13 = vpop.f32.mrb[12].mxu0 }
 0x3ec   : > { %v1591_v14 = vsel %vm1402_vm5, %v1490_v13, -1e+30  ;;  %v2520_v15 = vpop.f32.mrb[13].mxu0 }
 0x3ed   : > { %v1493_v16 = vpop.f32.mrb[14].mxu0  ;;  %v1597_v17 = vsel %vm1403_vm3, %v1591_v14, -inf }
 0x3ee   : > { %1598 = vmax.xlane.f32.xlu0 %v1597_v17  ;;  %v2521_v18 = vpop.f32.mrb[15].mxu0 }
 0x3ef   : > { %v1536_v19 = vpop.f32.mrb[4].mxu1 }
 0x3f0   : > { %v1592_v20 = vsel %vm1402_vm5, %v1536_v19, -1e+30  ;;  %v2526_v21 = vpop.f32.mrb[5].mxu1 }
 0x3f1   : > { %v1539_v22 = vpop.f32.mrb[6].mxu1  ;;  %v1600_v23 = vsel %vm1403_vm3, %v1592_v20, -inf }
 0x3f2   : > { %v2527_v24 = vpop.f32.mrb[7].mxu1  ;;  %1601 = vmax.xlane.f32.xlu1 %v1600_v23 }
 0x3f3   : > { %v1582_v25 = vpop.f32.mrb[16].mxu0 }
 0x3f4   : > { %v1593_v26 = vsel %vm1402_vm5, %v1582_v25, -1e+30  ;;  %v2532_v27 = vpop.f32.mrb[17].mxu0 }
 0x3f5   : > { %v1585_v28 = vpop.f32.mrb[18].mxu0  ;;  %v1603_v29 = vsel %vm1403_vm3, %v1593_v26, -inf }
 0x3f6   : > { %1604 = vmax.xlane.f32.xlu1 %v1603_v29  ;;  %v2533_v30 = vpop.f32.mrb[19].mxu0 }
 0x404   : > { %861 = vrot.lane.b32.xlu0 %v3220_v44, %s2913_s19 }
 0x407   : > { %900 = vrot.lane.b32.xlu1 %v3220_v44, %s2915_s29  ;;  %s3383_s29 = scalar_lea.hbm %s3489_s22, %s2437_s23 }
 0x408   : > { %v1596_v31 = vpop.xlane.xlu1 %1595 }
 0x409   : > { %v1606_v32 = vmax.f32 %v1596_v31, -1e+30 }
 0x40b   : > { %v1622_v33 = vsub.f32 %v1590_v7, %v1606_v32  ;;  %v1610_v5 = vsub.f32 -1e+30, %v1606_v32 }
 0x40c   : > { %v883_v34 = vpop.permute.xlu1 %882 }
 0x40d   : > { %v1626_v35 = vmul.f32 1.442695, %v1622_v33  ;;  %2392 = vst.msk [vmem:[#allocation3 + $0x8] sm:$0xf] %vm840_vm2, %v883_v34  ;;  %v1614_v6 = vmul.f32 1.442695, %v1610_v5 }
 0x40e   : > { %v2417_v5 = vld [vmem:[%s3441_s10] ss:$0 sm:$0xff] }
 0x40f   : > { %2708 = vpow2.f32 %v1626_v35 }
 0x414   : > { %v1396_v37 = vld [vmem:[#allocation3 + $0x8] sm:$0xf] }
 0x415   : > { %v1759_v39 = vsel %vm1665_vm4, %v1396_v37, 0 }
 0x419   : > { %v2709_v36 = vpop.eup %2708 }
 0x41a   : > { %v1658_v38 = vpack.c.bf16 %v2709_v36, %v2709_v36  ;;  %v1638_v4 = vsel %vm1403_vm3, %v2709_v36, 0.0 }
 0x41c   : > { %2537 = vmatmul.mubr.msk.bf16.vlgmr.msra.gmra.mrb[8].mxu1 %vm1403_vm3, %v1658_v38 }
 0x41d   : > { %2547 = vmatpush3.bf16.msra.mxu1 %v1759_v39  ;;  %2548 = vmatprep.mubr.msk.bf16.mxu1 %vm2912_vm1, %v2911_v8 }
 0x41e   : > { %2558 = vmatprep.subr.bf16.mxu1 %v2911_v8 }
 0x47b   : > { %v3275_v40 = vpop.xlane.xlu0 %1598 }
 0x47c   : > { %v1607_v41 = vmax.f32 %v3275_v40, -1e+30 }
 0x47e   : > { %v1623_v42 = vsub.f32 %v1591_v14, %v1607_v41  ;;  %v1611_v22 = vsub.f32 -1e+30, %v1607_v41 }
 0x47f   : > { %v3280_v43 = vpop.xlane.xlu1 %1601  ;;  %v862_v44 = vpop.permute.xlu0 %861 }
 0x480   : > { %v1628_v45 = vmul.f32 1.442695, %v1623_v42  ;;  %v1608_v46 = vmax.f32 %v3280_v43, -1e+30  ;;  %2389 = vst.msk [vmem:[#allocation3 + $0x4] sm:$0xf] %vm840_vm2, %v862_v44 }
 0x481   : > { %v1616_v23 = vmul.f32 1.442695, %v1611_v22  ;;  %v2694_v43 = vld [vmem:[%s3440_s9] sm:$0xff]  }
 0x482   : > { %v1624_v47 = vsub.f32 %v1592_v20, %v1608_v46  ;;  %2710 = vpow2.f32 %v1628_v45  ;;  %v1612_v24 = vsub.f32 -1e+30, %v1608_v46 }
 0x483   : > { %v1605_v48 = vpop.xlane.xlu1 %1604 }
 0x484   : > { %v1630_v49 = vmul.f32 1.442695, %v1624_v47  ;;  %v1609_v50 = vmax.f32 %v1605_v48, -1e+30  ;;  %v1618_v25 = vmul.f32 1.442695, %v1612_v24 }
 0x485   : > { %v2695_v47 = vld [vmem:[%s3440_s9 + $0x8] sm:$0xff]  }
 0x486   : > { %v1625_v51 = vsub.f32 %v1593_v26, %v1609_v50  ;;  %2712 = vpow2.f32 %v1630_v49  ;;  %v1613_v26 = vsub.f32 -1e+30, %v1609_v50 }
 0x487   : > { %v901_v52 = vpop.permute.xlu1 %900  ;;  %v1395_v53 = vld [vmem:[#allocation3 + $0x4] sm:$0xf] }
 0x488   : > { %v1632_v54 = vmul.f32 1.442695, %v1625_v51  ;;  %2394 = vst.msk [vmem:[#allocation3 + $0xc] sm:$0xf] %vm840_vm2, %v901_v52  ;;  %v1713_v55 = vsel %vm1665_vm4, %v1395_v53, 0 }
 0x489   : > { %2541 = vmatpush3.bf16.msra.mxu0 %v1713_v55  ;;  %v1620_v27 = vmul.f32 1.442695, %v1613_v26 }
 0x48a   : > { %2552 = vmatprep.subr.bf16.mxu0 %v2911_v8  ;;  %2714 = vpow2.f32 %v1632_v54 }
 0x48b   : > { %2716 = vpow2.f32 %v1614_v6 }
 0x48c   : > { %v2711_v56 = vpop.eup %2710 }
 0x48d   : > { %v1641_v57 = vsel %vm1403_vm3, %v2711_v56, 0.0  ;;  %v1659_v58 = vpack.c.bf16 %v2711_v56, %v2711_v56 }
 0x48e   : > { %1642 = vadd.xlane.f32.xlu0 %v1641_v57 }
 0x48f   : > { %v1397_v59 = vld [vmem:[#allocation3 + $0xc] sm:$0xf]  ;;  %2543 = vmatmul.mubr.msk.bf16.vlgmr.msra.gmra.mrb[20].mxu0 %vm1403_vm3, %v1659_v58 }
 0x490   : > { %v1805_v60 = vsel %vm1665_vm4, %v1397_v59, 0  ;;  %v2713_v61 = vpop.eup %2712  ;;  %2554 = vmatprep.mubr.msk.bf16.mxu0 %vm2912_vm1, %v2911_v8 }
 0x491   : > { %2553 = vmatpush3.bf16.msra.mxu0 %v1805_v60  ;;  %v1644_v62 = vsel %vm1403_vm3, %v2713_v61, 0.0  ;;  %v1660_v63 = vpack.c.bf16 %v2713_v61, %v2713_v61 }
 0x492   : > { %2566 = vmatprep.subr.bf16.mxu0 %v2911_v8  ;;  %1645 = vadd.xlane.f32.xlu1 %v1644_v62 }
 0x493   : > { %2549 = vmatmul.mubr.msk.bf16.vlgmr.msra.gmra.mrb[12].mxu1 %vm1403_vm3, %v1660_v63 }
 0x494   : > { %v2715_v1 = vpop.eup %2714  ;;  %2562 = vmatprep.mubr.msk.bf16.mxu1 %vm2912_vm1, %v2911_v8  ;;  %2559 = vmatpush3.bf16.msra.mxu1 %v2694_v43 }
 0x495   : > { %v1647_v2 = vsel %vm1403_vm3, %v2715_v1, 0.0  ;;  %v1661_v3 = vpack.c.bf16 %v2715_v1, %v2715_v1  ;;  %v2717_v7 = vpop.eup %2716  ;;  %2560 = vmatprep.subr.bf16.mxu1 %v2911_v8 }
 0x496   : > { %1648 = vadd.xlane.f32.xlu0 %v1647_v2  ;;  %v1634_v9 = vmul.f32 0.0, %v2717_v7 }
 0x497   : > { %2555 = vmatmul.mubr.msk.bf16.vlgmr.msra.gmra.mrb[24].mxu0 %vm1403_vm3, %v1661_v3 }
 0x498   : > { %2570 = vmatprep.mubr.msk.bf16.mxu0 %vm2912_vm1, %v2911_v8  ;;  %2561 = vmatpush3.bf16.msra.mxu1 %v2695_v47 }
 0x499   : > { %2574 = vmatprep.subr.bf16.mxu1 %v2911_v8 }
 0x49a   : > { %1639 = vadd.xlane.f32.xlu0 %v1638_v4 }
 0x4ef   : > { %v1703_v10 = vpop.f32.mrb[8].mxu1 }
 0x4f0   : > { %v1847_v11 = vadd.f32 %v1703_v10, %v1634_v9  ;;  %v2538_v12 = vpop.f32.mrb[9].mxu1 }
 0x4f1   : > { %v1706_v13 = vpop.f32.mrb[10].mxu1 }
 0x4f2   : > { %v2539_v14 = vpop.f32.mrb[11].mxu1 }
 0x51b   : > { %v1643_v15 = vpop.xlane.xlu0 %1642 }
 0x51f   : > { %v1646_v32 = vpop.xlane.xlu1 %1645 }
 0x523   : > { %v1649_v16 = vpop.xlane.xlu0 %1648 }
 0x527   : > { %v1640_v17 = vpop.xlane.xlu0 %1639 }
 0x528   : > { %v1650_v18 = vadd.f32 %v1640_v17, %v1634_v9 }
 0x52a   : > { %2718 = vrcp.f32 %v1650_v18 }
 0x52b   : > { %2720 = vpow2.f32 %v1616_v23 }
 0x52c   : > { %2722 = vpow2.f32 %v1618_v25  ;;  %v2421_v25 = vld [vmem:[%s3442_s11] ss:$0 sm:$0xff] }
 0x52d   : > { %2724 = vpow2.f32 %v1620_v27  ;;  %v2422_v27 = vld [vmem:[%s3443_s12] ss:$0 sm:$0xff] }
 0x534   : > { %v2719_v19 = vpop.eup %2718 }
 0x535   : > { %v1855_v20 = vmul.f32 %v2719_v19, %v1847_v11  ;;  %v2721_v28 = vpop.eup %2720  ;;  %v2696_v19 = vld [vmem:[%s3444_s13] sm:$0xff]  }
 0x536   : > { %v1635_v29 = vmul.f32 0.0, %v2721_v28  ;;  %v2723_v30 = vpop.eup %2722  ;;  %2567 = vmatpush3.bf16.msra.mxu0 %v2696_v19 }
 0x537   : > { %v1859_v21 = vpack.c.bf16 %v1855_v20, %v1855_v20  ;;  %v1636_v33 = vmul.f32 0.0, %v2723_v30  ;;  %v2725_v34 = vpop.eup %2724  ;;  %2568 = vmatprep.subr.bf16.mxu0 %v2911_v8  ;;  %v2698_v20 = vld [vmem:[%s3446_s15] sm:$0xff]  }
 0x538   : > { %v1651_v31 = vadd.f32 %v1643_v15, %v1635_v29  ;;  %v1637_v36 = vmul.f32 0.0, %v2725_v34  ;;  %v2702_v34 = vld [vmem:[%s3446_s15 + $0x20] sm:$0xff]  }
 0x539   : > { %1860 = vst.msk [vmem:[#allocation5] sm:$0xf] %vm840_vm2, %v1859_v21  ;;  %v1652_v35 = vadd.f32 %v1646_v32, %v1636_v33  ;;  %v2700_v32 = vld [vmem:[%s3446_s15 + $0x10] sm:$0xff]  }
 0x53a   : > { %2726 = vrcp.f32 %v1651_v31  ;;  %v1653_v37 = vadd.f32 %v1649_v16, %v1637_v36  ;;  %v2699_v31 = vld [vmem:[%s3446_s15 + $0x8] sm:$0xff]  }
 0x53b   : > { %2728 = vrcp.f32 %v1652_v35  ;;  %v2703_v35 = vld [vmem:[%s3446_s15 + $0x28] sm:$0xff]  }
 0x53c   : > { %2730 = vrcp.f32 %v1653_v37  ;;  %v2705_v37 = vld [vmem:[%s3446_s15 + $0x38] sm:$0xff]  }
 0x544   : > { %v2727_v41 = vpop.eup %2726 }
 0x545   : > { %v2729_v51 = vpop.eup %2728 }
 0x546   : > { %v2731_v59 = vpop.eup %2730 }
 0x562   : > { %v1749_v38 = vpop.f32.mrb[20].mxu0 }
 0x563   : > { %v1848_v39 = vadd.f32 %v1749_v38, %v1635_v29  ;;  %v2544_v40 = vpop.f32.mrb[21].mxu0  ;;  %v2423_v38 = vld [vmem:[%s3445_s14] ss:$0 sm:$0xff] }
 0x564   : > { %v1752_v42 = vpop.f32.mrb[22].mxu0 }
 0x565   : > { %v1856_v44 = vmul.f32 %v2727_v41, %v1848_v39  ;;  %v2545_v45 = vpop.f32.mrb[23].mxu0 }
 0x566   : > { %v1795_v46 = vpop.f32.mrb[12].mxu1 }
 0x567   : > { %v2443_v48 = vpack.c.bf16 %v1856_v44, %v1856_v44  ;;  %v1849_v49 = vadd.f32 %v1795_v46, %v1636_v33  ;;  %v2550_v50 = vpop.f32.mrb[13].mxu1  ;;  %v2701_v33 = vld [vmem:[%s3446_s15 + $0x18] sm:$0xff]  }
 0x568   : > { %v1798_v52 = vpop.f32.mrb[14].mxu1 }
 0x569   : > { %v1857_v53 = vmul.f32 %v2729_v51, %v1849_v49  ;;  %v2551_v54 = vpop.f32.mrb[15].mxu1  ;;  %1865 = vrot.lane.b32.xlu1 %v2443_v48, %s2916_s21  ;;  %s2370_s21 = sshll.u32 %s597_s1, 3 }
 0x56a   : > { %v1841_v55 = vpop.f32.mrb[24].mxu0  ;;  %s599_s17 = scalar_lea.vmem [#allocation12], %s2370_s21  ;;  %s2826_s21 = scalar_lea.vmem %s2825_s28, 256 }
 0x56b   : > { %v2444_v56 = vpack.c.bf16 %v1857_v53, %v1857_v53  ;;  %v1850_v57 = vadd.f32 %v1841_v55, %v1637_v36  ;;  %v2556_v58 = vpop.f32.mrb[25].mxu0  ;;  %v2704_v36 = vld [vmem:[%s3446_s15 + $0x30] sm:$0xff]   ;;  %v2427_v53 = vld [vmem:[%s3487_s18] ss:$0 sm:$0xff]  ;;  %s2190_s26 = sshll.u32 %s599_s17, 4  ;;  %s3385_s26 = int_to_ptr.vmem [resolvable:$true] %s2190_s26 }
 0x56c   : > { %v1844_v60 = vpop.f32.mrb[26].mxu0  ;;  %s2820_s20 = scalar_lea.vmem %s3385_s26, 128  ;;  %p2827_p11 = scmp.lt.s32.totalorder %s3385_s26, %s2825_s28 }
 0x56d   : > { %v1858_v61 = vmul.f32 %v2731_v59, %v1850_v57  ;;  %1874 = vrot.lane.b32.xlu0 %v2444_v56, %s2917_s0  ;;  %v2557_v62 = vpop.f32.mrb[27].mxu0  ;;  %p2821_p13 = scmp.ne.s32.totalorder %s3385_s26, %s2820_s20  ;;  %p2828_p3 = scmp.lt.s32.totalorder %s2826_s21, %s2820_s20 }
 0x56f   : > { %v2445_v63 = vpack.c.bf16 %v1858_v61, %v1858_v61  ;;  %p2822_p8 = pnand %p2821_p13, %p3490_p4  ;;  %p2829_p5 = por %p2828_p3, %p2827_p11 }
 0x571   : > { %1883 = vrot.lane.b32.xlu1 %v2445_v63, %s2918_s6  ;;  %p2823_p10 = pneg %p2822_p8 }
 0x573   : > { %p2830_p6 = pnand %p2829_p5, %p2823_p10 }
 0x5db   : > { %v1866_v1 = vpop.permute.xlu1 %1865 }
 0x5dc   : > { %1869 = vst.msk [vmem:[#allocation5] sm:$0xf] %vm1868_vm6, %v1866_v1 }
 0x5df   : > { %v1875_v2 = vpop.permute.xlu0 %1874 }
 0x5e0   : > { %1878 = vst.msk [vmem:[#allocation5] sm:$0xf] %vm1877_vm7, %v1875_v2 }
 0x5e3   : > { %v1884_v3 = vpop.permute.xlu1 %1883 }
 0x5e4   : > { %1887 = vst.msk [vmem:[#allocation5] sm:$0xf] %vm1886_vm8, %v1884_v3 }
 0x5eb   : > { %v1888_v4 = vld [vmem:[#allocation5] sm:$0xf] }
 0x5ec   : > { %2563 = vmatmul.mubr.msk.bf16.vlgmr.msra.gmra.mrb[16].mxu1 %vm611_vm0, %v1888_v4 }
 0x5ed   : > { %2590 = vmatprep.mubr.msk.bf16.mxu1 %vm2912_vm1, %v2911_v8  ;;  %2575 = vmatpush3.bf16.msra.mxu1 %v2698_v20 }
 0x5ee   : > { %2576 = vmatprep.subr.bf16.mxu1 %v2911_v8 }
 0x5f1   : > { %2577 = vmatpush3.bf16.msra.mxu1 %v2699_v31 }
 0x5f2   : > { %2578 = vmatprep.subr.bf16.mxu1 %v2911_v8 }
 0x5f5   : > { %2579 = vmatpush3.bf16.msra.mxu1 %v2700_v32 }
 0x5f6   : > { %2580 = vmatprep.subr.bf16.mxu1 %v2911_v8 }
 0x5f9   : > { %2581 = vmatpush3.bf16.msra.mxu1 %v2701_v33 }
 0x5fa   : > { %2582 = vmatprep.subr.bf16.mxu1 %v2911_v8 }
 0x5fd   : > { %2583 = vmatpush3.bf16.msra.mxu1 %v2702_v34 }
 0x5fe   : > { %2584 = vmatprep.subr.bf16.mxu1 %v2911_v8 }
 0x601   : > { %2585 = vmatpush3.bf16.msra.mxu1 %v2703_v35 }
 0x602   : > { %2586 = vmatprep.subr.bf16.mxu1 %v2911_v8 }
 0x605   : > { %2587 = vmatpush3.bf16.msra.mxu1 %v2704_v36 }
 0x606   : > { %2588 = vmatprep.subr.bf16.mxu1 %v2911_v8 }
 0x609   : > { %2589 = vmatpush3.bf16.msra.mxu1 %v2705_v37 }
 0x6bf   : > { %v1949_v6 = vpop.f32.mrb[16].mxu1 }
 0x6c0   : > { %v1950_v7 = vadd.f32 %v2417_v5, %v1949_v6  ;;  %v2564_v9 = vpop.f32.mrb[17].mxu1 }
 0x6c1   : > { %v1952_v10 = vpop.f32.mrb[18].mxu1 }
 0x6c2   : > { %v3320_v11 = vadd.f32 %v1950_v7, %v3164_v0  ;;  %v2565_v12 = vpop.f32.mrb[19].mxu1  ;;  %v2697_v0 = vld [vmem:[%s3444_s13 + $0x8] sm:$0xff]  }
 0x6c3   : > { %2569 = vmatpush3.bf16.msra.mxu0 %v2697_v0 }
 0x6c4   : > { %v1958_v13 = vsel %vm611_vm0, %v3320_v11, 0.0 }
 0x6c5   : > { %1959 = vadd.xlane.f32.xlu1 %v1958_v13 }
 0x752   : > { %v1960_v14 = vpop.xlane.xlu1 %1959 }
 0x753   : > { %v1961_v15 = vmul.f32 0.03125, %v1960_v14 }
 0x755   : > { %v1962_v16 = vsub.f32 %v3320_v11, %v1961_v15 }
 0x757   : > { %v1963_v17 = vmul.f32 %v1962_v16, %v1962_v16 }
 0x759   : > { %v1964_v18 = vsel %vm611_vm0, %v1963_v17, 0.0 }
 0x75a   : > { %1965 = vadd.xlane.f32.xlu0 %v1964_v18 }
 0x7e7   : > { %v1966_v21 = vpop.xlane.xlu0 %1965 }
 0x7e8   : > { %v1967_v22 = vmul.f32 0.03125, %v1966_v21 }
 0x7ea   : > { %v1968_v23 = vadd.f32 1e-05, %v1967_v22 }
 0x7ec   : > { %2732 = vrsqrt.f32 %v1968_v23 }
 0x7f6   : > { %v2733_v24 = vpop.eup %2732 }
 0x7f7   : > { %v1970_v26 = vmul.f32 %v2733_v24, %v1962_v16 }
 0x7f9   : > { %v1977_v28 = vmul.f32 %v2421_v25, %v1970_v26 }
 0x7fb   : > { %v1984_v29 = vadd.f32 %v2422_v27, %v1977_v28 }
 0x7fd   : > { %v1985_v30 = vpack.c.bf16 %v1984_v29, %v1984_v29 }
 0x7ff   : > { %2571 = vmatmul.mubr.msk.bf16.vlgmr.msra.gmra.mrb[28].mxu0 %vm611_vm0, %v1985_v30 }
 0x8d2   : > { %v2046_v39 = vpop.f32.mrb[28].mxu0 }
 0x8d3   : > { %v2047_v40 = vadd.f32 %v2423_v38, %v2046_v39  ;;  %v2572_v41 = vpop.f32.mrb[29].mxu0 }
 0x8d4   : > { %v2049_v42 = vpop.f32.mrb[30].mxu0 }
 0x8d5   : > { %v2053_v43 = vmul.f32 0.044715, %v2047_v40  ;;  %v2573_v44 = vpop.f32.mrb[31].mxu0  ;;  %v2052_v8 = vmul.f32 0.5, %v2047_v40 }
 0x8d7   : > { %v2054_v45 = vmul.f32 %v2053_v43, %v2047_v40 }
 0x8d9   : > { %v2055_v46 = vmul.f32 %v2054_v45, %v2047_v40 }
 0x8db   : > { %v2056_v47 = vadd.f32 %v2055_v46, %v2047_v40 }
 0x8dd   : > { %v2057_v48 = vmul.f32 0.7978846, %v2056_v47 }
 0x8df   : > { %2734 = vtanh.f32 %v2057_v48 }
 0x8e9   : > { %v2735_v49 = vpop.eup %2734 }
 0x8ea   : > { %v2059_v50 = vadd.f32 1.0, %v2735_v49 }
 0x8ec   : > { %v2060_v51 = vmul.f32 %v2059_v50, %v2052_v8 }
 0x8ee   : > { %v2061_v52 = vpack.c.bf16 %v2060_v51, %v2060_v51 }
 0x8f0   : > { %2591 = vmatmul.mubr.bf16.vlgmr.msra.gmra.mrb[20].mxu1 %v2061_v52 }
 0x9c3   : > { %v2167_v54 = vpop.f32.mrb[20].mxu1 }
 0x9c4   : > { %v2168_v55 = vadd.f32 %v2427_v53, %v2167_v54  ;;  %v2592_v56 = vpop.f32.mrb[21].mxu1 }
 0x9c5   : > { %v2170_v57 = vpop.f32.mrb[22].mxu1 }
 0x9c6   : > { %v2173_v58 = vadd.f32 %v2168_v55, %v3320_v11  ;;  %v2593_v59 = vpop.f32.mrb[23].mxu1 }
 0x9c8   : > { %2174 = vst.msk [vmem:[%s599_s17] sm:$0xff] %vm611_vm0, %v2173_v58 }
 0x9c9   : > { %2833 = shalt.err (!%p2830_p6)
}
 0x9ca   : > { %s2834_s1 = scalar_lea.hbm %s3383_s29, 128  ;;  %s2838_s18 = scalar_lea.hbm %s3489_s22, 256 }
 0x9cb   : > { %p2835_p7 = scmp.ne.s32.totalorder %s3383_s29, %s2834_s1  ;;  %p2839_p0 = scmp.lt.u32.totalorder %s3383_s29, %s3489_s22 }
 0x9cc   : > { %p2840_p2 = scmp.lt.u32.totalorder %s2838_s18, %s2834_s1  ;;  %p2842_p13 = scmp.lt.u32.totalorder %s2834_s1, %s3383_s29 }
 0x9cd   : > { %p2836_p9 = pnand %p2835_p7, %p3490_p4 }
 0x9ce   : > { %p2841_p1 = por %p2840_p2, %p2839_p0 }
 0x9cf   : > { %p2837_p12 = pneg %p2836_p9 }
 0x9d0   : > { %p2843_p8 = por %p2842_p13, %p2841_p1 }
 0x9d2   : > { %p2844_p10 = pnand %p2843_p8, %p2837_p12 }
 0x9d4   : > { %2847 = shalt.err (!%p2844_p10)
}
 0x9d5   : > { %2606 = dma.vmem_to_hbm [thread:$0]  (%p3490_p4), %s3385_s26, 128, %s3383_s29, %s2176_s27  }
 0x9d6 PF: > { %s3491_s24 = sld [smem:[#allocation19_spill]]  ;;  %s3492_s19 = sld [smem:[#allocation16_spill]] }
 0x9d7   : > { %s3493_s20 = sld [smem:[#allocation22_spill]] }
 0x9dc   : > { %p2628_p11 = scmp.ge.s32.totalorder %s3491_s24, 2  ;;  %s2202_s16 = sand.u32 1, %s3492_s19  }
 0x9dd   : > { %p3494_p3 = scmp.ne.s32.totalorder %s3493_s20, 0  ;;  %s2203_s28 = scalar_lea.sflag [#allocation8], %s2202_s16 }
 0x9df   : > { %p2619_p5 = pnand %p2628_p11, %p3494_p3 }
 0x9e1   : > { %2881 = dma.done.wait (!%p2619_p5), %s2203_s28, 128  }
 0x9e2   : > { %2883 = vsyncadd (!%p2619_p5), %s2203_s28, 4294967168  ;;  %s32_s29 = sadd.s32 1, %s3491_s24   ;;  %s3495_s21 = sld [smem:[#allocation17_spill]] }
 0x9e3   : > { %p29_p6 = scmp.ge.s32.totalorder %s32_s29, 4   ;;  %s3496_s26 = sld [smem:[#allocation23_spill]] }
 0x9e4   : > { %s3497_s27 = sld [smem:[#allocation18_spill]]  ;;  %s3498_s28 = sld [smem:[#allocation20_spill]] }
 0x9e5   : > { %s3499_s24 = smov %s2890_s25  ;;  %31 = sbr.rel (!%p29_p6) target bundleno = 12 (0xc), region = 167 }
 0x9e8   : > { %s3500_s25 = smov %s3495_s21 }
 0x9ec   :  { %2208 = vsyncpa [#allocation7], 1 }
 0x9ed   :  { %2210 = vsyncpa [#allocation7 + $0x1], 1 }
 0x9ee   :  { %2211 = vsyncpa [#allocation10], 1 }
 0x9ef   :  { %2212 = vsyncpa [#allocation8], 1 }
 0x9f0   :  { %2214 = vsyncpa [#allocation8 + $0x1], 1 }

</bundles_post_ra>
